<compile_context>
chip_gen: v5e
topology: v5e:2x2
jax: 0.10.0
libtpu: 0.0.40
codegen_flags: <defaults>
</compile_context>

<pallas_src>
import numpy as np
import jax
import jax.numpy as jnp
from jax.experimental import pallas as pl
from jax.experimental.pallas import tpu as pltpu

MAXIMUM_BOUNDING_BOXES = 5


# ----------------------------------------------------------------------------
# Fused Pallas kernel: 50x50 stride-50 conv + both 3x3/pad-1 heads (+ tanh)
# ----------------------------------------------------------------------------
def _make_fused_rpn_kernel(bbox_cols):
    def kernel(p_ref, w1_ref, b1_ref, s_ref, wh_ref, bh_ref, out_ref):
        # Stage 1: 50x50 stride-50 conv as a single MXU matmul -> (P, 2).
        y = (
            jnp.dot(p_ref[...], w1_ref[...], preferred_element_type=jnp.float32)
            + b1_ref[...]
        )
        # Stage 2: fused bbox + class heads.  For tap k, S_k is a (P, P) 0/1
        # shift matrix (zero padding baked in) and W_k the (2, bbox_cols+na)
        # slice of the merged head weights:
        #     z = sum_k S_k @ (y @ W_k) + b
        # The intermediate feature map never round-trips through HBM.
        z = jnp.zeros(out_ref.shape, jnp.float32)
        for k in range(9):
            yk = jnp.dot(y, wh_ref[k], preferred_element_type=jnp.float32)
            z = z + jnp.dot(s_ref[k], yk, preferred_element_type=jnp.float32)
        z = z + bh_ref[...]
        # tanh only on the class columns (last na columns of the packed output).
        col = jax.lax.broadcasted_iota(jnp.int32, z.shape, 1)
        out_ref[...] = jnp.where(col < bbox_cols, z, jnp.tanh(z)).astype(out_ref.dtype)

    return kernel


def fused_rpn(patches, w1, b1, shifts, wh, bh, bbox_cols):
    P = patches.shape[0]
    Cout = wh.shape[-1]
    vmem = pl.BlockSpec(memory_space=pltpu.MemorySpace.VMEM)
    # Grid-less call: single invocation, whole (small) operands resident in VMEM,
    # no pipelining machinery / double buffering needed.
    return pl.pallas_call(
        _make_fused_rpn_kernel(bbox_cols),
        out_shape=jax.ShapeDtypeStruct((P, Cout), jnp.float32),
        in_specs=[vmem] * 6,
        out_specs=vmem,
    )(patches, w1, b1, shifts, wh, bh)


# ----------------------------------------------------------------------------
# Post-processing helpers (functional JAX versions of the reference semantics)
# ----------------------------------------------------------------------------
def apply_bounding_box_offsets_to_anchors(anchors, offsets):
    # First argument is the one that is updated/returned (as in the reference).
    x0 = anchors[:, 0] + offsets[:, 0] - offsets[:, 2] * 0.5
    y0 = anchors[:, 1] - offsets[:, 3] * 0.5
    x1 = anchors[:, 2] + offsets[:, 0] + offsets[:, 2] * 0.5
    y1 = anchors[:, 3] + offsets[:, 3] * 0.5
    return jnp.stack([x0, y0, x1, y1], axis=1)


def clip_boxes_to_image(boxes, size):
    # torchvision.ops.clip_boxes_to_image: size = (height, width);
    # x coords (cols 0, 2) clamp to [0, width], y coords (cols 1, 3) to [0, height].
    height, width = size
    hi = jnp.array([width, height, width, height], jnp.float32)
    return jnp.clip(boxes, 0.0, hi)


# ----------------------------------------------------------------------------
# RegionPurposalNetwork (Pallas version)
# ----------------------------------------------------------------------------
class RegionPurposalNetworkPallas:
    def __init__(self, image_dimensions, key):
        self.bounding_box_limit = 5
        self.image_dimensions = image_dimensions
        self.input_shape = (image_dimensions[0] / 4, image_dimensions[1] / 4)
        self.cnn_output_shape = (image_dimensions[0] / 200, image_dimensions[1] / 200)
        self.class_confidence = 0.95

        sizes = [1.0, 2.0]
        aspect_ratios = [0.5, 1.0, 2.0]
        self.num_anchors = len(sizes) * len(aspect_ratios)
        Hf, Wf = int(self.cnn_output_shape[0]), int(self.cnn_output_shape[1])
        self.Hf, self.Wf = Hf, Wf
        self.P = Hf * Wf
        na = self.num_anchors

        # Anchor boxes: (num_anchors, 4, Hf, Wf)  (matches the reference construction)
        ind = jnp.array(
            [
                [0.0, s * -(ar - 1) / 2, s, s * (1 + (ar - 1) / 2)]
                for s in sizes
                for ar in aspect_ratios
            ],
            jnp.float32,
        )
        x_off = jnp.broadcast_to(jnp.arange(Hf, dtype=jnp.float32)[:, None], (Hf, Wf))
        y_off = jnp.broadcast_to(jnp.arange(Wf, dtype=jnp.float32)[None, :], (Hf, Wf))
        pos = jnp.stack([x_off, y_off, x_off, y_off], axis=0)          # (4, Hf, Wf)
        self.anchor_boxes = ind[:, :, None, None] + pos[None]          # (na, 4, Hf, Wf)

        # Parameter init (PyTorch Conv2d default: U(-1/sqrt(fan_in), +1/sqrt(fan_in)))
        k1, k2, k3, k4, k5, k6 = jax.random.split(key, 6)

        def conv_init(kw_, kb_, shape):
            fan_in = shape[1] * shape[2] * shape[3]
            bound = 1.0 / float(np.sqrt(fan_in))
            w = jax.random.uniform(kw_, shape, jnp.float32, -bound, bound)
            b = jax.random.uniform(kb_, (shape[0],), jnp.float32, -bound, bound)
            return w, b

        self.w_conv, self.b_conv = conv_init(k1, k2, (2, 1, 50, 50))
        self.w_bbox, self.b_bbox = conv_init(k3, k4, (na * 4, 2, 3, 3))
        self.w_cls, self.b_cls = conv_init(k5, k6, (na, 2, 3, 3))

        # --- precomputed kernel-layout weights (built once, not per forward) ---
        self.w1 = self.w_conv.reshape(2, 50 * 50).T                    # (2500, 2)
        self.b1 = self.b_conv.reshape(1, 2)                            # (1, 2)

        # The reference indexes bounding_box_offsets.reshape(na,4,Hf,Wf)[0],
        # i.e. only the first 4 bbox output channels ever reach the output, so
        # the merged head keeps just those 4 + the na class channels.
        self.bbox_cols = 4
        wh = jnp.concatenate(
            [self.w_bbox[: self.bbox_cols].transpose(2, 3, 1, 0),      # (3,3,2,4)
             self.w_cls.transpose(2, 3, 1, 0)],                        # (3,3,2,na)
            axis=-1,
        )
        self.Cout = self.bbox_cols + na                                # 10
        self.wh = wh.reshape(9, 2, self.Cout)                          # per-tap (2, 10)
        self.bh = jnp.concatenate(
            [self.b_bbox[: self.bbox_cols], self.b_cls]
        ).reshape(1, self.Cout)

        # 0/1 shift matrices realizing the 3x3/pad-1 spatial window as matmuls.
        shifts = np.zeros((9, self.P, self.P), np.float32)
        for kh in range(3):
            for kw in range(3):
                k = kh * 3 + kw
                for i in range(Hf):
                    for j in range(Wf):
                        si, sj = i + kh - 1, j + kw - 1
                        if 0 <= si < Hf and 0 <= sj < Wf:
                            shifts[k, i * Wf + j, si * Wf + sj] = 1.0
        self.shifts = jnp.asarray(shifts)

        sx = self.input_shape[0] / self.cnn_output_shape[0]
        sy = self.input_shape[1] / self.cnn_output_shape[1]
        self.scale_vec = jnp.array([sx, sy, sx, sy], jnp.float32)

        # The entire device-side path is jitted once -> single dispatch per forward.
        self._device_forward_jit = jax.jit(self._device_forward)

    def _device_forward(self, X):
        Hf, Wf, na, P = self.Hf, self.Wf, self.num_anchors, self.P
        # im2col of the 50x50/stride-50 conv (layout plumbing done by XLA):
        # rows = (h, w) positions, cols = (kh, kw) receptive-field offsets.
        patches = (
            X[0, 0]
            .reshape(Hf, 50, Wf, 50)
            .transpose(0, 2, 1, 3)
            .reshape(P, 50 * 50)
        )
        out = fused_rpn(
            patches, self.w1, self.b1, self.shifts, self.wh, self.bh, self.bbox_cols
        )
        off_flat = out[:, : self.bbox_cols]        # (P, 4)
        cls_flat = out[:, self.bbox_cols :]        # (P, na)

        # Reference semantics: bounding_box_offsets.reshape(na,4,Hf,Wf)[0] is the
        # first 4 channels, broadcast against the (na,1,Hf,Wf) class mask.
        off0 = off_flat.T.reshape(4, Hf, Wf)
        cls_hw = cls_flat.T.reshape(na, Hf, Wf)
        mask = (cls_hw > self.class_confidence)[:, None, :, :]

        common = (na, 4, Hf, Wf)
        mask_b = jnp.broadcast_to(mask, common).reshape(-1)
        anch_b = self.anchor_boxes.reshape(-1)
        off_b = jnp.broadcast_to(off0[None], common).reshape(-1)

        # torch.masked_select order = row-major flat order of the broadcast
        # tensors.  Static-size nonzero (cumsum-based) is cheaper than the
        # previous stable argsort and keeps shapes static under jit.
        idx = jnp.nonzero(mask_b, size=4 * MAXIMUM_BOUNDING_BOXES, fill_value=0)[0]
        sel_off = off_b[idx].reshape(MAXIMUM_BOUNDING_BOXES, 4)
        sel_anch = anch_b[idx].reshape(MAXIMUM_BOUNDING_BOXES, 4)
        count = jnp.sum(mask_b.astype(jnp.int32))

        # NOTE: argument order matches the reference module exactly (offsets first).
        preds = apply_bounding_box_offsets_to_anchors(sel_off, sel_anch)
        preds = clip_boxes_to_image(preds, size=(float(Hf), float(Wf)))
        preds = preds * self.scale_vec
        return preds, count

    def forward(self, X):
        # X: (1, 1, H, W) NCHW with H = W = image_dimensions/4
        N, Cin, H, W = X.shape
        assert N == 1 and Cin == 1
        preds, count = self._device_forward_jit(X)
        preds, count = jax.block_until_ready((preds, count))
        # TODO(synk): torch.masked_select yields a data-dependent-length proposal
        # list; only this final truncation / None packaging runs on host (5x4 + scalar).
        rows = min(int(count) // 4, MAXIMUM_BOUNDING_BOXES)
        if rows == 0:
            return [None]
        return [np.asarray(preds[:rows])]


if __name__ == "__main__":
    # Small, module-consistent sizes: image_dims=(800,800) -> input 200x200,
    # feature map 4x4 (P=16), 6 anchors, packed head output (16, 10).
    image_dimensions = (800, 800)
    key = jax.random.PRNGKey(0)
    pkey, xkey = jax.random.split(key)

    rpn = RegionPurposalNetworkPallas(image_dimensions, pkey)
    H = int(image_dimensions[0] / 4)
    W = int(image_dimensions[1] / 4)
    X = jax.random.normal(xkey, (1, 1, H, W), jnp.float32)

    proposals = rpn.forward(X)   # list (len 1) of (K<=5, 4) arrays or [None]
    print("KERNEL_OK")
</pallas_src>

<mosaic_0001>
module attributes {stable_mosaic.version = 11 : i64} {
  func.func @kernel(%arg0: memref<16x2500xf32, #tpu.memory_space<vmem>>, %arg1: memref<2500x2xf32, #tpu.memory_space<vmem>>, %arg2: memref<1x2xf32, #tpu.memory_space<vmem>>, %arg3: memref<9x16x16xf32, #tpu.memory_space<vmem>>, %arg4: memref<9x2x10xf32, #tpu.memory_space<vmem>>, %arg5: memref<1x10xf32, #tpu.memory_space<vmem>>, %arg6: memref<16x10xf32, #tpu.memory_space<vmem>>) attributes {dimension_semantics = [], scalar_prefetch = 0 : i64, scratch_operands = 0 : i64, tpu.core_type = #tpu.core_type<tc>} {
    %c0 = arith.constant 0 : index
    %c0_0 = arith.constant 0 : index
    %0 = vector.load %arg0[%c0, %c0_0] : memref<16x2500xf32, #tpu.memory_space<vmem>>, vector<16x2500xf32>
    %c0_1 = arith.constant 0 : index
    %c0_2 = arith.constant 0 : index
    %1 = vector.load %arg1[%c0_1, %c0_2] : memref<2500x2xf32, #tpu.memory_space<vmem>>, vector<2500x2xf32>
    %cst = arith.constant dense<0.000000e+00> : vector<16x2xf32>
    %2 = tpu.matmul %0, %1, %cst {dimension_numbers = #tpu.dot_dimension_numbers<[1], [0], [0], [1], [0, 0, 1, 1], [], []>} : vector<16x2500xf32>, vector<2500x2xf32>, vector<16x2xf32> -> vector<16x2xf32>
    %c0_3 = arith.constant 0 : index
    %c0_4 = arith.constant 0 : index
    %3 = vector.load %arg2[%c0_3, %c0_4] : memref<1x2xf32, #tpu.memory_space<vmem>>, vector<1x2xf32>
    %4 = vector.broadcast %3 : vector<1x2xf32> to vector<16x2xf32>
    %5 = arith.addf %2, %4 : vector<16x2xf32>
    %cst_5 = arith.constant 0.000000e+00 : f32
    %6 = vector.broadcast %cst_5 : f32 to vector<16x10xf32>
    %c0_6 = arith.constant 0 : index
    %c0_7 = arith.constant 0 : index
    %c0_8 = arith.constant 0 : index
    %7 = vector.load %arg4[%c0_6, %c0_7, %c0_8] : memref<9x2x10xf32, #tpu.memory_space<vmem>>, vector<1x2x10xf32>
    %8 = vector.shape_cast %7 : vector<1x2x10xf32> to vector<2x10xf32>
    %cst_9 = arith.constant dense<0.000000e+00> : vector<16x10xf32>
    %9 = tpu.matmul %5, %8, %cst_9 {dimension_numbers = #tpu.dot_dimension_numbers<[1], [0], [0], [1], [0, 0, 1, 1], [], []>} : vector<16x2xf32>, vector<2x10xf32>, vector<16x10xf32> -> vector<16x10xf32>
    %c0_10 = arith.constant 0 : index
    %c0_11 = arith.constant 0 : index
    %c0_12 = arith.constant 0 : index
    %10 = vector.load %arg3[%c0_10, %c0_11, %c0_12] : memref<9x16x16xf32, #tpu.memory_space<vmem>>, vector<1x16x16xf32>
    %11 = vector.shape_cast %10 : vector<1x16x16xf32> to vector<16x16xf32>
    %cst_13 = arith.constant dense<0.000000e+00> : vector<16x10xf32>
    %12 = tpu.matmul %11, %9, %cst_13 {dimension_numbers = #tpu.dot_dimension_numbers<[1], [0], [0], [1], [0, 0, 1, 1], [], []>} : vector<16x16xf32>, vector<16x10xf32>, vector<16x10xf32> -> vector<16x10xf32>
    %13 = arith.addf %6, %12 : vector<16x10xf32>
    %c1 = arith.constant 1 : index
    %c0_14 = arith.constant 0 : index
    %c0_15 = arith.constant 0 : index
    %14 = vector.load %arg4[%c1, %c0_14, %c0_15] : memref<9x2x10xf32, #tpu.memory_space<vmem>>, vector<1x2x10xf32>
    %15 = vector.shape_cast %14 : vector<1x2x10xf32> to vector<2x10xf32>
    %cst_16 = arith.constant dense<0.000000e+00> : vector<16x10xf32>
    %16 = tpu.matmul %5, %15, %cst_16 {dimension_numbers = #tpu.dot_dimension_numbers<[1], [0], [0], [1], [0, 0, 1, 1], [], []>} : vector<16x2xf32>, vector<2x10xf32>, vector<16x10xf32> -> vector<16x10xf32>
    %c1_17 = arith.constant 1 : index
    %c0_18 = arith.constant 0 : index
    %c0_19 = arith.constant 0 : index
    %17 = vector.load %arg3[%c1_17, %c0_18, %c0_19] : memref<9x16x16xf32, #tpu.memory_space<vmem>>, vector<1x16x16xf32>
    %18 = vector.shape_cast %17 : vector<1x16x16xf32> to vector<16x16xf32>
    %cst_20 = arith.constant dense<0.000000e+00> : vector<16x10xf32>
    %19 = tpu.matmul %18, %16, %cst_20 {dimension_numbers = #tpu.dot_dimension_numbers<[1], [0], [0], [1], [0, 0, 1, 1], [], []>} : vector<16x16xf32>, vector<16x10xf32>, vector<16x10xf32> -> vector<16x10xf32>
    %20 = arith.addf %13, %19 : vector<16x10xf32>
    %c2 = arith.constant 2 : index
    %c0_21 = arith.constant 0 : index
    %c0_22 = arith.constant 0 : index
    %21 = vector.load %arg4[%c2, %c0_21, %c0_22] : memref<9x2x10xf32, #tpu.memory_space<vmem>>, vector<1x2x10xf32>
    %22 = vector.shape_cast %21 : vector<1x2x10xf32> to vector<2x10xf32>
    %cst_23 = arith.constant dense<0.000000e+00> : vector<16x10xf32>
    %23 = tpu.matmul %5, %22, %cst_23 {dimension_numbers = #tpu.dot_dimension_numbers<[1], [0], [0], [1], [0, 0, 1, 1], [], []>} : vector<16x2xf32>, vector<2x10xf32>, vector<16x10xf32> -> vector<16x10xf32>
    %c2_24 = arith.constant 2 : index
    %c0_25 = arith.constant 0 : index
    %c0_26 = arith.constant 0 : index
    %24 = vector.load %arg3[%c2_24, %c0_25, %c0_26] : memref<9x16x16xf32, #tpu.memory_space<vmem>>, vector<1x16x16xf32>
    %25 = vector.shape_cast %24 : vector<1x16x16xf32> to vector<16x16xf32>
    %cst_27 = arith.constant dense<0.000000e+00> : vector<16x10xf32>
    %26 = tpu.matmul %25, %23, %cst_27 {dimension_numbers = #tpu.dot_dimension_numbers<[1], [0], [0], [1], [0, 0, 1, 1], [], []>} : vector<16x16xf32>, vector<16x10xf32>, vector<16x10xf32> -> vector<16x10xf32>
    %27 = arith.addf %20, %26 : vector<16x10xf32>
    %c3 = arith.constant 3 : index
    %c0_28 = arith.constant 0 : index
    %c0_29 = arith.constant 0 : index
    %28 = vector.load %arg4[%c3, %c0_28, %c0_29] : memref<9x2x10xf32, #tpu.memory_space<vmem>>, vector<1x2x10xf32>
    %29 = vector.shape_cast %28 : vector<1x2x10xf32> to vector<2x10xf32>
    %cst_30 = arith.constant dense<0.000000e+00> : vector<16x10xf32>
    %30 = tpu.matmul %5, %29, %cst_30 {dimension_numbers = #tpu.dot_dimension_numbers<[1], [0], [0], [1], [0, 0, 1, 1], [], []>} : vector<16x2xf32>, vector<2x10xf32>, vector<16x10xf32> -> vector<16x10xf32>
    %c3_31 = arith.constant 3 : index
    %c0_32 = arith.constant 0 : index
    %c0_33 = arith.constant 0 : index
    %31 = vector.load %arg3[%c3_31, %c0_32, %c0_33] : memref<9x16x16xf32, #tpu.memory_space<vmem>>, vector<1x16x16xf32>
    %32 = vector.shape_cast %31 : vector<1x16x16xf32> to vector<16x16xf32>
    %cst_34 = arith.constant dense<0.000000e+00> : vector<16x10xf32>
    %33 = tpu.matmul %32, %30, %cst_34 {dimension_numbers = #tpu.dot_dimension_numbers<[1], [0], [0], [1], [0, 0, 1, 1], [], []>} : vector<16x16xf32>, vector<16x10xf32>, vector<16x10xf32> -> vector<16x10xf32>
    %34 = arith.addf %27, %33 : vector<16x10xf32>
    %c4 = arith.constant 4 : index
    %c0_35 = arith.constant 0 : index
    %c0_36 = arith.constant 0 : index
    %35 = vector.load %arg4[%c4, %c0_35, %c0_36] : memref<9x2x10xf32, #tpu.memory_space<vmem>>, vector<1x2x10xf32>
    %36 = vector.shape_cast %35 : vector<1x2x10xf32> to vector<2x10xf32>
    %cst_37 = arith.constant dense<0.000000e+00> : vector<16x10xf32>
    %37 = tpu.matmul %5, %36, %cst_37 {dimension_numbers = #tpu.dot_dimension_numbers<[1], [0], [0], [1], [0, 0, 1, 1], [], []>} : vector<16x2xf32>, vector<2x10xf32>, vector<16x10xf32> -> vector<16x10xf32>
    %c4_38 = arith.constant 4 : index
    %c0_39 = arith.constant 0 : index
    %c0_40 = arith.constant 0 : index
    %38 = vector.load %arg3[%c4_38, %c0_39, %c0_40] : memref<9x16x16xf32, #tpu.memory_space<vmem>>, vector<1x16x16xf32>
    %39 = vector.shape_cast %38 : vector<1x16x16xf32> to vector<16x16xf32>
    %cst_41 = arith.constant dense<0.000000e+00> : vector<16x10xf32>
    %40 = tpu.matmul %39, %37, %cst_41 {dimension_numbers = #tpu.dot_dimension_numbers<[1], [0], [0], [1], [0, 0, 1, 1], [], []>} : vector<16x16xf32>, vector<16x10xf32>, vector<16x10xf32> -> vector<16x10xf32>
    %41 = arith.addf %34, %40 : vector<16x10xf32>
    %c5 = arith.constant 5 : index
    %c0_42 = arith.constant 0 : index
    %c0_43 = arith.constant 0 : index
    %42 = vector.load %arg4[%c5, %c0_42, %c0_43] : memref<9x2x10xf32, #tpu.memory_space<vmem>>, vector<1x2x10xf32>
    %43 = vector.shape_cast %42 : vector<1x2x10xf32> to vector<2x10xf32>
    %cst_44 = arith.constant dense<0.000000e+00> : vector<16x10xf32>
    %44 = tpu.matmul %5, %43, %cst_44 {dimension_numbers = #tpu.dot_dimension_numbers<[1], [0], [0], [1], [0, 0, 1, 1], [], []>} : vector<16x2xf32>, vector<2x10xf32>, vector<16x10xf32> -> vector<16x10xf32>
    %c5_45 = arith.constant 5 : index
    %c0_46 = arith.constant 0 : index
    %c0_47 = arith.constant 0 : index
    %45 = vector.load %arg3[%c5_45, %c0_46, %c0_47] : memref<9x16x16xf32, #tpu.memory_space<vmem>>, vector<1x16x16xf32>
    %46 = vector.shape_cast %45 : vector<1x16x16xf32> to vector<16x16xf32>
    %cst_48 = arith.constant dense<0.000000e+00> : vector<16x10xf32>
    %47 = tpu.matmul %46, %44, %cst_48 {dimension_numbers = #tpu.dot_dimension_numbers<[1], [0], [0], [1], [0, 0, 1, 1], [], []>} : vector<16x16xf32>, vector<16x10xf32>, vector<16x10xf32> -> vector<16x10xf32>
    %48 = arith.addf %41, %47 : vector<16x10xf32>
    %c6 = arith.constant 6 : index
    %c0_49 = arith.constant 0 : index
    %c0_50 = arith.constant 0 : index
    %49 = vector.load %arg4[%c6, %c0_49, %c0_50] : memref<9x2x10xf32, #tpu.memory_space<vmem>>, vector<1x2x10xf32>
    %50 = vector.shape_cast %49 : vector<1x2x10xf32> to vector<2x10xf32>
    %cst_51 = arith.constant dense<0.000000e+00> : vector<16x10xf32>
    %51 = tpu.matmul %5, %50, %cst_51 {dimension_numbers = #tpu.dot_dimension_numbers<[1], [0], [0], [1], [0, 0, 1, 1], [], []>} : vector<16x2xf32>, vector<2x10xf32>, vector<16x10xf32> -> vector<16x10xf32>
    %c6_52 = arith.constant 6 : index
    %c0_53 = arith.constant 0 : index
    %c0_54 = arith.constant 0 : index
    %52 = vector.load %arg3[%c6_52, %c0_53, %c0_54] : memref<9x16x16xf32, #tpu.memory_space<vmem>>, vector<1x16x16xf32>
    %53 = vector.shape_cast %52 : vector<1x16x16xf32> to vector<16x16xf32>
    %cst_55 = arith.constant dense<0.000000e+00> : vector<16x10xf32>
    %54 = tpu.matmul %53, %51, %cst_55 {dimension_numbers = #tpu.dot_dimension_numbers<[1], [0], [0], [1], [0, 0, 1, 1], [], []>} : vector<16x16xf32>, vector<16x10xf32>, vector<16x10xf32> -> vector<16x10xf32>
    %55 = arith.addf %48, %54 : vector<16x10xf32>
    %c7 = arith.constant 7 : index
    %c0_56 = arith.constant 0 : index
    %c0_57 = arith.constant 0 : index
    %56 = vector.load %arg4[%c7, %c0_56, %c0_57] : memref<9x2x10xf32, #tpu.memory_space<vmem>>, vector<1x2x10xf32>
    %57 = vector.shape_cast %56 : vector<1x2x10xf32> to vector<2x10xf32>
    %cst_58 = arith.constant dense<0.000000e+00> : vector<16x10xf32>
    %58 = tpu.matmul %5, %57, %cst_58 {dimension_numbers = #tpu.dot_dimension_numbers<[1], [0], [0], [1], [0, 0, 1, 1], [], []>} : vector<16x2xf32>, vector<2x10xf32>, vector<16x10xf32> -> vector<16x10xf32>
    %c7_59 = arith.constant 7 : index
    %c0_60 = arith.constant 0 : index
    %c0_61 = arith.constant 0 : index
    %59 = vector.load %arg3[%c7_59, %c0_60, %c0_61] : memref<9x16x16xf32, #tpu.memory_space<vmem>>, vector<1x16x16xf32>
    %60 = vector.shape_cast %59 : vector<1x16x16xf32> to vector<16x16xf32>
    %cst_62 = arith.constant dense<0.000000e+00> : vector<16x10xf32>
    %61 = tpu.matmul %60, %58, %cst_62 {dimension_numbers = #tpu.dot_dimension_numbers<[1], [0], [0], [1], [0, 0, 1, 1], [], []>} : vector<16x16xf32>, vector<16x10xf32>, vector<16x10xf32> -> vector<16x10xf32>
    %62 = arith.addf %55, %61 : vector<16x10xf32>
    %c8 = arith.constant 8 : index
    %c0_63 = arith.constant 0 : index
    %c0_64 = arith.constant 0 : index
    %63 = vector.load %arg4[%c8, %c0_63, %c0_64] : memref<9x2x10xf32, #tpu.memory_space<vmem>>, vector<1x2x10xf32>
    %64 = vector.shape_cast %63 : vector<1x2x10xf32> to vector<2x10xf32>
    %cst_65 = arith.constant dense<0.000000e+00> : vector<16x10xf32>
    %65 = tpu.matmul %5, %64, %cst_65 {dimension_numbers = #tpu.dot_dimension_numbers<[1], [0], [0], [1], [0, 0, 1, 1], [], []>} : vector<16x2xf32>, vector<2x10xf32>, vector<16x10xf32> -> vector<16x10xf32>
    %c8_66 = arith.constant 8 : index
    %c0_67 = arith.constant 0 : index
    %c0_68 = arith.constant 0 : index
    %66 = vector.load %arg3[%c8_66, %c0_67, %c0_68] : memref<9x16x16xf32, #tpu.memory_space<vmem>>, vector<1x16x16xf32>
    %67 = vector.shape_cast %66 : vector<1x16x16xf32> to vector<16x16xf32>
    %cst_69 = arith.constant dense<0.000000e+00> : vector<16x10xf32>
    %68 = tpu.matmul %67, %65, %cst_69 {dimension_numbers = #tpu.dot_dimension_numbers<[1], [0], [0], [1], [0, 0, 1, 1], [], []>} : vector<16x16xf32>, vector<16x10xf32>, vector<16x10xf32> -> vector<16x10xf32>
    %69 = arith.addf %62, %68 : vector<16x10xf32>
    %c0_70 = arith.constant 0 : index
    %c0_71 = arith.constant 0 : index
    %70 = vector.load %arg5[%c0_70, %c0_71] : memref<1x10xf32, #tpu.memory_space<vmem>>, vector<1x10xf32>
    %71 = vector.broadcast %70 : vector<1x10xf32> to vector<16x10xf32>
    %72 = arith.addf %69, %71 : vector<16x10xf32>
    %73 = tpu.iota {dimensions = array<i32: 1>} : vector<16x10xi32>
    %c4_i32 = arith.constant 4 : i32
    %74 = vector.broadcast %c4_i32 : i32 to vector<16x10xi32>
    %75 = arith.cmpi slt, %73, %74 : vector<16x10xi32>
    %76 = math.tanh %72 : vector<16x10xf32>
    %77 = arith.select %75, %72, %76 : vector<16x10xi1>, vector<16x10xf32>
    %c0_72 = arith.constant 0 : index
    %c0_73 = arith.constant 0 : index
    %78 = vector.load %arg6[%c0_72, %c0_73] : memref<16x10xf32, #tpu.memory_space<vmem>>, vector<16x10xf32>
    tpu.vector_store %arg6[%c0_72, %c0_73], %77 {strides = array<i32>} : memref<16x10xf32, #tpu.memory_space<vmem>>, vector<16x10xf32>,
    return
  }
}

</mosaic_0001>

<bundles_post_ra>
// kernel: squeeze.11
= control target key start
LH: loop header
LB: loop body
LE: loop exit
PB: predicated region body
PF: predicated region fallthrough
CT: control target
= control target key end

     0   :  { %2 = vsyncpa [#allocation1], 0  ;;  %s2514_s8 = smov [#allocation0]   ;;  %s3767_s0 = inlined_call_operand.hbm [shape: f32[1,1,200,200], index: 0, kind: input, shape index: {}]   ;;  %s3768_s1 = inlined_call_operand.vmem [shape: f32[4,50,4,50], index: 1, kind: output, shape index: {}]  }
   0x1   :  { %s6_s0 = sshll.u32 %s3767_s0, 4  ;;  %s8_s9 = sshll.u32 %s2514_s8, 4  ;;  %s7_s0 = int_to_ptr.hbm [resolvable:$true] %s6_s0  ;;  %s9_s9 = int_to_ptr.vmem [resolvable:$true] %s8_s9 }
   0x2   :  { %11 = dma.hbm_to_vmem [thread:$0]  %s7_s0, 6400, %s9_s9, [#allocation1]  }
   0x3   :  { %2512 = dma.done.wait [#allocation1], 6400  }
   0x4   :  { %2513 = vsyncadd [#allocation1], 4294960896  ;;  %v2531_v0 = vld [vmem:[#allocation0 + $0x48] sm:$0xff]   ;;  %s2515_s10 = smov 106   ;;  %v2543_v3 = vld [vmem:[#allocation0 + $0x58] sm:$0xff]   ;;  %vm15_vm0 = vcmask 408576  }
   0x5   :  { %v2533_v1 = vld [vmem:[#allocation0 + $0x28] sm:$0xff]   ;;  %224 = vrot.lane.b32.xlu2 %v2531_v0, %s2515_s10  ;;  %v2545_v4 = vld [vmem:[#allocation0 + $0x38] sm:$0xff]   ;;  %v2627_v24 = vld [vmem:[#allocation0 + $0x40] sm:$0xff]   ;;  %s2516_s11 = smov 78   ;;  %vm638_vm1 = vcmask 818176   ;;  %s2517_s12 = smov 28  }
   0x6   :  { %v2535_v2 = vld [vmem:[#allocation0 + $0x8] sm:$0xff]   ;;  %206 = vrot.lane.b32.xlu1 %v2533_v1, %s2515_s10  ;;  %v2547_v5 = vld [vmem:[#allocation0 + $0x18] sm:$0xff]   ;;  %43 = vst.msk [vmem:[#allocation2 + $0x100] ss:$8 sm:$0xf] %vm15_vm0, %v2627_v24   ;;  %v2631_v25 = vld [vmem:[#allocation0 + $0x50] sm:$0xff]   ;;  %v711_v0 = vsel %vm638_vm1, %v2531_v0, %v2627_v24 }
   0x7   :  { %188 = vrot.lane.b32.xlu0 %v2535_v2, %s2515_s10  ;;  %v2555_v6 = vld [vmem:[#allocation0 + $0x88] sm:$0xff]   ;;  %v2557_v7 = vld [vmem:[#allocation0 + $0x78] sm:$0xff]   ;;  %45 = vst.msk [vmem:[#allocation2 + $0x100] ss:$8 sm:$0xf0] %vm15_vm0, %v2627_v24   ;;  %v2637_v26 = vld [vmem:[#allocation0 + $0x10] sm:$0xff]  }
   0x8   :  { %v2559_v8 = vld [vmem:[#allocation0 + $0x68] sm:$0xff]   ;;  %v2567_v9 = vld [vmem:[#allocation0 + $0xb8] sm:$0xff]   ;;  %50 = vst.msk [vmem:[#allocation2 + $0x140] ss:$8 sm:$0xf] %vm15_vm0, %v2631_v25   ;;  %v2639_v27 = vld [vmem:[#allocation0] sm:$0xff]  }
   0x9   :  { %v2569_v10 = vld [vmem:[#allocation0 + $0xa8] sm:$0xff]   ;;  %v2571_v11 = vld [vmem:[#allocation0 + $0x98] sm:$0xff]   ;;  %v2641_v28 = vld [vmem:[#allocation0 + $0x80] sm:$0xff]   ;;  %52 = vst.msk [vmem:[#allocation2 + $0x140] ss:$8 sm:$0xf0] %vm15_vm0, %v2631_v25   ;;  %v639_v59 = vsel %vm638_vm1, %v2535_v2, %v2639_v27  ;;  %v657_v2 = vsel %vm638_vm1, %v2547_v5, %v2637_v26 }
   0xa   :  { %v2579_v12 = vld [vmem:[#allocation0 + $0xe8] sm:$0xff]   ;;  %v2581_v13 = vld [vmem:[#allocation0 + $0xd8] sm:$0xff]   ;;  %71 = vst.msk [vmem:[#allocation2 + $0x200] ss:$8 sm:$0xf] %vm15_vm0, %v2641_v28   ;;  %v2649_v30 = vld [vmem:[#allocation0 + $0x20] sm:$0xff]  }
   0xb   :  { %v2583_v14 = vld [vmem:[#allocation0 + $0xc8] sm:$0xff]   ;;  %v2591_v15 = vld [vmem:[#allocation0 + $0x118] sm:$0xff]   ;;  %73 = vst.msk [vmem:[#allocation2 + $0x200] ss:$8 sm:$0xf0] %vm15_vm0, %v2641_v28   ;;  %v2657_v31 = vld [vmem:[#allocation0 + $0xb0] sm:$0xff]   ;;  %v675_v1 = vsel %vm638_vm1, %v2533_v1, %v2649_v30 }
   0xc   :  { %v2593_v16 = vld [vmem:[#allocation0 + $0x108] sm:$0xff]   ;;  %v2595_v17 = vld [vmem:[#allocation0 + $0xf8] sm:$0xff]   ;;  %29 = vst.msk [vmem:[#allocation2 + $0x80] ss:$8 sm:$0xf] %vm15_vm0, %v2649_v30   ;;  %v2671_v32 = vld [vmem:[#allocation0 + $0x30] sm:$0xff]  }
   0xd   :  { %233 = vrot.lane.b32.xlu2 %v2543_v3, %s2515_s10  ;;  %v2603_v18 = vld [vmem:[#allocation0 + $0x148] sm:$0xff]   ;;  %v2605_v19 = vld [vmem:[#allocation0 + $0x138] sm:$0xff]   ;;  %94 = vst.msk [vmem:[#allocation2 + $0x2c0] ss:$8 sm:$0xf0] %vm15_vm0, %v2657_v31   ;;  %v2673_v33 = vld [vmem:[#allocation0 + $0x70] sm:$0xff]   ;;  %v693_v63 = vsel %vm638_vm1, %v2545_v4, %v2671_v32  ;;  %v729_v3 = vsel %vm638_vm1, %v2543_v3, %v2631_v25 }
   0xe   :  { %215 = vrot.lane.b32.xlu1 %v2545_v4, %s2515_s10  ;;  %v2607_v20 = vld [vmem:[#allocation0 + $0x128] sm:$0xff]   ;;  %v2615_v21 = vld [vmem:[#allocation0 + $0x178] sm:$0xff]   ;;  %92 = vst.msk [vmem:[#allocation2 + $0x2c0] ss:$8 sm:$0xf] %vm15_vm0, %v2657_v31   ;;  %v2679_v34 = vld [vmem:[#allocation0 + $0x60] sm:$0xff]  }
   0xf   :  { %197 = vrot.lane.b32.xlu0 %v2547_v5, %s2515_s10  ;;  %v2617_v22 = vld [vmem:[#allocation0 + $0x168] sm:$0xff]   ;;  %v2619_v23 = vld [vmem:[#allocation0 + $0x158] sm:$0xff]   ;;  %31 = vst.msk [vmem:[#allocation2 + $0x80] ss:$8 sm:$0xf0] %vm15_vm0, %v2649_v30   ;;  %v2687_v35 = vld [vmem:[#allocation0 + $0xe0] sm:$0xff]  }
  0x10   :  { %v2645_v29 = vld [vmem:[#allocation0 + $0x188] sm:$0xff]   ;;  %24 = vst.msk [vmem:[#allocation2 + $0x40] ss:$8 sm:$0xf0] %vm15_vm0, %v2637_v26   ;;  %v2697_v36 = vld [vmem:[#allocation0 + $0xa0] sm:$0xff]   ;;  %v2703_v37 = vld [vmem:[#allocation0 + $0x90] sm:$0xff]  }
  0x11   :  { %22 = vst.msk [vmem:[#allocation2 + $0x40] ss:$8 sm:$0xf] %vm15_vm0, %v2637_v26   ;;  %v2709_v38 = vld [vmem:[#allocation0 + $0xd0] sm:$0xff]   ;;  %v2721_v39 = vld [vmem:[#allocation0 + $0xc0] sm:$0xff]   ;;  %vm642_vm2 = vcmask 228352  }
  0x12   :  { %64 = vst.msk [vmem:[#allocation2 + $0x1c0] ss:$8 sm:$0xf] %vm15_vm0, %v2673_v33   ;;  %v2727_v40 = vld [vmem:[#allocation0 + $0x100] sm:$0xff]   ;;  %v2733_v41 = vld [vmem:[#allocation0 + $0xf0] sm:$0xff]   ;;  %vm647_vm3 = vcmask 408800  }
  0x13   :  { %66 = vst.msk [vmem:[#allocation2 + $0x1c0] ss:$8 sm:$0xf0] %vm15_vm0, %v2673_v33   ;;  %v2739_v42 = vld [vmem:[#allocation0 + $0x130] sm:$0xff]   ;;  %v2747_v43 = vld [vmem:[#allocation0 + $0x140] sm:$0xff]  }
  0x14   :  { %57 = vst.msk [vmem:[#allocation2 + $0x180] ss:$8 sm:$0xf] %vm15_vm0, %v2679_v34   ;;  %v2759_v45 = vld [vmem:[#allocation0 + $0x120] sm:$0xff]   ;;  %v2777_v47 = vld [vmem:[#allocation0 + $0x150] sm:$0xff]  }
  0x15   :  { %260 = vrot.lane.b32.xlu2 %v2555_v6, %s2515_s10  ;;  %115 = vst.msk [vmem:[#allocation2 + $0x380] ss:$8 sm:$0xf0] %vm15_vm0, %v2687_v35   ;;  %v2765_v46 = vld [vmem:[#allocation0 + $0x160] sm:$0xff]   ;;  %v2799_v49 = vld [vmem:[#allocation0 + $0x110] sm:$0xff]   ;;  %v783_v6 = vsel %vm638_vm1, %v2555_v6, %v2641_v28 }
  0x16   :  { %251 = vrot.lane.b32.xlu1 %v2557_v7, %s2515_s10  ;;  %113 = vst.msk [vmem:[#allocation2 + $0x380] ss:$8 sm:$0xf] %vm15_vm0, %v2687_v35   ;;  %v2807_v51 = vld [vmem:[#allocation0 + $0x180] sm:$0xff]   ;;  %v2813_v52 = vld [vmem:[#allocation0 + $0x170] sm:$0xff]   ;;  %v765_v7 = vsel %vm638_vm1, %v2557_v7, %v2673_v33 }
  0x17   :  { %242 = vrot.lane.b32.xlu0 %v2559_v8, %s2515_s10  ;;  %59 = vst.msk [vmem:[#allocation2 + $0x180] ss:$8 sm:$0xf0] %vm15_vm0, %v2679_v34   ;;  %v747_v8 = vsel %vm638_vm1, %v2559_v8, %v2679_v34 }
  0x18   :  { %85 = vst.msk [vmem:[#allocation2 + $0x280] ss:$8 sm:$0xf] %vm15_vm0, %v2697_v36  }
  0x19   :  { %87 = vst.msk [vmem:[#allocation2 + $0x280] ss:$8 sm:$0xf0] %vm15_vm0, %v2697_v36  }
  0x1a   :  { %78 = vst.msk [vmem:[#allocation2 + $0x240] ss:$8 sm:$0xf] %vm15_vm0, %v2703_v37  }
  0x1b   :  { %80 = vst.msk [vmem:[#allocation2 + $0x240] ss:$8 sm:$0xf0] %vm15_vm0, %v2703_v37  }
  0x1c   :  { %106 = vst.msk [vmem:[#allocation2 + $0x340] ss:$8 sm:$0xf] %vm15_vm0, %v2709_v38  }
  0x1d   :  { %287 = vrot.lane.b32.xlu2 %v2567_v9, %s2515_s10  ;;  %108 = vst.msk [vmem:[#allocation2 + $0x340] ss:$8 sm:$0xf0] %vm15_vm0, %v2709_v38   ;;  %v837_v9 = vsel %vm638_vm1, %v2567_v9, %v2657_v31 }
  0x1e   :  { %278 = vrot.lane.b32.xlu1 %v2569_v10, %s2515_s10  ;;  %101 = vst.msk [vmem:[#allocation2 + $0x300] ss:$8 sm:$0xf0] %vm15_vm0, %v2721_v39   ;;  %v819_v10 = vsel %vm638_vm1, %v2569_v10, %v2697_v36 }
  0x1f   :  { %269 = vrot.lane.b32.xlu0 %v2571_v11, %s2515_s10  ;;  %99 = vst.msk [vmem:[#allocation2 + $0x300] ss:$8 sm:$0xf] %vm15_vm0, %v2721_v39   ;;  %v801_v11 = vsel %vm638_vm1, %v2571_v11, %v2703_v37 }
  0x20   :  { %127 = vst.msk [vmem:[#allocation2 + $0x400] ss:$8 sm:$0xf] %vm15_vm0, %v2727_v40  }
  0x21   :  { %129 = vst.msk [vmem:[#allocation2 + $0x400] ss:$8 sm:$0xf0] %vm15_vm0, %v2727_v40  }
  0x22   :  { %122 = vst.msk [vmem:[#allocation2 + $0x3c0] ss:$8 sm:$0xf0] %vm15_vm0, %v2733_v41  }
  0x23   :  { %120 = vst.msk [vmem:[#allocation2 + $0x3c0] ss:$8 sm:$0xf] %vm15_vm0, %v2733_v41  }
  0x24   :  { %148 = vst.msk [vmem:[#allocation2 + $0x4c0] ss:$8 sm:$0xf] %vm15_vm0, %v2739_v42  }
  0x25   :  { %314 = vrot.lane.b32.xlu2 %v2579_v12, %s2515_s10  ;;  %155 = vst.msk [vmem:[#allocation2 + $0x500] ss:$8 sm:$0xf] %vm15_vm0, %v2747_v43   ;;  %v891_v12 = vsel %vm638_vm1, %v2579_v12, %v2687_v35 }
  0x26   :  { %305 = vrot.lane.b32.xlu1 %v2581_v13, %s2515_s10  ;;  %157 = vst.msk [vmem:[#allocation2 + $0x500] ss:$8 sm:$0xf0] %vm15_vm0, %v2747_v43   ;;  %v873_v13 = vsel %vm638_vm1, %v2581_v13, %v2709_v38 }
  0x27   :  { %296 = vrot.lane.b32.xlu0 %v2583_v14, %s2515_s10  ;;  %150 = vst.msk [vmem:[#allocation2 + $0x4c0] ss:$8 sm:$0xf0] %vm15_vm0, %v2739_v42   ;;  %v855_v14 = vsel %vm638_vm1, %v2583_v14, %v2721_v39 }
  0x28   :  { %143 = vst.msk [vmem:[#allocation2 + $0x480] ss:$8 sm:$0xf0] %vm15_vm0, %v2759_v45  }
  0x29   :  { %141 = vst.msk [vmem:[#allocation2 + $0x480] ss:$8 sm:$0xf] %vm15_vm0, %v2759_v45  }
  0x2a   :  { %169 = vst.msk [vmem:[#allocation2 + $0x580] ss:$8 sm:$0xf] %vm15_vm0, %v2765_v46  }
  0x2b   :  { %171 = vst.msk [vmem:[#allocation2 + $0x580] ss:$8 sm:$0xf0] %vm15_vm0, %v2765_v46  }
  0x2c   :  { %164 = vst.msk [vmem:[#allocation2 + $0x540] ss:$8 sm:$0xf0] %vm15_vm0, %v2777_v47  }
  0x2d   :  { %341 = vrot.lane.b32.xlu2 %v2591_v15, %s2515_s10  ;;  %162 = vst.msk [vmem:[#allocation2 + $0x540] ss:$8 sm:$0xf] %vm15_vm0, %v2777_v47   ;;  %v945_v15 = vsel %vm638_vm1, %v2591_v15, %v2799_v49 }
  0x2e   :  { %332 = vrot.lane.b32.xlu1 %v2593_v16, %s2515_s10  ;;  %16 = vst.msk [vmem:[#allocation2] ss:$8 sm:$0xf] %vm15_vm0, %v2639_v27   ;;  %v927_v16 = vsel %vm638_vm1, %v2593_v16, %v2727_v40 }
  0x2f   :  { %323 = vrot.lane.b32.xlu0 %v2595_v17, %s2515_s10  ;;  %17 = vst.msk [vmem:[#allocation2] ss:$8 sm:$0xf0] %vm15_vm0, %v2639_v27   ;;  %v909_v17 = vsel %vm638_vm1, %v2595_v17, %v2733_v41 }
  0x30   :  { %36 = vst.msk [vmem:[#allocation2 + $0xc0] ss:$8 sm:$0xf] %vm15_vm0, %v2671_v32  }
  0x31   :  { %38 = vst.msk [vmem:[#allocation2 + $0xc0] ss:$8 sm:$0xf0] %vm15_vm0, %v2671_v32  }
  0x32   :  { %134 = vst.msk [vmem:[#allocation2 + $0x440] ss:$8 sm:$0xf] %vm15_vm0, %v2799_v49  }
  0x33   :  { %136 = vst.msk [vmem:[#allocation2 + $0x440] ss:$8 sm:$0xf0] %vm15_vm0, %v2799_v49  }
  0x34   :  { %183 = vst.msk [vmem:[#allocation2 + $0x600] ss:$8 sm:$0xf] %vm15_vm0, %v2807_v51  }
  0x35   :  { %368 = vrot.lane.b32.xlu2 %v2603_v18, %s2515_s10  ;;  %185 = vst.msk [vmem:[#allocation2 + $0x600] ss:$8 sm:$0xf0] %vm15_vm0, %v2807_v51   ;;  %v999_v18 = vsel %vm638_vm1, %v2603_v18, %v2747_v43 }
  0x36   :  { %359 = vrot.lane.b32.xlu1 %v2605_v19, %s2515_s10  ;;  %176 = vst.msk [vmem:[#allocation2 + $0x5c0] ss:$8 sm:$0xf] %vm15_vm0, %v2813_v52   ;;  %v981_v19 = vsel %vm638_vm1, %v2605_v19, %v2739_v42 }
  0x37   :  { %350 = vrot.lane.b32.xlu0 %v2607_v20, %s2515_s10  ;;  %178 = vst.msk [vmem:[#allocation2 + $0x5c0] ss:$8 sm:$0xf0] %vm15_vm0, %v2813_v52   ;;  %v963_v20 = vsel %vm638_vm1, %v2607_v20, %v2759_v45 }
  0x3d   :  { %395 = vrot.lane.b32.xlu2 %v2615_v21, %s2515_s10  ;;  %v1053_v21 = vsel %vm638_vm1, %v2615_v21, %v2813_v52 }
  0x3e   :  { %386 = vrot.lane.b32.xlu1 %v2617_v22, %s2515_s10  ;;  %v1035_v22 = vsel %vm638_vm1, %v2617_v22, %v2765_v46 }
  0x3f   :  { %377 = vrot.lane.b32.xlu0 %v2619_v23, %s2515_s10  ;;  %v1017_v23 = vsel %vm638_vm1, %v2619_v23, %v2777_v47 }
  0x45   :  { %421 = vrot.lane.b32.xlu2 %v2637_v26, %s2516_s11 }
  0x46   :  { %412 = vrot.lane.b32.xlu1 %v2639_v27, %s2516_s11 }
  0x47   :  { %404 = vrot.lane.b32.xlu0 %v2645_v29, %s2515_s10  ;;  %v1071_v29 = vsel %vm638_vm1, %v2645_v29, %v2807_v51 }
  0x4d   :  { %448 = vrot.lane.b32.xlu2 %v2627_v24, %s2516_s11 }
  0x4e   :  { %439 = vrot.lane.b32.xlu1 %v2671_v32, %s2516_s11 }
  0x4f   :  { %430 = vrot.lane.b32.xlu0 %v2649_v30, %s2516_s11 }
  0x55   :  { %475 = vrot.lane.b32.xlu2 %v2673_v33, %s2516_s11 }
  0x56   :  { %466 = vrot.lane.b32.xlu1 %v2679_v34, %s2516_s11 }
  0x57   :  { %457 = vrot.lane.b32.xlu0 %v2631_v25, %s2516_s11 }
  0x5d   :  { %502 = vrot.lane.b32.xlu2 %v2697_v36, %s2516_s11 }
  0x5e   :  { %493 = vrot.lane.b32.xlu1 %v2703_v37, %s2516_s11 }
  0x5f   :  { %484 = vrot.lane.b32.xlu0 %v2641_v28, %s2516_s11  ;;  %v225_v44 = vpop.permute.xlu2 %224  }
  0x60   :  { %228 = vst.msk [vmem:[#allocation2 + $0x103] ss:$8 sm:$0xf] %vm15_vm0, %v225_v44  }
  0x61   :  { %230 = vst.msk [vmem:[#allocation2 + $0x103] ss:$8 sm:$0xf0] %vm15_vm0, %v225_v44  }
  0x65   :  { %529 = vrot.lane.b32.xlu2 %v2709_v38, %s2516_s11 }
  0x66   :  { %520 = vrot.lane.b32.xlu1 %v2721_v39, %s2516_s11 }
  0x67   :  { %511 = vrot.lane.b32.xlu0 %v2657_v31, %s2516_s11  ;;  %v234_v48 = vpop.permute.xlu2 %233  }
  0x68   :  { %237 = vst.msk [vmem:[#allocation2 + $0x143] ss:$8 sm:$0xf] %vm15_vm0, %v234_v48  }
  0x69   :  { %239 = vst.msk [vmem:[#allocation2 + $0x143] ss:$8 sm:$0xf0] %vm15_vm0, %v234_v48  }
  0x6d   :  { %556 = vrot.lane.b32.xlu2 %v2727_v40, %s2516_s11 }
  0x6e   :  { %547 = vrot.lane.b32.xlu1 %v2733_v41, %s2516_s11 }
  0x6f   :  { %538 = vrot.lane.b32.xlu0 %v2687_v35, %s2516_s11  ;;  %v261_v50 = vpop.permute.xlu2 %260  }
  0x70   :  { %264 = vst.msk [vmem:[#allocation2 + $0x203] ss:$8 sm:$0xf] %vm15_vm0, %v261_v50  }
  0x71   :  { %266 = vst.msk [vmem:[#allocation2 + $0x203] ss:$8 sm:$0xf0] %vm15_vm0, %v261_v50  }
  0x75   :  { %583 = vrot.lane.b32.xlu2 %v2739_v42, %s2516_s11 }
  0x76   :  { %574 = vrot.lane.b32.xlu1 %v2759_v45, %s2516_s11 }
  0x77   :  { %565 = vrot.lane.b32.xlu0 %v2799_v49, %s2516_s11  ;;  %v288_v53 = vpop.permute.xlu2 %287  }
  0x78   :  { %v207_v54 = vpop.permute.xlu1 %206   ;;  %291 = vst.msk [vmem:[#allocation2 + $0x2c3] ss:$8 sm:$0xf] %vm15_vm0, %v288_v53  }
  0x79   :  { %v189_v55 = vpop.permute.xlu0 %188   ;;  %293 = vst.msk [vmem:[#allocation2 + $0x2c3] ss:$8 sm:$0xf0] %vm15_vm0, %v288_v53  }
  0x7a   :  { %210 = vst.msk [vmem:[#allocation2 + $0x83] ss:$8 sm:$0xf] %vm15_vm0, %v207_v54  }
  0x7b   :  { %212 = vst.msk [vmem:[#allocation2 + $0x83] ss:$8 sm:$0xf0] %vm15_vm0, %v207_v54  }
  0x7c   :  { %192 = vst.msk [vmem:[#allocation2 + $0x3] ss:$8 sm:$0xf] %vm15_vm0, %v189_v55  }
  0x7d   :  { %194 = vst.msk [vmem:[#allocation2 + $0x3] ss:$8 sm:$0xf0] %vm15_vm0, %v189_v55   ;;  %610 = vrot.lane.b32.xlu2 %v2765_v46, %s2516_s11 }
  0x7e   :  { %601 = vrot.lane.b32.xlu1 %v2777_v47, %s2516_s11 }
  0x7f   :  { %592 = vrot.lane.b32.xlu0 %v2747_v43, %s2516_s11  ;;  %v315_v56 = vpop.permute.xlu2 %314  }
  0x80   :  { %v216_v57 = vpop.permute.xlu1 %215   ;;  %318 = vst.msk [vmem:[#allocation2 + $0x383] ss:$8 sm:$0xf] %vm15_vm0, %v315_v56  }
  0x81   :  { %v198_v58 = vpop.permute.xlu0 %197   ;;  %320 = vst.msk [vmem:[#allocation2 + $0x383] ss:$8 sm:$0xf0] %vm15_vm0, %v315_v56  }
  0x82   :  { %219 = vst.msk [vmem:[#allocation2 + $0xc3] ss:$8 sm:$0xf] %vm15_vm0, %v216_v57  }
  0x83   :  { %221 = vst.msk [vmem:[#allocation2 + $0xc3] ss:$8 sm:$0xf0] %vm15_vm0, %v216_v57  }
  0x84   :  { %201 = vst.msk [vmem:[#allocation2 + $0x43] ss:$8 sm:$0xf] %vm15_vm0, %v198_v58  }
  0x85   :  { %203 = vst.msk [vmem:[#allocation2 + $0x43] ss:$8 sm:$0xf0] %vm15_vm0, %v198_v58   ;;  %640 = vrot.lane.b32.xlu2 %v639_v59, %s2517_s12 }
  0x86   :  { %628 = vrot.lane.b32.xlu1 %v2807_v51, %s2516_s11 }
  0x87   :  { %619 = vrot.lane.b32.xlu0 %v2813_v52, %s2516_s11  ;;  %v342_v60 = vpop.permute.xlu2 %341  }
  0x88   :  { %v252_v61 = vpop.permute.xlu1 %251   ;;  %345 = vst.msk [vmem:[#allocation2 + $0x443] ss:$8 sm:$0xf] %vm15_vm0, %v342_v60  }
  0x89   :  { %v243_v62 = vpop.permute.xlu0 %242   ;;  %347 = vst.msk [vmem:[#allocation2 + $0x443] ss:$8 sm:$0xf0] %vm15_vm0, %v342_v60  }
  0x8a   :  { %255 = vst.msk [vmem:[#allocation2 + $0x1c3] ss:$8 sm:$0xf] %vm15_vm0, %v252_v61  }
  0x8b   :  { %257 = vst.msk [vmem:[#allocation2 + $0x1c3] ss:$8 sm:$0xf0] %vm15_vm0, %v252_v61  }
  0x8c   :  { %246 = vst.msk [vmem:[#allocation2 + $0x183] ss:$8 sm:$0xf] %vm15_vm0, %v243_v62  }
  0x8d   :  { %248 = vst.msk [vmem:[#allocation2 + $0x183] ss:$8 sm:$0xf0] %vm15_vm0, %v243_v62   ;;  %694 = vrot.lane.b32.xlu2 %v693_v63, %s2517_s12 }
  0x8e   :  { %676 = vrot.lane.b32.xlu1 %v675_v1, %s2517_s12 }
  0x8f   :  { %658 = vrot.lane.b32.xlu0 %v657_v2, %s2517_s12  ;;  %v369_v4 = vpop.permute.xlu2 %368  }
  0x90   :  { %v279_v5 = vpop.permute.xlu1 %278   ;;  %372 = vst.msk [vmem:[#allocation2 + $0x503] ss:$8 sm:$0xf] %vm15_vm0, %v369_v4  }
  0x91   :  { %v270_v26 = vpop.permute.xlu0 %269   ;;  %374 = vst.msk [vmem:[#allocation2 + $0x503] ss:$8 sm:$0xf0] %vm15_vm0, %v369_v4  }
  0x92   :  { %282 = vst.msk [vmem:[#allocation2 + $0x283] ss:$8 sm:$0xf] %vm15_vm0, %v279_v5  }
  0x93   :  { %284 = vst.msk [vmem:[#allocation2 + $0x283] ss:$8 sm:$0xf0] %vm15_vm0, %v279_v5  }
  0x94   :  { %273 = vst.msk [vmem:[#allocation2 + $0x243] ss:$8 sm:$0xf] %vm15_vm0, %v270_v26  }
  0x95   :  { %275 = vst.msk [vmem:[#allocation2 + $0x243] ss:$8 sm:$0xf0] %vm15_vm0, %v270_v26   ;;  %748 = vrot.lane.b32.xlu2 %v747_v8, %s2517_s12 }
  0x96   :  { %730 = vrot.lane.b32.xlu1 %v729_v3, %s2517_s12 }
  0x97   :  { %712 = vrot.lane.b32.xlu0 %v711_v0, %s2517_s12  ;;  %v396_v24 = vpop.permute.xlu2 %395  }
  0x98   :  { %v306_v25 = vpop.permute.xlu1 %305   ;;  %399 = vst.msk [vmem:[#allocation2 + $0x5c3] ss:$8 sm:$0xf] %vm15_vm0, %v396_v24  }
  0x99   :  { %v297_v27 = vpop.permute.xlu0 %296   ;;  %401 = vst.msk [vmem:[#allocation2 + $0x5c3] ss:$8 sm:$0xf0] %vm15_vm0, %v396_v24  }
  0x9a   :  { %309 = vst.msk [vmem:[#allocation2 + $0x343] ss:$8 sm:$0xf] %vm15_vm0, %v306_v25  }
  0x9b   :  { %311 = vst.msk [vmem:[#allocation2 + $0x343] ss:$8 sm:$0xf0] %vm15_vm0, %v306_v25  }
  0x9c   :  { %300 = vst.msk [vmem:[#allocation2 + $0x303] ss:$8 sm:$0xf] %vm15_vm0, %v297_v27  }
  0x9d   :  { %302 = vst.msk [vmem:[#allocation2 + $0x303] ss:$8 sm:$0xf0] %vm15_vm0, %v297_v27   ;;  %802 = vrot.lane.b32.xlu2 %v801_v11, %s2517_s12 }
  0x9e   :  { %784 = vrot.lane.b32.xlu1 %v783_v6, %s2517_s12 }
  0x9f   :  { %766 = vrot.lane.b32.xlu0 %v765_v7, %s2517_s12  ;;  %v422_v28 = vpop.permute.xlu2 %421  }
  0xa0   :  { %v333_v30 = vpop.permute.xlu1 %332   ;;  %425 = vst.msk [vmem:[#allocation2 + $0x41] ss:$8 sm:$0xf] %vm15_vm0, %v422_v28  }
  0xa1   :  { %v324_v32 = vpop.permute.xlu0 %323   ;;  %427 = vst.msk [vmem:[#allocation2 + $0x41] ss:$8 sm:$0xf0] %vm15_vm0, %v422_v28  }
  0xa2   :  { %336 = vst.msk [vmem:[#allocation2 + $0x403] ss:$8 sm:$0xf] %vm15_vm0, %v333_v30  }
  0xa3   :  { %338 = vst.msk [vmem:[#allocation2 + $0x403] ss:$8 sm:$0xf0] %vm15_vm0, %v333_v30  }
  0xa4   :  { %327 = vst.msk [vmem:[#allocation2 + $0x3c3] ss:$8 sm:$0xf] %vm15_vm0, %v324_v32  }
  0xa5   :  { %329 = vst.msk [vmem:[#allocation2 + $0x3c3] ss:$8 sm:$0xf0] %vm15_vm0, %v324_v32   ;;  %856 = vrot.lane.b32.xlu2 %v855_v14, %s2517_s12 }
  0xa6   :  { %838 = vrot.lane.b32.xlu1 %v837_v9, %s2517_s12 }
  0xa7   :  { %820 = vrot.lane.b32.xlu0 %v819_v10, %s2517_s12  ;;  %v449_v31 = vpop.permute.xlu2 %448  }
  0xa8   :  { %v360_v33 = vpop.permute.xlu1 %359   ;;  %452 = vst.msk [vmem:[#allocation2 + $0x101] ss:$8 sm:$0xf] %vm15_vm0, %v449_v31  }
  0xa9   :  { %v351_v34 = vpop.permute.xlu0 %350   ;;  %454 = vst.msk [vmem:[#allocation2 + $0x101] ss:$8 sm:$0xf0] %vm15_vm0, %v449_v31  }
  0xaa   :  { %363 = vst.msk [vmem:[#allocation2 + $0x4c3] ss:$8 sm:$0xf] %vm15_vm0, %v360_v33  }
  0xab   :  { %365 = vst.msk [vmem:[#allocation2 + $0x4c3] ss:$8 sm:$0xf0] %vm15_vm0, %v360_v33  }
  0xac   :  { %354 = vst.msk [vmem:[#allocation2 + $0x483] ss:$8 sm:$0xf] %vm15_vm0, %v351_v34  }
  0xad   :  { %356 = vst.msk [vmem:[#allocation2 + $0x483] ss:$8 sm:$0xf0] %vm15_vm0, %v351_v34   ;;  %910 = vrot.lane.b32.xlu2 %v909_v17, %s2517_s12 }
  0xae   :  { %892 = vrot.lane.b32.xlu1 %v891_v12, %s2517_s12 }
  0xaf   :  { %874 = vrot.lane.b32.xlu0 %v873_v13, %s2517_s12  ;;  %v476_v35 = vpop.permute.xlu2 %475  }
  0xb0   :  { %v387_v36 = vpop.permute.xlu1 %386   ;;  %479 = vst.msk [vmem:[#allocation2 + $0x1c1] ss:$8 sm:$0xf] %vm15_vm0, %v476_v35  }
  0xb1   :  { %v378_v37 = vpop.permute.xlu0 %377   ;;  %481 = vst.msk [vmem:[#allocation2 + $0x1c1] ss:$8 sm:$0xf0] %vm15_vm0, %v476_v35  }
  0xb2   :  { %390 = vst.msk [vmem:[#allocation2 + $0x583] ss:$8 sm:$0xf] %vm15_vm0, %v387_v36  }
  0xb3   :  { %392 = vst.msk [vmem:[#allocation2 + $0x583] ss:$8 sm:$0xf0] %vm15_vm0, %v387_v36  }
  0xb4   :  { %381 = vst.msk [vmem:[#allocation2 + $0x543] ss:$8 sm:$0xf] %vm15_vm0, %v378_v37  }
  0xb5   :  { %383 = vst.msk [vmem:[#allocation2 + $0x543] ss:$8 sm:$0xf0] %vm15_vm0, %v378_v37   ;;  %964 = vrot.lane.b32.xlu2 %v963_v20, %s2517_s12 }
  0xb6   :  { %946 = vrot.lane.b32.xlu1 %v945_v15, %s2517_s12 }
  0xb7   :  { %928 = vrot.lane.b32.xlu0 %v927_v16, %s2517_s12  ;;  %v503_v38 = vpop.permute.xlu2 %502  }
  0xb8   :  { %v413_v39 = vpop.permute.xlu1 %412   ;;  %506 = vst.msk [vmem:[#allocation2 + $0x281] ss:$8 sm:$0xf] %vm15_vm0, %v503_v38  }
  0xb9   :  { %v405_v40 = vpop.permute.xlu0 %404   ;;  %508 = vst.msk [vmem:[#allocation2 + $0x281] ss:$8 sm:$0xf0] %vm15_vm0, %v503_v38  }
  0xba   :  { %416 = vst.msk [vmem:[#allocation2 + $0x1] ss:$8 sm:$0xf] %vm15_vm0, %v413_v39  }
  0xbb   :  { %418 = vst.msk [vmem:[#allocation2 + $0x1] ss:$8 sm:$0xf0] %vm15_vm0, %v413_v39  }
  0xbc   :  { %408 = vst.msk [vmem:[#allocation2 + $0x603] ss:$8 sm:$0xf] %vm15_vm0, %v405_v40  }
  0xbd   :  { %410 = vst.msk [vmem:[#allocation2 + $0x603] ss:$8 sm:$0xf0] %vm15_vm0, %v405_v40   ;;  %1018 = vrot.lane.b32.xlu2 %v1017_v23, %s2517_s12 }
  0xbe   :  { %1000 = vrot.lane.b32.xlu1 %v999_v18, %s2517_s12 }
  0xbf   :  { %982 = vrot.lane.b32.xlu0 %v981_v19, %s2517_s12  ;;  %v530_v41 = vpop.permute.xlu2 %529  }
  0xc0   :  { %v440_v42 = vpop.permute.xlu1 %439   ;;  %533 = vst.msk [vmem:[#allocation2 + $0x341] ss:$8 sm:$0xf] %vm15_vm0, %v530_v41  }
  0xc1   :  { %v431_v43 = vpop.permute.xlu0 %430   ;;  %535 = vst.msk [vmem:[#allocation2 + $0x341] ss:$8 sm:$0xf0] %vm15_vm0, %v530_v41  }
  0xc2   :  { %443 = vst.msk [vmem:[#allocation2 + $0xc1] ss:$8 sm:$0xf] %vm15_vm0, %v440_v42  }
  0xc3   :  { %445 = vst.msk [vmem:[#allocation2 + $0xc1] ss:$8 sm:$0xf0] %vm15_vm0, %v440_v42  }
  0xc4   :  { %434 = vst.msk [vmem:[#allocation2 + $0x81] ss:$8 sm:$0xf] %vm15_vm0, %v431_v43  }
  0xc5   :  { %436 = vst.msk [vmem:[#allocation2 + $0x81] ss:$8 sm:$0xf0] %vm15_vm0, %v431_v43   ;;  %1072 = vrot.lane.b32.xlu2 %v1071_v29, %s2517_s12 }
  0xc6   :  { %1054 = vrot.lane.b32.xlu1 %v1053_v21, %s2517_s12 }
  0xc7   :  { %1036 = vrot.lane.b32.xlu0 %v1035_v22, %s2517_s12  ;;  %v557_v44 = vpop.permute.xlu2 %556  }
  0xc8   :  { %v467_v45 = vpop.permute.xlu1 %466   ;;  %560 = vst.msk [vmem:[#allocation2 + $0x401] ss:$8 sm:$0xf] %vm15_vm0, %v557_v44  }
  0xc9   :  { %v458_v46 = vpop.permute.xlu0 %457   ;;  %562 = vst.msk [vmem:[#allocation2 + $0x401] ss:$8 sm:$0xf0] %vm15_vm0, %v557_v44  }
  0xca   :  { %470 = vst.msk [vmem:[#allocation2 + $0x181] ss:$8 sm:$0xf] %vm15_vm0, %v467_v45  }
  0xcb   :  { %472 = vst.msk [vmem:[#allocation2 + $0x181] ss:$8 sm:$0xf0] %vm15_vm0, %v467_v45  }
  0xcc   :  { %461 = vst.msk [vmem:[#allocation2 + $0x141] ss:$8 sm:$0xf] %vm15_vm0, %v458_v46  }
  0xcd   :  { %463 = vst.msk [vmem:[#allocation2 + $0x141] ss:$8 sm:$0xf0] %vm15_vm0, %v458_v46  }
  0xcf   :  { %v584_v47 = vpop.permute.xlu2 %583  }
  0xd0   :  { %v494_v48 = vpop.permute.xlu1 %493   ;;  %587 = vst.msk [vmem:[#allocation2 + $0x4c1] ss:$8 sm:$0xf] %vm15_vm0, %v584_v47  }
  0xd1   :  { %v485_v49 = vpop.permute.xlu0 %484   ;;  %589 = vst.msk [vmem:[#allocation2 + $0x4c1] ss:$8 sm:$0xf0] %vm15_vm0, %v584_v47  }
  0xd2   :  { %497 = vst.msk [vmem:[#allocation2 + $0x241] ss:$8 sm:$0xf] %vm15_vm0, %v494_v48  }
  0xd3   :  { %499 = vst.msk [vmem:[#allocation2 + $0x241] ss:$8 sm:$0xf0] %vm15_vm0, %v494_v48  }
  0xd4   :  { %488 = vst.msk [vmem:[#allocation2 + $0x201] ss:$8 sm:$0xf] %vm15_vm0, %v485_v49  }
  0xd5   :  { %490 = vst.msk [vmem:[#allocation2 + $0x201] ss:$8 sm:$0xf0] %vm15_vm0, %v485_v49  }
  0xd7   :  { %v611_v50 = vpop.permute.xlu2 %610  }
  0xd8   :  { %v521_v51 = vpop.permute.xlu1 %520   ;;  %614 = vst.msk [vmem:[#allocation2 + $0x581] ss:$8 sm:$0xf] %vm15_vm0, %v611_v50  }
  0xd9   :  { %v512_v52 = vpop.permute.xlu0 %511   ;;  %616 = vst.msk [vmem:[#allocation2 + $0x581] ss:$8 sm:$0xf0] %vm15_vm0, %v611_v50  }
  0xda   :  { %524 = vst.msk [vmem:[#allocation2 + $0x301] ss:$8 sm:$0xf] %vm15_vm0, %v521_v51  }
  0xdb   :  { %526 = vst.msk [vmem:[#allocation2 + $0x301] ss:$8 sm:$0xf0] %vm15_vm0, %v521_v51  }
  0xdc   :  { %515 = vst.msk [vmem:[#allocation2 + $0x2c1] ss:$8 sm:$0xf] %vm15_vm0, %v512_v52  }
  0xdd   :  { %517 = vst.msk [vmem:[#allocation2 + $0x2c1] ss:$8 sm:$0xf0] %vm15_vm0, %v512_v52  }
  0xdf   :  { %v641_v53 = vpop.permute.xlu2 %640  }
  0xe0   :  { %v548_v54 = vpop.permute.xlu1 %547   ;;  %644 = vst.msk [vmem:[#allocation2 + $0x2] ss:$8 sm:$0xf] %vm642_vm2, %v641_v53  }
  0xe1   :  { %v539_v55 = vpop.permute.xlu0 %538   ;;  %646 = vst.msk [vmem:[#allocation2 + $0x2] ss:$8 sm:$0xf0] %vm642_vm2, %v641_v53  }
  0xe2   :  { %649 = vst.msk [vmem:[#allocation2 + $0x2] ss:$8 sm:$0xf] %vm647_vm3, %v641_v53  }
  0xe3   :  { %651 = vst.msk [vmem:[#allocation2 + $0x2] ss:$8 sm:$0xf0] %vm647_vm3, %v641_v53  }
  0xe4   :  { %551 = vst.msk [vmem:[#allocation2 + $0x3c1] ss:$8 sm:$0xf] %vm15_vm0, %v548_v54  }
  0xe5   :  { %553 = vst.msk [vmem:[#allocation2 + $0x3c1] ss:$8 sm:$0xf0] %vm15_vm0, %v548_v54  }
  0xe6   :  { %542 = vst.msk [vmem:[#allocation2 + $0x381] ss:$8 sm:$0xf] %vm15_vm0, %v539_v55  }
  0xe7   :  { %544 = vst.msk [vmem:[#allocation2 + $0x381] ss:$8 sm:$0xf0] %vm15_vm0, %v539_v55   ;;  %v695_v56 = vpop.permute.xlu2 %694  }
  0xe8   :  { %v575_v57 = vpop.permute.xlu1 %574   ;;  %698 = vst.msk [vmem:[#allocation2 + $0xc2] ss:$8 sm:$0xf] %vm642_vm2, %v695_v56  }
  0xe9   :  { %v566_v58 = vpop.permute.xlu0 %565   ;;  %v1086_v59 = vld [vmem:[#allocation2] sm:$0xf]  ;;  %v1091_v60 = vld [vmem:[#allocation2 + $0x8] sm:$0xf]  ;;  %v1097_v61 = vld [vmem:[#allocation2 + $0x10] sm:$0xf] }
  0xea   :  { %v1103_v62 = vld [vmem:[#allocation2 + $0x18] sm:$0xf]  ;;  %1089 = vst [vmem:[%s3768_s1] sm:$0xf] %v1086_v59  ;;  %v1109_v63 = vld [vmem:[#allocation2 + $0x20] sm:$0xf] }
  0xeb   :  { %2285 = vst [vmem:[%s3768_s1 + $0x4] sm:$0xf] %v1091_v60  ;;  %v1115_v1 = vld [vmem:[#allocation2 + $0x28] sm:$0xf]  ;;  %v1121_v2 = vld [vmem:[#allocation2 + $0x30] sm:$0xf] }
  0xec   :  { %2286 = vst [vmem:[%s3768_s1 + $0x8] sm:$0xf] %v1097_v61  ;;  %v1127_v4 = vld [vmem:[#allocation2 + $0x38] sm:$0xf] }
  0xed   :  { %2287 = vst [vmem:[%s3768_s1 + $0xc] sm:$0xf] %v1103_v62 }
  0xee   :  { %2288 = vst [vmem:[%s3768_s1 + $0x10] sm:$0xf] %v1109_v63 }
  0xef   :  { %v749_v5 = vpop.permute.xlu2 %748   ;;  %2289 = vst [vmem:[%s3768_s1 + $0x14] sm:$0xf] %v1115_v1 }
  0xf0   :  { %v602_v26 = vpop.permute.xlu1 %601   ;;  %2290 = vst [vmem:[%s3768_s1 + $0x18] sm:$0xf] %v1121_v2 }
  0xf1   :  { %v593_v8 = vpop.permute.xlu0 %592   ;;  %2291 = vst [vmem:[%s3768_s1 + $0x1c] sm:$0xf] %v1127_v4 }
  0xf2   :  { %700 = vst.msk [vmem:[#allocation2 + $0xc2] ss:$8 sm:$0xf0] %vm642_vm2, %v695_v56  }
  0xf3   :  { %703 = vst.msk [vmem:[#allocation2 + $0xc2] ss:$8 sm:$0xf] %vm647_vm3, %v695_v56  }
  0xf4   :  { %705 = vst.msk [vmem:[#allocation2 + $0xc2] ss:$8 sm:$0xf0] %vm647_vm3, %v695_v56  }
  0xf5   :  { %578 = vst.msk [vmem:[#allocation2 + $0x481] ss:$8 sm:$0xf] %vm15_vm0, %v575_v57  }
  0xf6   :  { %580 = vst.msk [vmem:[#allocation2 + $0x481] ss:$8 sm:$0xf0] %vm15_vm0, %v575_v57  }
  0xf7   :  { %v803_v3 = vpop.permute.xlu2 %802   ;;  %569 = vst.msk [vmem:[#allocation2 + $0x441] ss:$8 sm:$0xf] %vm15_vm0, %v566_v58  }
  0xf8   :  { %v629_v0 = vpop.permute.xlu1 %628   ;;  %571 = vst.msk [vmem:[#allocation2 + $0x441] ss:$8 sm:$0xf0] %vm15_vm0, %v566_v58  }
  0xf9   :  { %752 = vst.msk [vmem:[#allocation2 + $0x182] ss:$8 sm:$0xf] %vm642_vm2, %v749_v5   ;;  %v620_v7 = vpop.permute.xlu0 %619  }
  0xfa   :  { %v1229_v24 = vld [vmem:[#allocation2 + $0xc0] sm:$0xf]  ;;  %v1235_v25 = vld [vmem:[#allocation2 + $0xc8] sm:$0xf]  ;;  %v1241_v27 = vld [vmem:[#allocation2 + $0xd0] sm:$0xf] }
  0xfb   :  { %v1247_v11 = vld [vmem:[#allocation2 + $0xd8] sm:$0xf]  ;;  %2308 = vst [vmem:[%s3768_s1 + $0x60] sm:$0xf] %v1229_v24  ;;  %v1253_v6 = vld [vmem:[#allocation2 + $0xe0] sm:$0xf] }
  0xfc   :  { %2309 = vst [vmem:[%s3768_s1 + $0x64] sm:$0xf] %v1235_v25  ;;  %v1259_v28 = vld [vmem:[#allocation2 + $0xe8] sm:$0xf]  ;;  %v1265_v30 = vld [vmem:[#allocation2 + $0xf0] sm:$0xf] }
  0xfd   :  { %2310 = vst [vmem:[%s3768_s1 + $0x68] sm:$0xf] %v1241_v27  ;;  %v1271_v32 = vld [vmem:[#allocation2 + $0xf8] sm:$0xf] }
  0xfe   :  { %2311 = vst [vmem:[%s3768_s1 + $0x6c] sm:$0xf] %v1247_v11 }
  0xff   :  { %2312 = vst [vmem:[%s3768_s1 + $0x70] sm:$0xf] %v1253_v6  ;;  %v857_v14 = vpop.permute.xlu2 %856  }
 0x100   :  { %2313 = vst [vmem:[%s3768_s1 + $0x74] sm:$0xf] %v1259_v28  ;;  %v677_v9 = vpop.permute.xlu1 %676  }
 0x101   :  { %2314 = vst [vmem:[%s3768_s1 + $0x78] sm:$0xf] %v1265_v30  ;;  %v659_v17 = vpop.permute.xlu0 %658  }
 0x102   :  { %2315 = vst [vmem:[%s3768_s1 + $0x7c] sm:$0xf] %v1271_v32 }
 0x103   :  { %754 = vst.msk [vmem:[#allocation2 + $0x182] ss:$8 sm:$0xf0] %vm642_vm2, %v749_v5  }
 0x104   :  { %757 = vst.msk [vmem:[#allocation2 + $0x182] ss:$8 sm:$0xf] %vm647_vm3, %v749_v5  }
 0x105   :  { %759 = vst.msk [vmem:[#allocation2 + $0x182] ss:$8 sm:$0xf0] %vm647_vm3, %v749_v5  }
 0x106   :  { %605 = vst.msk [vmem:[#allocation2 + $0x541] ss:$8 sm:$0xf] %vm15_vm0, %v602_v26  }
 0x107   :  { %607 = vst.msk [vmem:[#allocation2 + $0x541] ss:$8 sm:$0xf0] %vm15_vm0, %v602_v26   ;;  %v911_v39 = vpop.permute.xlu2 %910  }
 0x108   :  { %596 = vst.msk [vmem:[#allocation2 + $0x501] ss:$8 sm:$0xf] %vm15_vm0, %v593_v8   ;;  %v3155_v18 = vpop.permute.xlu1 %730  }
 0x109   :  { %598 = vst.msk [vmem:[#allocation2 + $0x501] ss:$8 sm:$0xf0] %vm15_vm0, %v593_v8   ;;  %v3169_v46 = vpop.permute.xlu0 %712  }
 0x10a   :  { %806 = vst.msk [vmem:[#allocation2 + $0x242] ss:$8 sm:$0xf] %vm642_vm2, %v803_v3  }
 0x10b   :  { %v1373_v10 = vld [vmem:[#allocation2 + $0x180] sm:$0xf]  ;;  %v1379_v29 = vld [vmem:[#allocation2 + $0x188] sm:$0xf]  ;;  %v1385_v21 = vld [vmem:[#allocation2 + $0x190] sm:$0xf] }
 0x10c   :  { %v1391_v22 = vld [vmem:[#allocation2 + $0x198] sm:$0xf]  ;;  %2332 = vst [vmem:[%s3768_s1 + $0xc0] sm:$0xf] %v1373_v10  ;;  %v1397_v31 = vld [vmem:[#allocation2 + $0x1a0] sm:$0xf] }
 0x10d   :  { %2333 = vst [vmem:[%s3768_s1 + $0xc4] sm:$0xf] %v1379_v29  ;;  %v1403_v33 = vld [vmem:[#allocation2 + $0x1a8] sm:$0xf]  ;;  %v1409_v34 = vld [vmem:[#allocation2 + $0x1b0] sm:$0xf] }
 0x10e   :  { %2334 = vst [vmem:[%s3768_s1 + $0xc8] sm:$0xf] %v1385_v21  ;;  %v1415_v12 = vld [vmem:[#allocation2 + $0x1b8] sm:$0xf] }
 0x10f   :  { %2335 = vst [vmem:[%s3768_s1 + $0xcc] sm:$0xf] %v1391_v22  ;;  %v965_v60 = vpop.permute.xlu2 %964  }
 0x110   :  { %2336 = vst [vmem:[%s3768_s1 + $0xd0] sm:$0xf] %v1397_v31  ;;  %v785_v8 = vpop.permute.xlu1 %784  }
 0x111   :  { %2337 = vst [vmem:[%s3768_s1 + $0xd4] sm:$0xf] %v1403_v33  ;;  %v3261_v25 = vpop.permute.xlu0 %766  }
 0x112   :  { %2338 = vst [vmem:[%s3768_s1 + $0xd8] sm:$0xf] %v1409_v34 }
 0x113   :  { %2339 = vst [vmem:[%s3768_s1 + $0xdc] sm:$0xf] %v1415_v12 }
 0x114   :  { %808 = vst.msk [vmem:[#allocation2 + $0x242] ss:$8 sm:$0xf0] %vm642_vm2, %v803_v3  }
 0x115   :  { %811 = vst.msk [vmem:[#allocation2 + $0x242] ss:$8 sm:$0xf] %vm647_vm3, %v803_v3  }
 0x116   :  { %813 = vst.msk [vmem:[#allocation2 + $0x242] ss:$8 sm:$0xf0] %vm647_vm3, %v803_v3  }
 0x117   :  { %632 = vst.msk [vmem:[#allocation2 + $0x601] ss:$8 sm:$0xf] %vm15_vm0, %v629_v0   ;;  %v1019_v31 = vpop.permute.xlu2 %1018  }
 0x118   :  { %634 = vst.msk [vmem:[#allocation2 + $0x601] ss:$8 sm:$0xf0] %vm15_vm0, %v629_v0  }
 0x119   :  { %623 = vst.msk [vmem:[#allocation2 + $0x5c1] ss:$8 sm:$0xf] %vm15_vm0, %v620_v7  }
 0x11a   :  { %625 = vst.msk [vmem:[#allocation2 + $0x5c1] ss:$8 sm:$0xf0] %vm15_vm0, %v620_v7  }
 0x11b   :  { %860 = vst.msk [vmem:[#allocation2 + $0x302] ss:$8 sm:$0xf] %vm642_vm2, %v857_v14  }
 0x11c   :  { %v1517_v13 = vld [vmem:[#allocation2 + $0x240] sm:$0xf]  ;;  %v1523_v35 = vld [vmem:[#allocation2 + $0x248] sm:$0xf]  ;;  %v1529_v36 = vld [vmem:[#allocation2 + $0x250] sm:$0xf] }
 0x11d   :  { %v1535_v37 = vld [vmem:[#allocation2 + $0x258] sm:$0xf]  ;;  %2356 = vst [vmem:[%s3768_s1 + $0x120] sm:$0xf] %v1517_v13  ;;  %v1541_v20 = vld [vmem:[#allocation2 + $0x260] sm:$0xf] }
 0x11e   :  { %2357 = vst [vmem:[%s3768_s1 + $0x124] sm:$0xf] %v1523_v35  ;;  %v1547_v15 = vld [vmem:[#allocation2 + $0x268] sm:$0xf]  ;;  %v1553_v16 = vld [vmem:[#allocation2 + $0x270] sm:$0xf] }
 0x11f   :  { %2358 = vst [vmem:[%s3768_s1 + $0x128] sm:$0xf] %v1529_v36  ;;  %v1559_v38 = vld [vmem:[#allocation2 + $0x278] sm:$0xf] }
 0x120   :  { %2359 = vst [vmem:[%s3768_s1 + $0x12c] sm:$0xf] %v1535_v37 }
 0x121   :  { %2360 = vst [vmem:[%s3768_s1 + $0x130] sm:$0xf] %v1541_v20  ;;  %v839_v20 = vpop.permute.xlu1 %838  }
 0x122   :  { %2361 = vst [vmem:[%s3768_s1 + $0x134] sm:$0xf] %v1547_v15 }
 0x123   :  { %2362 = vst [vmem:[%s3768_s1 + $0x138] sm:$0xf] %v1553_v16 }
 0x124   :  { %2363 = vst [vmem:[%s3768_s1 + $0x13c] sm:$0xf] %v1559_v38 }
 0x125   :  { %862 = vst.msk [vmem:[#allocation2 + $0x302] ss:$8 sm:$0xf0] %vm642_vm2, %v857_v14  }
 0x126   :  { %865 = vst.msk [vmem:[#allocation2 + $0x302] ss:$8 sm:$0xf] %vm647_vm3, %v857_v14  }
 0x127   :  { %867 = vst.msk [vmem:[#allocation2 + $0x302] ss:$8 sm:$0xf0] %vm647_vm3, %v857_v14  }
 0x128   :  { %680 = vst.msk [vmem:[#allocation2 + $0x82] ss:$8 sm:$0xf] %vm642_vm2, %v677_v9  }
 0x129   :  { %682 = vst.msk [vmem:[#allocation2 + $0x82] ss:$8 sm:$0xf0] %vm642_vm2, %v677_v9  }
 0x12a   :  { %685 = vst.msk [vmem:[#allocation2 + $0x82] ss:$8 sm:$0xf] %vm647_vm3, %v677_v9  }
 0x12b   :  { %687 = vst.msk [vmem:[#allocation2 + $0x82] ss:$8 sm:$0xf0] %vm647_vm3, %v677_v9  }
 0x12c   :  { %662 = vst.msk [vmem:[#allocation2 + $0x42] ss:$8 sm:$0xf] %vm642_vm2, %v659_v17  }
 0x12d   :  { %v1661_v40 = vld [vmem:[#allocation2 + $0x300] sm:$0xf]  ;;  %v1667_v23 = vld [vmem:[#allocation2 + $0x308] sm:$0xf]  ;;  %v1673_v19 = vld [vmem:[#allocation2 + $0x310] sm:$0xf] }
 0x12e   :  { %2380 = vst [vmem:[%s3768_s1 + $0x180] sm:$0xf] %v1661_v40  ;;  %v1679_v41 = vld [vmem:[#allocation2 + $0x318] sm:$0xf]  ;;  %v1685_v42 = vld [vmem:[#allocation2 + $0x320] sm:$0xf] }
 0x12f   :  { %2381 = vst [vmem:[%s3768_s1 + $0x184] sm:$0xf] %v1667_v23  ;;  %v1691_v43 = vld [vmem:[#allocation2 + $0x328] sm:$0xf]  ;;  %v1697_v44 = vld [vmem:[#allocation2 + $0x330] sm:$0xf] }
 0x130   :  { %2382 = vst [vmem:[%s3768_s1 + $0x188] sm:$0xf] %v1673_v19  ;;  %v1703_v45 = vld [vmem:[#allocation2 + $0x338] sm:$0xf] }
 0x131   :  { %2383 = vst [vmem:[%s3768_s1 + $0x18c] sm:$0xf] %v1679_v41  ;;  %v1181_v47 = vld [vmem:[#allocation2 + $0x80] sm:$0xf]  ;;  %v1187_v48 = vld [vmem:[#allocation2 + $0x88] sm:$0xf] }
 0x132   :  { %2384 = vst [vmem:[%s3768_s1 + $0x190] sm:$0xf] %v1685_v42  ;;  %v1193_v49 = vld [vmem:[#allocation2 + $0x90] sm:$0xf]  ;;  %v1199_v50 = vld [vmem:[#allocation2 + $0x98] sm:$0xf] }
 0x133   :  { %2385 = vst [vmem:[%s3768_s1 + $0x194] sm:$0xf] %v1691_v43  ;;  %v1205_v51 = vld [vmem:[#allocation2 + $0xa0] sm:$0xf]  ;;  %v1211_v52 = vld [vmem:[#allocation2 + $0xa8] sm:$0xf] }
 0x134   :  { %2386 = vst [vmem:[%s3768_s1 + $0x198] sm:$0xf] %v1697_v44  ;;  %v1217_v53 = vld [vmem:[#allocation2 + $0xb0] sm:$0xf]  ;;  %v1223_v54 = vld [vmem:[#allocation2 + $0xb8] sm:$0xf] }
 0x135   :  { %2387 = vst [vmem:[%s3768_s1 + $0x19c] sm:$0xf] %v1703_v45 }
 0x136   :  { %664 = vst.msk [vmem:[#allocation2 + $0x42] ss:$8 sm:$0xf0] %vm642_vm2, %v659_v17  }
 0x137   :  { %667 = vst.msk [vmem:[#allocation2 + $0x42] ss:$8 sm:$0xf] %vm647_vm3, %v659_v17  }
 0x138   :  { %669 = vst.msk [vmem:[#allocation2 + $0x42] ss:$8 sm:$0xf0] %vm647_vm3, %v659_v17  }
 0x139   :  { %2300 = vst [vmem:[%s3768_s1 + $0x40] sm:$0xf] %v1181_v47 }
 0x13a   :  { %2301 = vst [vmem:[%s3768_s1 + $0x44] sm:$0xf] %v1187_v48 }
 0x13b   :  { %2302 = vst [vmem:[%s3768_s1 + $0x48] sm:$0xf] %v1193_v49 }
 0x13c   :  { %2303 = vst [vmem:[%s3768_s1 + $0x4c] sm:$0xf] %v1199_v50  ;;  %v1073_v50 = vpop.permute.xlu2 %1072  }
 0x13d   :  { %2304 = vst [vmem:[%s3768_s1 + $0x50] sm:$0xf] %v1205_v51 }
 0x13e   :  { %2305 = vst [vmem:[%s3768_s1 + $0x54] sm:$0xf] %v1211_v52  ;;  %v1133_v55 = vld [vmem:[#allocation2 + $0x40] sm:$0xf]  ;;  %v1139_v56 = vld [vmem:[#allocation2 + $0x48] sm:$0xf] }
 0x13f   :  { %2306 = vst [vmem:[%s3768_s1 + $0x58] sm:$0xf] %v1217_v53  ;;  %v1145_v57 = vld [vmem:[#allocation2 + $0x50] sm:$0xf]  ;;  %v1151_v58 = vld [vmem:[#allocation2 + $0x58] sm:$0xf] }
 0x140   :  { %2307 = vst [vmem:[%s3768_s1 + $0x5c] sm:$0xf] %v1223_v54  ;;  %v1157_v59 = vld [vmem:[#allocation2 + $0x60] sm:$0xf]  ;;  %v1163_v61 = vld [vmem:[#allocation2 + $0x68] sm:$0xf] }
 0x141   :  { %914 = vst.msk [vmem:[#allocation2 + $0x3c2] ss:$8 sm:$0xf] %vm642_vm2, %v911_v39   ;;  %v1169_v62 = vld [vmem:[#allocation2 + $0x70] sm:$0xf] }
 0x142   :  { %916 = vst.msk [vmem:[#allocation2 + $0x3c2] ss:$8 sm:$0xf0] %vm642_vm2, %v911_v39   ;;  %v1175_v63 = vld [vmem:[#allocation2 + $0x78] sm:$0xf] }
 0x143   :  { %919 = vst.msk [vmem:[#allocation2 + $0x3c2] ss:$8 sm:$0xf] %vm647_vm3, %v911_v39  }
 0x144   :  { %921 = vst.msk [vmem:[#allocation2 + $0x3c2] ss:$8 sm:$0xf0] %vm647_vm3, %v911_v39   ;;  %v3351_v39 = vpop.permute.xlu0 %820  }
 0x145   :  { %2292 = vst [vmem:[%s3768_s1 + $0x20] sm:$0xf] %v1133_v55 }
 0x146   :  { %2293 = vst [vmem:[%s3768_s1 + $0x24] sm:$0xf] %v1139_v56 }
 0x147   :  { %2294 = vst [vmem:[%s3768_s1 + $0x28] sm:$0xf] %v1145_v57 }
 0x148   :  { %2295 = vst [vmem:[%s3768_s1 + $0x2c] sm:$0xf] %v1151_v58 }
 0x149   :  { %2296 = vst [vmem:[%s3768_s1 + $0x30] sm:$0xf] %v1157_v59  ;;  %v893_v59 = vpop.permute.xlu1 %892  }
 0x14a   :  { %2297 = vst [vmem:[%s3768_s1 + $0x34] sm:$0xf] %v1163_v61  ;;  %v1805_v1 = vld [vmem:[#allocation2 + $0x3c0] sm:$0xf]  ;;  %v1811_v2 = vld [vmem:[#allocation2 + $0x3c8] sm:$0xf] }
 0x14b   :  { %2298 = vst [vmem:[%s3768_s1 + $0x38] sm:$0xf] %v1169_v62  ;;  %v1817_v4 = vld [vmem:[#allocation2 + $0x3d0] sm:$0xf]  ;;  %v1823_v5 = vld [vmem:[#allocation2 + $0x3d8] sm:$0xf] }
 0x14c   :  { %2299 = vst [vmem:[%s3768_s1 + $0x3c] sm:$0xf] %v1175_v63  ;;  %v1829_v26 = vld [vmem:[#allocation2 + $0x3e0] sm:$0xf]  ;;  %v1835_v3 = vld [vmem:[#allocation2 + $0x3e8] sm:$0xf]  ;;  %v3441_v63 = vpop.permute.xlu0 %874  }
 0x14d   :  { %2404 = vst [vmem:[%s3768_s1 + $0x1e0] sm:$0xf] %v1805_v1  ;;  %v1841_v0 = vld [vmem:[#allocation2 + $0x3f0] sm:$0xf]  ;;  %v1847_v24 = vld [vmem:[#allocation2 + $0x3f8] sm:$0xf] }
 0x14e   :  { %734 = vst.msk [vmem:[#allocation2 + $0x142] ss:$8 sm:$0xf] %vm642_vm2, %v3155_v18  }
 0x14f   :  { %736 = vst.msk [vmem:[#allocation2 + $0x142] ss:$8 sm:$0xf0] %vm642_vm2, %v3155_v18  }
 0x150   :  { %739 = vst.msk [vmem:[#allocation2 + $0x142] ss:$8 sm:$0xf] %vm647_vm3, %v3155_v18  }
 0x151   :  { %741 = vst.msk [vmem:[#allocation2 + $0x142] ss:$8 sm:$0xf0] %vm647_vm3, %v3155_v18  }
 0x152   :  { %2405 = vst [vmem:[%s3768_s1 + $0x1e4] sm:$0xf] %v1811_v2 }
 0x153   :  { %2406 = vst [vmem:[%s3768_s1 + $0x1e8] sm:$0xf] %v1817_v4 }
 0x154   :  { %2407 = vst [vmem:[%s3768_s1 + $0x1ec] sm:$0xf] %v1823_v5 }
 0x155   :  { %2408 = vst [vmem:[%s3768_s1 + $0x1f0] sm:$0xf] %v1829_v26 }
 0x156   :  { %2409 = vst [vmem:[%s3768_s1 + $0x1f4] sm:$0xf] %v1835_v3 }
 0x157   :  { %2410 = vst [vmem:[%s3768_s1 + $0x1f8] sm:$0xf] %v1841_v0  ;;  %v1325_v27 = vld [vmem:[#allocation2 + $0x140] sm:$0xf]  ;;  %v1331_v11 = vld [vmem:[#allocation2 + $0x148] sm:$0xf] }
 0x158   :  { %2411 = vst [vmem:[%s3768_s1 + $0x1fc] sm:$0xf] %v1847_v24  ;;  %v1337_v6 = vld [vmem:[#allocation2 + $0x150] sm:$0xf]  ;;  %v1343_v7 = vld [vmem:[#allocation2 + $0x158] sm:$0xf] }
 0x159   :  { %716 = vst.msk [vmem:[#allocation2 + $0x102] ss:$8 sm:$0xf] %vm642_vm2, %v3169_v46   ;;  %v1349_v28 = vld [vmem:[#allocation2 + $0x160] sm:$0xf] }
 0x15a   :  { %718 = vst.msk [vmem:[#allocation2 + $0x102] ss:$8 sm:$0xf0] %vm642_vm2, %v3169_v46   ;;  %v1355_v30 = vld [vmem:[#allocation2 + $0x168] sm:$0xf] }
 0x15b   :  { %721 = vst.msk [vmem:[#allocation2 + $0x102] ss:$8 sm:$0xf] %vm647_vm3, %v3169_v46   ;;  %v1361_v32 = vld [vmem:[#allocation2 + $0x170] sm:$0xf] }
 0x15c   :  { %723 = vst.msk [vmem:[#allocation2 + $0x102] ss:$8 sm:$0xf0] %vm647_vm3, %v3169_v46   ;;  %v1367_v14 = vld [vmem:[#allocation2 + $0x178] sm:$0xf] }
 0x15d   :  { %2324 = vst [vmem:[%s3768_s1 + $0xa0] sm:$0xf] %v1325_v27 }
 0x15e   :  { %2325 = vst [vmem:[%s3768_s1 + $0xa4] sm:$0xf] %v1331_v11 }
 0x15f   :  { %2326 = vst [vmem:[%s3768_s1 + $0xa8] sm:$0xf] %v1337_v6 }
 0x160   :  { %2327 = vst [vmem:[%s3768_s1 + $0xac] sm:$0xf] %v1343_v7  ;;  %v947_v7 = vpop.permute.xlu1 %946  }
 0x161   :  { %2328 = vst [vmem:[%s3768_s1 + $0xb0] sm:$0xf] %v1349_v28 }
 0x162   :  { %2329 = vst [vmem:[%s3768_s1 + $0xb4] sm:$0xf] %v1355_v30  ;;  %v1277_v9 = vld [vmem:[#allocation2 + $0x100] sm:$0xf]  ;;  %v1283_v10 = vld [vmem:[#allocation2 + $0x108] sm:$0xf] }
 0x163   :  { %2330 = vst [vmem:[%s3768_s1 + $0xb8] sm:$0xf] %v1361_v32  ;;  %v1289_v29 = vld [vmem:[#allocation2 + $0x110] sm:$0xf]  ;;  %v1295_v21 = vld [vmem:[#allocation2 + $0x118] sm:$0xf] }
 0x164   :  { %2331 = vst [vmem:[%s3768_s1 + $0xbc] sm:$0xf] %v1367_v14  ;;  %v1301_v22 = vld [vmem:[#allocation2 + $0x120] sm:$0xf]  ;;  %v1307_v33 = vld [vmem:[#allocation2 + $0x128] sm:$0xf] }
 0x165   :  { %968 = vst.msk [vmem:[#allocation2 + $0x482] ss:$8 sm:$0xf] %vm642_vm2, %v965_v60   ;;  %v1313_v34 = vld [vmem:[#allocation2 + $0x130] sm:$0xf] }
 0x166   :  { %970 = vst.msk [vmem:[#allocation2 + $0x482] ss:$8 sm:$0xf0] %vm642_vm2, %v965_v60   ;;  %v1319_v17 = vld [vmem:[#allocation2 + $0x138] sm:$0xf] }
 0x167   :  { %973 = vst.msk [vmem:[#allocation2 + $0x482] ss:$8 sm:$0xf] %vm647_vm3, %v965_v60  }
 0x168   :  { %975 = vst.msk [vmem:[#allocation2 + $0x482] ss:$8 sm:$0xf0] %vm647_vm3, %v965_v60  }
 0x169   :  { %2316 = vst [vmem:[%s3768_s1 + $0x80] sm:$0xf] %v1277_v9 }
 0x16a   :  { %2317 = vst [vmem:[%s3768_s1 + $0x84] sm:$0xf] %v1283_v10 }
 0x16b   :  { %2318 = vst [vmem:[%s3768_s1 + $0x88] sm:$0xf] %v1289_v29 }
 0x16c   :  { %2319 = vst [vmem:[%s3768_s1 + $0x8c] sm:$0xf] %v1295_v21 }
 0x16d   :  { %2320 = vst [vmem:[%s3768_s1 + $0x90] sm:$0xf] %v1301_v22  ;;  %v929_v22 = vpop.permute.xlu0 %928  }
 0x16e   :  { %2321 = vst [vmem:[%s3768_s1 + $0x94] sm:$0xf] %v1307_v33  ;;  %v1949_v12 = vld [vmem:[#allocation2 + $0x480] sm:$0xf]  ;;  %v1955_v13 = vld [vmem:[#allocation2 + $0x488] sm:$0xf] }
 0x16f   :  { %2322 = vst [vmem:[%s3768_s1 + $0x98] sm:$0xf] %v1313_v34  ;;  %v1961_v35 = vld [vmem:[#allocation2 + $0x490] sm:$0xf]  ;;  %v1967_v36 = vld [vmem:[#allocation2 + $0x498] sm:$0xf] }
 0x170   :  { %2323 = vst [vmem:[%s3768_s1 + $0x9c] sm:$0xf] %v1319_v17  ;;  %v1973_v37 = vld [vmem:[#allocation2 + $0x4a0] sm:$0xf]  ;;  %v1979_v15 = vld [vmem:[#allocation2 + $0x4a8] sm:$0xf] }
 0x171   :  { %2428 = vst [vmem:[%s3768_s1 + $0x240] sm:$0xf] %v1949_v12  ;;  %v1985_v16 = vld [vmem:[#allocation2 + $0x4b0] sm:$0xf]  ;;  %v1991_v38 = vld [vmem:[#allocation2 + $0x4b8] sm:$0xf] }
 0x172   :  { %788 = vst.msk [vmem:[#allocation2 + $0x202] ss:$8 sm:$0xf] %vm642_vm2, %v785_v8  }
 0x173   :  { %790 = vst.msk [vmem:[#allocation2 + $0x202] ss:$8 sm:$0xf0] %vm642_vm2, %v785_v8  }
 0x174   :  { %793 = vst.msk [vmem:[#allocation2 + $0x202] ss:$8 sm:$0xf] %vm647_vm3, %v785_v8  }
 0x175   :  { %795 = vst.msk [vmem:[#allocation2 + $0x202] ss:$8 sm:$0xf0] %vm647_vm3, %v785_v8  }
 0x176   :  { %2429 = vst [vmem:[%s3768_s1 + $0x244] sm:$0xf] %v1955_v13 }
 0x177   :  { %2430 = vst [vmem:[%s3768_s1 + $0x248] sm:$0xf] %v1961_v35 }
 0x178   :  { %2431 = vst [vmem:[%s3768_s1 + $0x24c] sm:$0xf] %v1967_v36 }
 0x179   :  { %2432 = vst [vmem:[%s3768_s1 + $0x250] sm:$0xf] %v1973_v37  ;;  %v1001_v37 = vpop.permute.xlu1 %1000  }
 0x17a   :  { %2433 = vst [vmem:[%s3768_s1 + $0x254] sm:$0xf] %v1979_v15 }
 0x17b   :  { %2434 = vst [vmem:[%s3768_s1 + $0x258] sm:$0xf] %v1985_v16  ;;  %v1469_v40 = vld [vmem:[#allocation2 + $0x200] sm:$0xf]  ;;  %v1475_v23 = vld [vmem:[#allocation2 + $0x208] sm:$0xf] }
 0x17c   :  { %2435 = vst [vmem:[%s3768_s1 + $0x25c] sm:$0xf] %v1991_v38  ;;  %v1481_v18 = vld [vmem:[#allocation2 + $0x210] sm:$0xf]  ;;  %v1487_v19 = vld [vmem:[#allocation2 + $0x218] sm:$0xf] }
 0x17d   :  { %770 = vst.msk [vmem:[#allocation2 + $0x1c2] ss:$8 sm:$0xf] %vm642_vm2, %v3261_v25   ;;  %v1493_v41 = vld [vmem:[#allocation2 + $0x220] sm:$0xf] }
 0x17e   :  { %772 = vst.msk [vmem:[#allocation2 + $0x1c2] ss:$8 sm:$0xf0] %vm642_vm2, %v3261_v25   ;;  %v1499_v42 = vld [vmem:[#allocation2 + $0x228] sm:$0xf] }
 0x17f   :  { %775 = vst.msk [vmem:[#allocation2 + $0x1c2] ss:$8 sm:$0xf] %vm647_vm3, %v3261_v25   ;;  %v1505_v43 = vld [vmem:[#allocation2 + $0x230] sm:$0xf] }
 0x180   :  { %777 = vst.msk [vmem:[#allocation2 + $0x1c2] ss:$8 sm:$0xf0] %vm647_vm3, %v3261_v25   ;;  %v1511_v44 = vld [vmem:[#allocation2 + $0x238] sm:$0xf] }
 0x181   :  { %2348 = vst [vmem:[%s3768_s1 + $0x100] sm:$0xf] %v1469_v40 }
 0x182   :  { %2349 = vst [vmem:[%s3768_s1 + $0x104] sm:$0xf] %v1475_v23  ;;  %v3573_v23 = vpop.permute.xlu0 %982  }
 0x183   :  { %2350 = vst [vmem:[%s3768_s1 + $0x108] sm:$0xf] %v1481_v18 }
 0x184   :  { %2351 = vst [vmem:[%s3768_s1 + $0x10c] sm:$0xf] %v1487_v19 }
 0x185   :  { %2352 = vst [vmem:[%s3768_s1 + $0x110] sm:$0xf] %v1493_v41 }
 0x186   :  { %2353 = vst [vmem:[%s3768_s1 + $0x114] sm:$0xf] %v1499_v42  ;;  %v1421_v45 = vld [vmem:[#allocation2 + $0x1c0] sm:$0xf]  ;;  %v1427_v46 = vld [vmem:[#allocation2 + $0x1c8] sm:$0xf] }
 0x187   :  { %2354 = vst [vmem:[%s3768_s1 + $0x118] sm:$0xf] %v1505_v43  ;;  %v1433_v47 = vld [vmem:[#allocation2 + $0x1d0] sm:$0xf]  ;;  %v1439_v48 = vld [vmem:[#allocation2 + $0x1d8] sm:$0xf] }
 0x188   :  { %2355 = vst [vmem:[%s3768_s1 + $0x11c] sm:$0xf] %v1511_v44  ;;  %v1445_v49 = vld [vmem:[#allocation2 + $0x1e0] sm:$0xf]  ;;  %v1451_v51 = vld [vmem:[#allocation2 + $0x1e8] sm:$0xf] }
 0x189   :  { %1022 = vst.msk [vmem:[#allocation2 + $0x542] ss:$8 sm:$0xf] %vm642_vm2, %v1019_v31   ;;  %v1457_v52 = vld [vmem:[#allocation2 + $0x1f0] sm:$0xf] }
 0x18a   :  { %1024 = vst.msk [vmem:[#allocation2 + $0x542] ss:$8 sm:$0xf0] %vm642_vm2, %v1019_v31   ;;  %v1463_v53 = vld [vmem:[#allocation2 + $0x1f8] sm:$0xf] }
 0x18b   :  { %1027 = vst.msk [vmem:[#allocation2 + $0x542] ss:$8 sm:$0xf] %vm647_vm3, %v1019_v31  }
 0x18c   :  { %1029 = vst.msk [vmem:[#allocation2 + $0x542] ss:$8 sm:$0xf0] %vm647_vm3, %v1019_v31  }
 0x18d   :  { %2340 = vst [vmem:[%s3768_s1 + $0xe0] sm:$0xf] %v1421_v45 }
 0x18e   :  { %2341 = vst [vmem:[%s3768_s1 + $0xe4] sm:$0xf] %v1427_v46 }
 0x18f   :  { %2342 = vst [vmem:[%s3768_s1 + $0xe8] sm:$0xf] %v1433_v47 }
 0x190   :  { %2343 = vst [vmem:[%s3768_s1 + $0xec] sm:$0xf] %v1439_v48 }
 0x191   :  { %2344 = vst [vmem:[%s3768_s1 + $0xf0] sm:$0xf] %v1445_v49  ;;  %v1055_v49 = vpop.permute.xlu1 %1054  }
 0x192   :  { %2345 = vst [vmem:[%s3768_s1 + $0xf4] sm:$0xf] %v1451_v51  ;;  %v2093_v54 = vld [vmem:[#allocation2 + $0x540] sm:$0xf]  ;;  %v2099_v55 = vld [vmem:[#allocation2 + $0x548] sm:$0xf] }
 0x193   :  { %2346 = vst [vmem:[%s3768_s1 + $0xf8] sm:$0xf] %v1457_v52  ;;  %v2105_v56 = vld [vmem:[#allocation2 + $0x550] sm:$0xf]  ;;  %v2111_v57 = vld [vmem:[#allocation2 + $0x558] sm:$0xf] }
 0x194   :  { %2347 = vst [vmem:[%s3768_s1 + $0xfc] sm:$0xf] %v1463_v53  ;;  %v2117_v58 = vld [vmem:[#allocation2 + $0x560] sm:$0xf]  ;;  %v2123_v60 = vld [vmem:[#allocation2 + $0x568] sm:$0xf] }
 0x195   :  { %2452 = vst [vmem:[%s3768_s1 + $0x2a0] sm:$0xf] %v2093_v54  ;;  %v2129_v61 = vld [vmem:[#allocation2 + $0x570] sm:$0xf]  ;;  %v2135_v62 = vld [vmem:[#allocation2 + $0x578] sm:$0xf] }
 0x196   :  { %842 = vst.msk [vmem:[#allocation2 + $0x2c2] ss:$8 sm:$0xf] %vm642_vm2, %v839_v20  }
 0x197   :  { %844 = vst.msk [vmem:[#allocation2 + $0x2c2] ss:$8 sm:$0xf0] %vm642_vm2, %v839_v20  }
 0x198   :  { %847 = vst.msk [vmem:[#allocation2 + $0x2c2] ss:$8 sm:$0xf] %vm647_vm3, %v839_v20  }
 0x199   :  { %849 = vst.msk [vmem:[#allocation2 + $0x2c2] ss:$8 sm:$0xf0] %vm647_vm3, %v839_v20  }
 0x19a   :  { %2453 = vst [vmem:[%s3768_s1 + $0x2a4] sm:$0xf] %v2099_v55 }
 0x19b   :  { %2454 = vst [vmem:[%s3768_s1 + $0x2a8] sm:$0xf] %v2105_v56  ;;  %v1037_v56 = vpop.permute.xlu0 %1036  }
 0x19c   :  { %2455 = vst [vmem:[%s3768_s1 + $0x2ac] sm:$0xf] %v2111_v57 }
 0x19d   :  { %2456 = vst [vmem:[%s3768_s1 + $0x2b0] sm:$0xf] %v2117_v58 }
 0x19e   :  { %2457 = vst [vmem:[%s3768_s1 + $0x2b4] sm:$0xf] %v2123_v60 }
 0x19f   :  { %2458 = vst [vmem:[%s3768_s1 + $0x2b8] sm:$0xf] %v2129_v61  ;;  %v1613_v1 = vld [vmem:[#allocation2 + $0x2c0] sm:$0xf]  ;;  %v1619_v2 = vld [vmem:[#allocation2 + $0x2c8] sm:$0xf] }
 0x1a0   :  { %2459 = vst [vmem:[%s3768_s1 + $0x2bc] sm:$0xf] %v2135_v62  ;;  %v1625_v4 = vld [vmem:[#allocation2 + $0x2d0] sm:$0xf]  ;;  %v1631_v5 = vld [vmem:[#allocation2 + $0x2d8] sm:$0xf] }
 0x1a1   :  { %824 = vst.msk [vmem:[#allocation2 + $0x282] ss:$8 sm:$0xf] %vm642_vm2, %v3351_v39   ;;  %v1637_v26 = vld [vmem:[#allocation2 + $0x2e0] sm:$0xf] }
 0x1a2   :  { %826 = vst.msk [vmem:[#allocation2 + $0x282] ss:$8 sm:$0xf0] %vm642_vm2, %v3351_v39   ;;  %v1643_v8 = vld [vmem:[#allocation2 + $0x2e8] sm:$0xf] }
 0x1a3   :  { %829 = vst.msk [vmem:[#allocation2 + $0x282] ss:$8 sm:$0xf] %vm647_vm3, %v3351_v39   ;;  %v1649_v3 = vld [vmem:[#allocation2 + $0x2f0] sm:$0xf] }
 0x1a4   :  { %831 = vst.msk [vmem:[#allocation2 + $0x282] ss:$8 sm:$0xf0] %vm647_vm3, %v3351_v39   ;;  %v1655_v0 = vld [vmem:[#allocation2 + $0x2f8] sm:$0xf] }
 0x1a5   :  { %2372 = vst [vmem:[%s3768_s1 + $0x160] sm:$0xf] %v1613_v1 }
 0x1a6   :  { %2373 = vst [vmem:[%s3768_s1 + $0x164] sm:$0xf] %v1619_v2 }
 0x1a7   :  { %2374 = vst [vmem:[%s3768_s1 + $0x168] sm:$0xf] %v1625_v4 }
 0x1a8   :  { %2375 = vst [vmem:[%s3768_s1 + $0x16c] sm:$0xf] %v1631_v5 }
 0x1a9   :  { %2376 = vst [vmem:[%s3768_s1 + $0x170] sm:$0xf] %v1637_v26 }
 0x1aa   :  { %2377 = vst [vmem:[%s3768_s1 + $0x174] sm:$0xf] %v1643_v8  ;;  %v1565_v24 = vld [vmem:[#allocation2 + $0x280] sm:$0xf]  ;;  %v1571_v25 = vld [vmem:[#allocation2 + $0x288] sm:$0xf] }
 0x1ab   :  { %2378 = vst [vmem:[%s3768_s1 + $0x178] sm:$0xf] %v1649_v3  ;;  %v1577_v27 = vld [vmem:[#allocation2 + $0x290] sm:$0xf]  ;;  %v1583_v11 = vld [vmem:[#allocation2 + $0x298] sm:$0xf] }
 0x1ac   :  { %2379 = vst [vmem:[%s3768_s1 + $0x17c] sm:$0xf] %v1655_v0  ;;  %v1589_v6 = vld [vmem:[#allocation2 + $0x2a0] sm:$0xf]  ;;  %v1595_v28 = vld [vmem:[#allocation2 + $0x2a8] sm:$0xf] }
 0x1ad   :  { %1076 = vst.msk [vmem:[#allocation2 + $0x602] ss:$8 sm:$0xf] %vm642_vm2, %v1073_v50   ;;  %v1601_v30 = vld [vmem:[#allocation2 + $0x2b0] sm:$0xf] }
 0x1ae   :  { %1078 = vst.msk [vmem:[#allocation2 + $0x602] ss:$8 sm:$0xf0] %vm642_vm2, %v1073_v50   ;;  %v1607_v32 = vld [vmem:[#allocation2 + $0x2b8] sm:$0xf] }
 0x1af   :  { %1081 = vst.msk [vmem:[#allocation2 + $0x602] ss:$8 sm:$0xf] %vm647_vm3, %v1073_v50  }
 0x1b0   :  { %1083 = vst.msk [vmem:[#allocation2 + $0x602] ss:$8 sm:$0xf0] %vm647_vm3, %v1073_v50  }
 0x1b1   :  { %2364 = vst [vmem:[%s3768_s1 + $0x140] sm:$0xf] %v1565_v24 }
 0x1b2   :  { %2365 = vst [vmem:[%s3768_s1 + $0x144] sm:$0xf] %v1571_v25 }
 0x1b3   :  { %2366 = vst [vmem:[%s3768_s1 + $0x148] sm:$0xf] %v1577_v27 }
 0x1b4   :  { %2367 = vst [vmem:[%s3768_s1 + $0x14c] sm:$0xf] %v1583_v11 }
 0x1b5   :  { %2368 = vst [vmem:[%s3768_s1 + $0x150] sm:$0xf] %v1589_v6 }
 0x1b6   :  { %2369 = vst [vmem:[%s3768_s1 + $0x154] sm:$0xf] %v1595_v28  ;;  %v2237_v14 = vld [vmem:[#allocation2 + $0x600] sm:$0xf]  ;;  %v2243_v9 = vld [vmem:[#allocation2 + $0x608] sm:$0xf] }
 0x1b7   :  { %2370 = vst [vmem:[%s3768_s1 + $0x158] sm:$0xf] %v1601_v30  ;;  %v2249_v10 = vld [vmem:[#allocation2 + $0x610] sm:$0xf]  ;;  %v2255_v29 = vld [vmem:[#allocation2 + $0x618] sm:$0xf] }
 0x1b8   :  { %2371 = vst [vmem:[%s3768_s1 + $0x15c] sm:$0xf] %v1607_v32  ;;  %v2261_v21 = vld [vmem:[#allocation2 + $0x620] sm:$0xf]  ;;  %v2267_v31 = vld [vmem:[#allocation2 + $0x628] sm:$0xf] }
 0x1b9   :  { %2476 = vst [vmem:[%s3768_s1 + $0x300] sm:$0xf] %v2237_v14  ;;  %v2273_v33 = vld [vmem:[#allocation2 + $0x630] sm:$0xf]  ;;  %v2279_v34 = vld [vmem:[#allocation2 + $0x638] sm:$0xf] }
 0x1ba   :  { %896 = vst.msk [vmem:[#allocation2 + $0x382] ss:$8 sm:$0xf] %vm642_vm2, %v893_v59  }
 0x1bb   :  { %898 = vst.msk [vmem:[#allocation2 + $0x382] ss:$8 sm:$0xf0] %vm642_vm2, %v893_v59  }
 0x1bc   :  { %901 = vst.msk [vmem:[#allocation2 + $0x382] ss:$8 sm:$0xf] %vm647_vm3, %v893_v59  }
 0x1bd   :  { %903 = vst.msk [vmem:[#allocation2 + $0x382] ss:$8 sm:$0xf0] %vm647_vm3, %v893_v59  }
 0x1be   :  { %2477 = vst [vmem:[%s3768_s1 + $0x304] sm:$0xf] %v2243_v9 }
 0x1bf   :  { %2478 = vst [vmem:[%s3768_s1 + $0x308] sm:$0xf] %v2249_v10 }
 0x1c0   :  { %2479 = vst [vmem:[%s3768_s1 + $0x30c] sm:$0xf] %v2255_v29 }
 0x1c1   :  { %2480 = vst [vmem:[%s3768_s1 + $0x310] sm:$0xf] %v2261_v21 }
 0x1c2   :  { %2481 = vst [vmem:[%s3768_s1 + $0x314] sm:$0xf] %v2267_v31 }
 0x1c3   :  { %2482 = vst [vmem:[%s3768_s1 + $0x318] sm:$0xf] %v2273_v33  ;;  %v1757_v17 = vld [vmem:[#allocation2 + $0x380] sm:$0xf]  ;;  %v1763_v12 = vld [vmem:[#allocation2 + $0x388] sm:$0xf] }
 0x1c4   :  { %2483 = vst [vmem:[%s3768_s1 + $0x31c] sm:$0xf] %v2279_v34  ;;  %v1769_v13 = vld [vmem:[#allocation2 + $0x390] sm:$0xf]  ;;  %v1775_v35 = vld [vmem:[#allocation2 + $0x398] sm:$0xf] }
 0x1c5   :  { %878 = vst.msk [vmem:[#allocation2 + $0x342] ss:$8 sm:$0xf] %vm642_vm2, %v3441_v63   ;;  %v1781_v36 = vld [vmem:[#allocation2 + $0x3a0] sm:$0xf] }
 0x1c6   :  { %880 = vst.msk [vmem:[#allocation2 + $0x342] ss:$8 sm:$0xf0] %vm642_vm2, %v3441_v63   ;;  %v1787_v20 = vld [vmem:[#allocation2 + $0x3a8] sm:$0xf] }
 0x1c7   :  { %883 = vst.msk [vmem:[#allocation2 + $0x342] ss:$8 sm:$0xf] %vm647_vm3, %v3441_v63   ;;  %v1793_v15 = vld [vmem:[#allocation2 + $0x3b0] sm:$0xf] }
 0x1c8   :  { %885 = vst.msk [vmem:[#allocation2 + $0x342] ss:$8 sm:$0xf0] %vm647_vm3, %v3441_v63   ;;  %v1799_v16 = vld [vmem:[#allocation2 + $0x3b8] sm:$0xf] }
 0x1c9   :  { %2396 = vst [vmem:[%s3768_s1 + $0x1c0] sm:$0xf] %v1757_v17 }
 0x1ca   :  { %2397 = vst [vmem:[%s3768_s1 + $0x1c4] sm:$0xf] %v1763_v12 }
 0x1cb   :  { %2398 = vst [vmem:[%s3768_s1 + $0x1c8] sm:$0xf] %v1769_v13 }
 0x1cc   :  { %2399 = vst [vmem:[%s3768_s1 + $0x1cc] sm:$0xf] %v1775_v35 }
 0x1cd   :  { %2400 = vst [vmem:[%s3768_s1 + $0x1d0] sm:$0xf] %v1781_v36 }
 0x1ce   :  { %2401 = vst [vmem:[%s3768_s1 + $0x1d4] sm:$0xf] %v1787_v20  ;;  %v1709_v38 = vld [vmem:[#allocation2 + $0x340] sm:$0xf]  ;;  %v1715_v39 = vld [vmem:[#allocation2 + $0x348] sm:$0xf] }
 0x1cf   :  { %2402 = vst [vmem:[%s3768_s1 + $0x1d8] sm:$0xf] %v1793_v15  ;;  %v1721_v40 = vld [vmem:[#allocation2 + $0x350] sm:$0xf]  ;;  %v1727_v18 = vld [vmem:[#allocation2 + $0x358] sm:$0xf] }
 0x1d0   :  { %2403 = vst [vmem:[%s3768_s1 + $0x1dc] sm:$0xf] %v1799_v16  ;;  %v1733_v19 = vld [vmem:[#allocation2 + $0x360] sm:$0xf]  ;;  %v1739_v41 = vld [vmem:[#allocation2 + $0x368] sm:$0xf] }
 0x1d1   :  { %950 = vst.msk [vmem:[#allocation2 + $0x442] ss:$8 sm:$0xf] %vm642_vm2, %v947_v7   ;;  %v1745_v42 = vld [vmem:[#allocation2 + $0x370] sm:$0xf] }
 0x1d2   :  { %952 = vst.msk [vmem:[#allocation2 + $0x442] ss:$8 sm:$0xf0] %vm642_vm2, %v947_v7   ;;  %v1751_v43 = vld [vmem:[#allocation2 + $0x378] sm:$0xf] }
 0x1d3   :  { %955 = vst.msk [vmem:[#allocation2 + $0x442] ss:$8 sm:$0xf] %vm647_vm3, %v947_v7  }
 0x1d4   :  { %957 = vst.msk [vmem:[#allocation2 + $0x442] ss:$8 sm:$0xf0] %vm647_vm3, %v947_v7  }
 0x1d5   :  { %2388 = vst [vmem:[%s3768_s1 + $0x1a0] sm:$0xf] %v1709_v38 }
 0x1d6   :  { %2389 = vst [vmem:[%s3768_s1 + $0x1a4] sm:$0xf] %v1715_v39 }
 0x1d7   :  { %2390 = vst [vmem:[%s3768_s1 + $0x1a8] sm:$0xf] %v1721_v40 }
 0x1d8   :  { %2391 = vst [vmem:[%s3768_s1 + $0x1ac] sm:$0xf] %v1727_v18 }
 0x1d9   :  { %2392 = vst [vmem:[%s3768_s1 + $0x1b0] sm:$0xf] %v1733_v19 }
 0x1da   :  { %2393 = vst [vmem:[%s3768_s1 + $0x1b4] sm:$0xf] %v1739_v41  ;;  %v1901_v44 = vld [vmem:[#allocation2 + $0x440] sm:$0xf]  ;;  %v1907_v45 = vld [vmem:[#allocation2 + $0x448] sm:$0xf] }
 0x1db   :  { %2394 = vst [vmem:[%s3768_s1 + $0x1b8] sm:$0xf] %v1745_v42  ;;  %v1913_v46 = vld [vmem:[#allocation2 + $0x450] sm:$0xf]  ;;  %v1919_v47 = vld [vmem:[#allocation2 + $0x458] sm:$0xf] }
 0x1dc   :  { %2395 = vst [vmem:[%s3768_s1 + $0x1bc] sm:$0xf] %v1751_v43  ;;  %v1925_v48 = vld [vmem:[#allocation2 + $0x460] sm:$0xf]  ;;  %v1931_v50 = vld [vmem:[#allocation2 + $0x468] sm:$0xf] }
 0x1dd   :  { %2420 = vst [vmem:[%s3768_s1 + $0x220] sm:$0xf] %v1901_v44  ;;  %v1937_v51 = vld [vmem:[#allocation2 + $0x470] sm:$0xf]  ;;  %v1943_v52 = vld [vmem:[#allocation2 + $0x478] sm:$0xf] }
 0x1de   :  { %932 = vst.msk [vmem:[#allocation2 + $0x402] ss:$8 sm:$0xf] %vm642_vm2, %v929_v22  }
 0x1df   :  { %934 = vst.msk [vmem:[#allocation2 + $0x402] ss:$8 sm:$0xf0] %vm642_vm2, %v929_v22  }
 0x1e0   :  { %937 = vst.msk [vmem:[#allocation2 + $0x402] ss:$8 sm:$0xf] %vm647_vm3, %v929_v22  }
 0x1e1   :  { %939 = vst.msk [vmem:[#allocation2 + $0x402] ss:$8 sm:$0xf0] %vm647_vm3, %v929_v22  }
 0x1e2   :  { %2421 = vst [vmem:[%s3768_s1 + $0x224] sm:$0xf] %v1907_v45 }
 0x1e3   :  { %2422 = vst [vmem:[%s3768_s1 + $0x228] sm:$0xf] %v1913_v46 }
 0x1e4   :  { %2423 = vst [vmem:[%s3768_s1 + $0x22c] sm:$0xf] %v1919_v47 }
 0x1e5   :  { %2424 = vst [vmem:[%s3768_s1 + $0x230] sm:$0xf] %v1925_v48 }
 0x1e6   :  { %2425 = vst [vmem:[%s3768_s1 + $0x234] sm:$0xf] %v1931_v50 }
 0x1e7   :  { %2426 = vst [vmem:[%s3768_s1 + $0x238] sm:$0xf] %v1937_v51  ;;  %v1853_v53 = vld [vmem:[#allocation2 + $0x400] sm:$0xf]  ;;  %v1859_v54 = vld [vmem:[#allocation2 + $0x408] sm:$0xf] }
 0x1e8   :  { %2427 = vst [vmem:[%s3768_s1 + $0x23c] sm:$0xf] %v1943_v52  ;;  %v1865_v55 = vld [vmem:[#allocation2 + $0x410] sm:$0xf]  ;;  %v1871_v57 = vld [vmem:[#allocation2 + $0x418] sm:$0xf] }
 0x1e9   :  { %1004 = vst.msk [vmem:[#allocation2 + $0x502] ss:$8 sm:$0xf] %vm642_vm2, %v1001_v37   ;;  %v1877_v58 = vld [vmem:[#allocation2 + $0x420] sm:$0xf] }
 0x1ea   :  { %1006 = vst.msk [vmem:[#allocation2 + $0x502] ss:$8 sm:$0xf0] %vm642_vm2, %v1001_v37   ;;  %v1883_v59 = vld [vmem:[#allocation2 + $0x428] sm:$0xf] }
 0x1eb   :  { %1009 = vst.msk [vmem:[#allocation2 + $0x502] ss:$8 sm:$0xf] %vm647_vm3, %v1001_v37   ;;  %v1889_v60 = vld [vmem:[#allocation2 + $0x430] sm:$0xf] }
 0x1ec   :  { %1011 = vst.msk [vmem:[#allocation2 + $0x502] ss:$8 sm:$0xf0] %vm647_vm3, %v1001_v37   ;;  %v1895_v61 = vld [vmem:[#allocation2 + $0x438] sm:$0xf] }
 0x1ed   :  { %2412 = vst [vmem:[%s3768_s1 + $0x200] sm:$0xf] %v1853_v53 }
 0x1ee   :  { %2413 = vst [vmem:[%s3768_s1 + $0x204] sm:$0xf] %v1859_v54 }
 0x1ef   :  { %2414 = vst [vmem:[%s3768_s1 + $0x208] sm:$0xf] %v1865_v55 }
 0x1f0   :  { %2415 = vst [vmem:[%s3768_s1 + $0x20c] sm:$0xf] %v1871_v57 }
 0x1f1   :  { %2416 = vst [vmem:[%s3768_s1 + $0x210] sm:$0xf] %v1877_v58 }
 0x1f2   :  { %2417 = vst [vmem:[%s3768_s1 + $0x214] sm:$0xf] %v1883_v59  ;;  %v2045_v62 = vld [vmem:[#allocation2 + $0x500] sm:$0xf]  ;;  %v2051_v63 = vld [vmem:[#allocation2 + $0x508] sm:$0xf] }
 0x1f3   :  { %2418 = vst [vmem:[%s3768_s1 + $0x218] sm:$0xf] %v1889_v60  ;;  %v2057_v1 = vld [vmem:[#allocation2 + $0x510] sm:$0xf]  ;;  %v2063_v2 = vld [vmem:[#allocation2 + $0x518] sm:$0xf] }
 0x1f4   :  { %2419 = vst [vmem:[%s3768_s1 + $0x21c] sm:$0xf] %v1895_v61  ;;  %v2069_v4 = vld [vmem:[#allocation2 + $0x520] sm:$0xf]  ;;  %v2075_v5 = vld [vmem:[#allocation2 + $0x528] sm:$0xf] }
 0x1f5   :  { %2444 = vst [vmem:[%s3768_s1 + $0x280] sm:$0xf] %v2045_v62  ;;  %v2081_v26 = vld [vmem:[#allocation2 + $0x530] sm:$0xf]  ;;  %v2087_v8 = vld [vmem:[#allocation2 + $0x538] sm:$0xf] }
 0x1f6   :  { %986 = vst.msk [vmem:[#allocation2 + $0x4c2] ss:$8 sm:$0xf] %vm642_vm2, %v3573_v23  }
 0x1f7   :  { %988 = vst.msk [vmem:[#allocation2 + $0x4c2] ss:$8 sm:$0xf0] %vm642_vm2, %v3573_v23  }
 0x1f8   :  { %991 = vst.msk [vmem:[#allocation2 + $0x4c2] ss:$8 sm:$0xf] %vm647_vm3, %v3573_v23  }
 0x1f9   :  { %993 = vst.msk [vmem:[#allocation2 + $0x4c2] ss:$8 sm:$0xf0] %vm647_vm3, %v3573_v23  }
 0x1fa   :  { %2445 = vst [vmem:[%s3768_s1 + $0x284] sm:$0xf] %v2051_v63 }
 0x1fb   :  { %2446 = vst [vmem:[%s3768_s1 + $0x288] sm:$0xf] %v2057_v1 }
 0x1fc   :  { %2447 = vst [vmem:[%s3768_s1 + $0x28c] sm:$0xf] %v2063_v2 }
 0x1fd   :  { %2448 = vst [vmem:[%s3768_s1 + $0x290] sm:$0xf] %v2069_v4 }
 0x1fe   :  { %2449 = vst [vmem:[%s3768_s1 + $0x294] sm:$0xf] %v2075_v5 }
 0x1ff   :  { %2450 = vst [vmem:[%s3768_s1 + $0x298] sm:$0xf] %v2081_v26  ;;  %v1997_v3 = vld [vmem:[#allocation2 + $0x4c0] sm:$0xf]  ;;  %v2003_v0 = vld [vmem:[#allocation2 + $0x4c8] sm:$0xf] }
 0x200   :  { %2451 = vst [vmem:[%s3768_s1 + $0x29c] sm:$0xf] %v2087_v8  ;;  %v2009_v24 = vld [vmem:[#allocation2 + $0x4d0] sm:$0xf]  ;;  %v2015_v25 = vld [vmem:[#allocation2 + $0x4d8] sm:$0xf] }
 0x201   :  { %1058 = vst.msk [vmem:[#allocation2 + $0x5c2] ss:$8 sm:$0xf] %vm642_vm2, %v1055_v49   ;;  %v2021_v27 = vld [vmem:[#allocation2 + $0x4e0] sm:$0xf] }
 0x202   :  { %1060 = vst.msk [vmem:[#allocation2 + $0x5c2] ss:$8 sm:$0xf0] %vm642_vm2, %v1055_v49   ;;  %v2027_v11 = vld [vmem:[#allocation2 + $0x4e8] sm:$0xf] }
 0x203   :  { %1063 = vst.msk [vmem:[#allocation2 + $0x5c2] ss:$8 sm:$0xf] %vm647_vm3, %v1055_v49   ;;  %v2033_v6 = vld [vmem:[#allocation2 + $0x4f0] sm:$0xf] }
 0x204   :  { %1065 = vst.msk [vmem:[#allocation2 + $0x5c2] ss:$8 sm:$0xf0] %vm647_vm3, %v1055_v49   ;;  %v2039_v7 = vld [vmem:[#allocation2 + $0x4f8] sm:$0xf] }
 0x205   :  { %2436 = vst [vmem:[%s3768_s1 + $0x260] sm:$0xf] %v1997_v3 }
 0x206   :  { %2437 = vst [vmem:[%s3768_s1 + $0x264] sm:$0xf] %v2003_v0 }
 0x207   :  { %2438 = vst [vmem:[%s3768_s1 + $0x268] sm:$0xf] %v2009_v24 }
 0x208   :  { %2439 = vst [vmem:[%s3768_s1 + $0x26c] sm:$0xf] %v2015_v25 }
 0x209   :  { %2440 = vst [vmem:[%s3768_s1 + $0x270] sm:$0xf] %v2021_v27 }
 0x20a   :  { %2441 = vst [vmem:[%s3768_s1 + $0x274] sm:$0xf] %v2027_v11  ;;  %v2189_v28 = vld [vmem:[#allocation2 + $0x5c0] sm:$0xf]  ;;  %v2195_v30 = vld [vmem:[#allocation2 + $0x5c8] sm:$0xf] }
 0x20b   :  { %2442 = vst [vmem:[%s3768_s1 + $0x278] sm:$0xf] %v2033_v6  ;;  %v2201_v32 = vld [vmem:[#allocation2 + $0x5d0] sm:$0xf]  ;;  %v2207_v14 = vld [vmem:[#allocation2 + $0x5d8] sm:$0xf] }
 0x20c   :  { %2443 = vst [vmem:[%s3768_s1 + $0x27c] sm:$0xf] %v2039_v7  ;;  %v2213_v9 = vld [vmem:[#allocation2 + $0x5e0] sm:$0xf]  ;;  %v2219_v10 = vld [vmem:[#allocation2 + $0x5e8] sm:$0xf] }
 0x20d   :  { %2468 = vst [vmem:[%s3768_s1 + $0x2e0] sm:$0xf] %v2189_v28  ;;  %v2225_v13 = vld [vmem:[#allocation2 + $0x5f0] sm:$0xf]  ;;  %v2231_v35 = vld [vmem:[#allocation2 + $0x5f8] sm:$0xf] }
 0x20e   :  { %1040 = vst.msk [vmem:[#allocation2 + $0x582] ss:$8 sm:$0xf] %vm642_vm2, %v1037_v56  }
 0x20f   :  { %1042 = vst.msk [vmem:[#allocation2 + $0x582] ss:$8 sm:$0xf0] %vm642_vm2, %v1037_v56  }
 0x210   :  { %1045 = vst.msk [vmem:[#allocation2 + $0x582] ss:$8 sm:$0xf] %vm647_vm3, %v1037_v56  }
 0x211   :  { %1047 = vst.msk [vmem:[#allocation2 + $0x582] ss:$8 sm:$0xf0] %vm647_vm3, %v1037_v56  }
 0x212   :  { %2469 = vst [vmem:[%s3768_s1 + $0x2e4] sm:$0xf] %v2195_v30 }
 0x213   :  { %2470 = vst [vmem:[%s3768_s1 + $0x2e8] sm:$0xf] %v2201_v32 }
 0x214   :  { %2471 = vst [vmem:[%s3768_s1 + $0x2ec] sm:$0xf] %v2207_v14 }
 0x215   :  { %2472 = vst [vmem:[%s3768_s1 + $0x2f0] sm:$0xf] %v2213_v9 }
 0x216   :  { %2473 = vst [vmem:[%s3768_s1 + $0x2f4] sm:$0xf] %v2219_v10 }
 0x217   :  { %v2141_v29 = vld [vmem:[#allocation2 + $0x580] sm:$0xf]  ;;  %v2147_v21 = vld [vmem:[#allocation2 + $0x588] sm:$0xf]  ;;  %v2153_v22 = vld [vmem:[#allocation2 + $0x590] sm:$0xf] }
 0x218   :  { %2460 = vst [vmem:[%s3768_s1 + $0x2c0] sm:$0xf] %v2141_v29  ;;  %v2159_v31 = vld [vmem:[#allocation2 + $0x598] sm:$0xf]  ;;  %v2165_v33 = vld [vmem:[#allocation2 + $0x5a0] sm:$0xf] }
 0x219   :  { %2461 = vst [vmem:[%s3768_s1 + $0x2c4] sm:$0xf] %v2147_v21  ;;  %v2171_v34 = vld [vmem:[#allocation2 + $0x5a8] sm:$0xf]  ;;  %v2177_v17 = vld [vmem:[#allocation2 + $0x5b0] sm:$0xf] }
 0x21a   :  { %2462 = vst [vmem:[%s3768_s1 + $0x2c8] sm:$0xf] %v2153_v22  ;;  %v2183_v12 = vld [vmem:[#allocation2 + $0x5b8] sm:$0xf] }
 0x21b   :  { %2463 = vst [vmem:[%s3768_s1 + $0x2cc] sm:$0xf] %v2159_v31 }
 0x21c   :  { %2464 = vst [vmem:[%s3768_s1 + $0x2d0] sm:$0xf] %v2165_v33 }
 0x21d   :  { %2465 = vst [vmem:[%s3768_s1 + $0x2d4] sm:$0xf] %v2171_v34 }
 0x21e   :  { %2466 = vst [vmem:[%s3768_s1 + $0x2d8] sm:$0xf] %v2177_v17 }
 0x21f   :  { %2467 = vst [vmem:[%s3768_s1 + $0x2dc] sm:$0xf] %v2183_v12 }
 0x220   :  { %2474 = vst [vmem:[%s3768_s1 + $0x2f8] sm:$0xf] %v2225_v13 }
 0x221   :  { %2475 = vst [vmem:[%s3768_s1 + $0x2fc] sm:$0xf] %v2231_v35 }
 0x222   :  { %2284 = vsyncpa [#allocation1], 1 }

// kernel: _device_forward.1
= control target key start
LH: loop header
LB: loop body
LE: loop exit
PB: predicated region body
PF: predicated region fallthrough
CT: control target
= control target key end

     0   :  { %vm387_vm0 = vcmask 1043456   ;;  %vm380_vm1 = vcmask 556032   ;;  %vm859_vm2 = vcmask 1041408   ;;  %vm852_vm3 = vcmask 15360   ;;  %s2757_s1 = inlined_call_operand.vmem [shape: f32[2500,2], index: 1, kind: input, shape index: {}]   ;;  %s2758_s0 = inlined_call_operand.vmem [shape: f32[16,2500], index: 0, kind: input, shape index: {}]   ;;  %s2759_s2 = inlined_call_operand.vmem [shape: f32[1,2], index: 2, kind: input, shape index: {}]   ;;  %s2760_s4 = inlined_call_operand.vmem [shape: f32[9,2,10], index: 4, kind: input, shape index: {}]   ;;  %s2761_s3 = inlined_call_operand.vmem [shape: f32[9,16,16], index: 3, kind: input, shape index: {}]   ;;  %s2762_s5 = inlined_call_operand.vmem [shape: f32[1,10], index: 5, kind: input, shape index: {}]   ;;  %s2763_s6 = inlined_call_operand.vmem [shape: f32[16,10], index: 6, kind: output, shape index: {}]  }
   0x1   :  { %v78_v0 = vld [vmem:[%s2757_s1 + $0x78] sm:$0xff]  ;;  %v77_v2 = vld [vmem:[%s2757_s1 + $0x70] sm:$0xff]  ;;  %v76_v6 = vld [vmem:[%s2757_s1 + $0x68] sm:$0xff]  ;;  %vm919_vm4 = vcmask 130048   ;;  %vm1425_vm6 = vcmask 80896  }
   0x2   :  { %v110_v1 = vld [vmem:[%s2757_s1 + $0x178] sm:$0xff]  ;;  %391 = vmatpush.msra.mxu0 %v78_v0  ;;  %v109_v4 = vld [vmem:[%s2757_s1 + $0x170] sm:$0xff]  ;;  %v108_v8 = vld [vmem:[%s2757_s1 + $0x168] sm:$0xff] }
   0x3   :  { %437 = vmatpush.msra.mxu2 %v110_v1  ;;  %v94_v3 = vld [vmem:[%s2757_s1 + $0xf8] sm:$0xff]  ;;  %v93_v7 = vld [vmem:[%s2757_s1 + $0xf0] sm:$0xff]  ;;  %v92_v10 = vld [vmem:[%s2757_s1 + $0xe8] sm:$0xff] }
   0x4   :  { %v126_v5 = vld [vmem:[%s2757_s1 + $0x1f8] sm:$0xff]  ;;  %414 = vmatpush.msra.mxu1 %v94_v3  ;;  %392 = vmatpush.msra.mxu0 %v77_v2  ;;  %v125_v9 = vld [vmem:[%s2757_s1 + $0x1f0] sm:$0xff]  ;;  %v75_v11 = vld [vmem:[%s2757_s1 + $0x60] sm:$0xff] }
   0x5   :  { %460 = vmatpush.msra.mxu3 %v126_v5  ;;  %438 = vmatpush.msra.mxu2 %v109_v4  ;;  %v107_v12 = vld [vmem:[%s2757_s1 + $0x160] sm:$0xff]  ;;  %v124_v13 = vld [vmem:[%s2757_s1 + $0x1e8] sm:$0xff]  ;;  %v74_v16 = vld [vmem:[%s2757_s1 + $0x58] sm:$0xff] }
   0x6   :  { %415 = vmatpush.msra.mxu1 %v93_v7  ;;  %393 = vmatpush.msra.mxu0 %v76_v6  ;;  %v91_v14 = vld [vmem:[%s2757_s1 + $0xe0] sm:$0xff]  ;;  %v106_v17 = vld [vmem:[%s2757_s1 + $0x158] sm:$0xff]  ;;  %v73_v20 = vld [vmem:[%s2757_s1 + $0x50] sm:$0xff] }
   0x7   :  { %461 = vmatpush.msra.mxu3 %v125_v9  ;;  %439 = vmatpush.msra.mxu2 %v108_v8  ;;  %v123_v15 = vld [vmem:[%s2757_s1 + $0x1e0] sm:$0xff]  ;;  %v90_v18 = vld [vmem:[%s2757_s1 + $0xd8] sm:$0xff]  ;;  %v105_v21 = vld [vmem:[%s2757_s1 + $0x150] sm:$0xff] }
   0x8   :  { %416 = vmatpush.msra.mxu1 %v92_v10  ;;  %394 = vmatpush.msra.mxu0 %v75_v11  ;;  %v122_v19 = vld [vmem:[%s2757_s1 + $0x1d8] sm:$0xff]  ;;  %v89_v22 = vld [vmem:[%s2757_s1 + $0xd0] sm:$0xff]  ;;  %v72_v24 = vld [vmem:[%s2757_s1 + $0x48] sm:$0xff] }
   0x9   :  { %462 = vmatpush.msra.mxu3 %v124_v13  ;;  %440 = vmatpush.msra.mxu2 %v107_v12  ;;  %v121_v23 = vld [vmem:[%s2757_s1 + $0x1d0] sm:$0xff]  ;;  %v104_v25 = vld [vmem:[%s2757_s1 + $0x148] sm:$0xff]  ;;  %v71_v28 = vld [vmem:[%s2757_s1 + $0x40] sm:$0xff] }
   0xa   :  { %417 = vmatpush.msra.mxu1 %v91_v14  ;;  %395 = vmatpush.msra.mxu0 %v74_v16  ;;  %v88_v26 = vld [vmem:[%s2757_s1 + $0xc8] sm:$0xff]  ;;  %v103_v29 = vld [vmem:[%s2757_s1 + $0x140] sm:$0xff]  ;;  %v70_v32 = vld [vmem:[%s2757_s1 + $0x38] sm:$0xff] }
   0xb   :  { %463 = vmatpush.msra.mxu3 %v123_v15  ;;  %441 = vmatpush.msra.mxu2 %v106_v17  ;;  %v120_v27 = vld [vmem:[%s2757_s1 + $0x1c8] sm:$0xff]  ;;  %v87_v30 = vld [vmem:[%s2757_s1 + $0xc0] sm:$0xff]  ;;  %v102_v33 = vld [vmem:[%s2757_s1 + $0x138] sm:$0xff] }
   0xc   :  { %418 = vmatpush.msra.mxu1 %v90_v18  ;;  %396 = vmatpush.msra.mxu0 %v73_v20  ;;  %v119_v31 = vld [vmem:[%s2757_s1 + $0x1c0] sm:$0xff]  ;;  %v86_v34 = vld [vmem:[%s2757_s1 + $0xb8] sm:$0xff]  ;;  %v69_v36 = vld [vmem:[%s2757_s1 + $0x30] sm:$0xff] }
   0xd   :  { %464 = vmatpush.msra.mxu3 %v122_v19  ;;  %442 = vmatpush.msra.mxu2 %v105_v21  ;;  %v118_v35 = vld [vmem:[%s2757_s1 + $0x1b8] sm:$0xff]  ;;  %v101_v37 = vld [vmem:[%s2757_s1 + $0x130] sm:$0xff]  ;;  %v68_v40 = vld [vmem:[%s2757_s1 + $0x28] sm:$0xff] }
   0xe   :  { %419 = vmatpush.msra.mxu1 %v89_v22  ;;  %397 = vmatpush.msra.mxu0 %v72_v24  ;;  %v85_v38 = vld [vmem:[%s2757_s1 + $0xb0] sm:$0xff]  ;;  %v100_v41 = vld [vmem:[%s2757_s1 + $0x128] sm:$0xff]  ;;  %v67_v44 = vld [vmem:[%s2757_s1 + $0x20] sm:$0xff] }
   0xf   :  { %465 = vmatpush.msra.mxu3 %v121_v23  ;;  %443 = vmatpush.msra.mxu2 %v104_v25  ;;  %v117_v39 = vld [vmem:[%s2757_s1 + $0x1b0] sm:$0xff]  ;;  %v84_v42 = vld [vmem:[%s2757_s1 + $0xa8] sm:$0xff]  ;;  %v99_v45 = vld [vmem:[%s2757_s1 + $0x120] sm:$0xff] }
  0x10   :  { %420 = vmatpush.msra.mxu1 %v88_v26  ;;  %398 = vmatpush.msra.mxu0 %v71_v28  ;;  %v116_v43 = vld [vmem:[%s2757_s1 + $0x1a8] sm:$0xff]  ;;  %v83_v46 = vld [vmem:[%s2757_s1 + $0xa0] sm:$0xff]  ;;  %v66_v48 = vld [vmem:[%s2757_s1 + $0x18] sm:$0xff] }
  0x11   :  { %466 = vmatpush.msra.mxu3 %v120_v27  ;;  %444 = vmatpush.msra.mxu2 %v103_v29  ;;  %v115_v47 = vld [vmem:[%s2757_s1 + $0x1a0] sm:$0xff]  ;;  %v98_v49 = vld [vmem:[%s2757_s1 + $0x118] sm:$0xff]  ;;  %v65_v52 = vld [vmem:[%s2757_s1 + $0x10] sm:$0xff] }
  0x12   :  { %421 = vmatpush.msra.mxu1 %v87_v30  ;;  %399 = vmatpush.msra.mxu0 %v70_v32  ;;  %v82_v50 = vld [vmem:[%s2757_s1 + $0x98] sm:$0xff]  ;;  %v97_v53 = vld [vmem:[%s2757_s1 + $0x110] sm:$0xff]  ;;  %v64_v56 = vld [vmem:[%s2757_s1 + $0x8] sm:$0xff] }
  0x13   :  { %467 = vmatpush.msra.mxu3 %v119_v31  ;;  %445 = vmatpush.msra.mxu2 %v102_v33  ;;  %v114_v51 = vld [vmem:[%s2757_s1 + $0x198] sm:$0xff]  ;;  %v81_v54 = vld [vmem:[%s2757_s1 + $0x90] sm:$0xff]  ;;  %v96_v57 = vld [vmem:[%s2757_s1 + $0x108] sm:$0xff] }
  0x14   :  { %422 = vmatpush.msra.mxu1 %v86_v34  ;;  %400 = vmatpush.msra.mxu0 %v69_v36  ;;  %v113_v55 = vld [vmem:[%s2757_s1 + $0x190] sm:$0xff]  ;;  %v80_v58 = vld [vmem:[%s2757_s1 + $0x88] sm:$0xff]  ;;  %v63_v60 = vld [vmem:[%s2757_s1] sm:$0xff] }
  0x15   :  { %468 = vmatpush.msra.mxu3 %v118_v35  ;;  %446 = vmatpush.msra.mxu2 %v101_v37  ;;  %v112_v59 = vld [vmem:[%s2757_s1 + $0x188] sm:$0xff]  ;;  %v95_v61 = vld [vmem:[%s2757_s1 + $0x100] sm:$0xff]  ;;  %v142_v62 = vld [vmem:[%s2757_s1 + $0x278] sm:$0xff] }
  0x16   :  { %423 = vmatpush.msra.mxu1 %v85_v38  ;;  %401 = vmatpush.msra.mxu0 %v68_v40  ;;  %v174_v63 = vld [vmem:[%s2757_s1 + $0x378] sm:$0xff]  ;;  %v79_v0 = vld [vmem:[%s2757_s1 + $0x80] sm:$0xff]  ;;  %v141_v2 = vld [vmem:[%s2757_s1 + $0x270] sm:$0xff] }
  0x17   :  { %469 = vmatpush.msra.mxu3 %v117_v39  ;;  %447 = vmatpush.msra.mxu2 %v100_v41  ;;  %v111_v1 = vld [vmem:[%s2757_s1 + $0x180] sm:$0xff]  ;;  %v158_v3 = vld [vmem:[%s2757_s1 + $0x2f8] sm:$0xff]  ;;  %v173_v4 = vld [vmem:[%s2757_s1 + $0x370] sm:$0xff] }
  0x18   :  { %424 = vmatpush.msra.mxu1 %v84_v42  ;;  %402 = vmatpush.msra.mxu0 %v67_v44  ;;  %v190_v5 = vld [vmem:[%s2757_s1 + $0x3f8] sm:$0xff]  ;;  %v140_v6 = vld [vmem:[%s2757_s1 + $0x268] sm:$0xff]  ;;  %v157_v7 = vld [vmem:[%s2757_s1 + $0x2f0] sm:$0xff] }
  0x19   :  { %470 = vmatpush.msra.mxu3 %v116_v43  ;;  %448 = vmatpush.msra.mxu2 %v99_v45  ;;  %v172_v8 = vld [vmem:[%s2757_s1 + $0x368] sm:$0xff]  ;;  %v189_v9 = vld [vmem:[%s2757_s1 + $0x3f0] sm:$0xff]  ;;  %v139_v10 = vld [vmem:[%s2757_s1 + $0x260] sm:$0xff] }
  0x1a   :  { %425 = vmatpush.msra.mxu1 %v83_v46  ;;  %403 = vmatpush.msra.mxu0 %v66_v48  ;;  %v156_v11 = vld [vmem:[%s2757_s1 + $0x2e8] sm:$0xff]  ;;  %v171_v12 = vld [vmem:[%s2757_s1 + $0x360] sm:$0xff]  ;;  %v138_v14 = vld [vmem:[%s2757_s1 + $0x258] sm:$0xff] }
  0x1b   :  { %471 = vmatpush.msra.mxu3 %v115_v47  ;;  %449 = vmatpush.msra.mxu2 %v98_v49  ;;  %v188_v13 = vld [vmem:[%s2757_s1 + $0x3e8] sm:$0xff]  ;;  %v155_v15 = vld [vmem:[%s2757_s1 + $0x2e0] sm:$0xff]  ;;  %v170_v16 = vld [vmem:[%s2757_s1 + $0x358] sm:$0xff] }
  0x1c   :  { %426 = vmatpush.msra.mxu1 %v82_v50  ;;  %404 = vmatpush.msra.mxu0 %v65_v52  ;;  %v187_v17 = vld [vmem:[%s2757_s1 + $0x3e0] sm:$0xff]  ;;  %v137_v18 = vld [vmem:[%s2757_s1 + $0x250] sm:$0xff]  ;;  %v154_v19 = vld [vmem:[%s2757_s1 + $0x2d8] sm:$0xff] }
  0x1d   :  { %472 = vmatpush.msra.mxu3 %v114_v51  ;;  %450 = vmatpush.msra.mxu2 %v97_v53  ;;  %v169_v20 = vld [vmem:[%s2757_s1 + $0x350] sm:$0xff]  ;;  %v186_v21 = vld [vmem:[%s2757_s1 + $0x3d8] sm:$0xff]  ;;  %v136_v22 = vld [vmem:[%s2757_s1 + $0x248] sm:$0xff] }
  0x1e   :  { %427 = vmatpush.msra.mxu1 %v81_v54  ;;  %405 = vmatpush.msra.mxu0 %v64_v56  ;;  %v153_v23 = vld [vmem:[%s2757_s1 + $0x2d0] sm:$0xff]  ;;  %v168_v24 = vld [vmem:[%s2757_s1 + $0x348] sm:$0xff]  ;;  %v135_v26 = vld [vmem:[%s2757_s1 + $0x240] sm:$0xff] }
  0x1f   :  { %473 = vmatpush.msra.mxu3 %v113_v55  ;;  %451 = vmatpush.msra.mxu2 %v96_v57  ;;  %v185_v25 = vld [vmem:[%s2757_s1 + $0x3d0] sm:$0xff]  ;;  %v152_v27 = vld [vmem:[%s2757_s1 + $0x2c8] sm:$0xff]  ;;  %v167_v28 = vld [vmem:[%s2757_s1 + $0x340] sm:$0xff] }
  0x20   :  { %428 = vmatpush.msra.mxu1 %v80_v58  ;;  %406 = vmatpush.msra.mxu0 %v63_v60  ;;  %v184_v29 = vld [vmem:[%s2757_s1 + $0x3c8] sm:$0xff]  ;;  %v134_v30 = vld [vmem:[%s2757_s1 + $0x238] sm:$0xff]  ;;  %v151_v31 = vld [vmem:[%s2757_s1 + $0x2c0] sm:$0xff] }
  0x21   :  { %474 = vmatpush.msra.mxu3 %v112_v59  ;;  %452 = vmatpush.msra.mxu2 %v95_v61  ;;  %v166_v32 = vld [vmem:[%s2757_s1 + $0x338] sm:$0xff]  ;;  %v183_v33 = vld [vmem:[%s2757_s1 + $0x3c0] sm:$0xff]  ;;  %v133_v34 = vld [vmem:[%s2757_s1 + $0x230] sm:$0xff] }
  0x22   :  { %483 = vmatpush.msrb.mxu0 %v142_v62  ;;  %429 = vmatpush.msra.mxu1 %v79_v0  ;;  %v150_v35 = vld [vmem:[%s2757_s1 + $0x2b8] sm:$0xff]  ;;  %v165_v36 = vld [vmem:[%s2757_s1 + $0x330] sm:$0xff]  ;;  %v132_v38 = vld [vmem:[%s2757_s1 + $0x228] sm:$0xff] }
  0x23   :  { %529 = vmatpush.msrb.mxu2 %v174_v63  ;;  %475 = vmatpush.msra.mxu3 %v111_v1  ;;  %v182_v37 = vld [vmem:[%s2757_s1 + $0x3b8] sm:$0xff]  ;;  %v149_v39 = vld [vmem:[%s2757_s1 + $0x2b0] sm:$0xff]  ;;  %v164_v40 = vld [vmem:[%s2757_s1 + $0x328] sm:$0xff] }
  0x24   :  { %484 = vmatpush.msrb.mxu0 %v141_v2  ;;  %506 = vmatpush.msrb.mxu1 %v158_v3  ;;  %v181_v41 = vld [vmem:[%s2757_s1 + $0x3b0] sm:$0xff]  ;;  %v131_v42 = vld [vmem:[%s2757_s1 + $0x220] sm:$0xff]  ;;  %v148_v43 = vld [vmem:[%s2757_s1 + $0x2a8] sm:$0xff] }
  0x25   :  { %530 = vmatpush.msrb.mxu2 %v173_v4  ;;  %552 = vmatpush.msrb.mxu3 %v190_v5  ;;  %v163_v44 = vld [vmem:[%s2757_s1 + $0x320] sm:$0xff]  ;;  %v180_v45 = vld [vmem:[%s2757_s1 + $0x3a8] sm:$0xff]  ;;  %v25_v46 = vld [vmem:[%s2758_s0 + $0x10] sm:$0xff] }
  0x26   :  { %485 = vmatpush.msrb.mxu0 %v140_v6  ;;  %507 = vmatpush.msrb.mxu1 %v157_v7  ;;  %v130_v47 = vld [vmem:[%s2757_s1 + $0x218] sm:$0xff]  ;;  %v147_v48 = vld [vmem:[%s2757_s1 + $0x2a0] sm:$0xff]  ;;  %v129_v53 = vld [vmem:[%s2757_s1 + $0x210] sm:$0xff] }
  0x27   :  { %531 = vmatpush.msrb.mxu2 %v172_v8  ;;  %553 = vmatpush.msrb.mxu3 %v189_v9  ;;  %v162_v49 = vld [vmem:[%s2757_s1 + $0x318] sm:$0xff]  ;;  %v179_v50 = vld [vmem:[%s2757_s1 + $0x3a0] sm:$0xff]  ;;  %v161_v55 = vld [vmem:[%s2757_s1 + $0x310] sm:$0xff] }
  0x28   :  { %486 = vmatpush.msrb.mxu0 %v139_v10  ;;  %508 = vmatpush.msrb.mxu1 %v156_v11  ;;  %v23_v51 = vld [vmem:[%s2758_s0] sm:$0xff]  ;;  %v26_v52 = vld [vmem:[%s2758_s0 + $0x18] sm:$0xff]  ;;  %v24_v57 = vld [vmem:[%s2758_s0 + $0x8] sm:$0xff] }
  0x29   :  { %532 = vmatpush.msrb.mxu2 %v171_v12  ;;  %554 = vmatpush.msrb.mxu3 %v188_v13  ;;  %v146_v54 = vld [vmem:[%s2757_s1 + $0x298] sm:$0xff]  ;;  %v128_v58 = vld [vmem:[%s2757_s1 + $0x208] sm:$0xff]  ;;  %v145_v59 = vld [vmem:[%s2757_s1 + $0x290] sm:$0xff] }
  0x2a   :  { %487 = vmatpush.msrb.mxu0 %v138_v14  ;;  %509 = vmatpush.msrb.mxu1 %v155_v15  ;;  %v178_v56 = vld [vmem:[%s2757_s1 + $0x398] sm:$0xff]  ;;  %v160_v60 = vld [vmem:[%s2757_s1 + $0x308] sm:$0xff]  ;;  %v177_v61 = vld [vmem:[%s2757_s1 + $0x390] sm:$0xff] }
  0x2b   :  { %533 = vmatpush.msrb.mxu2 %v170_v16  ;;  %555 = vmatpush.msrb.mxu3 %v187_v17  ;;  %v127_v62 = vld [vmem:[%s2757_s1 + $0x200] sm:$0xff]  ;;  %v144_v63 = vld [vmem:[%s2757_s1 + $0x288] sm:$0xff]  ;;  %v45_v2 = vld [vmem:[%s2758_s0 + $0xb0] sm:$0xff] }
  0x2c   :  { %488 = vmatpush.msrb.mxu0 %v137_v18  ;;  %510 = vmatpush.msrb.mxu1 %v154_v19  ;;  %v159_v0 = vld [vmem:[%s2757_s1 + $0x300] sm:$0xff]  ;;  %v176_v1 = vld [vmem:[%s2757_s1 + $0x388] sm:$0xff]  ;;  %v206_v3 = vld [vmem:[%s2757_s1 + $0x478] sm:$0xff] }
  0x2d   :  { %534 = vmatpush.msrb.mxu2 %v169_v20  ;;  %556 = vmatpush.msrb.mxu3 %v186_v21  ;;  %v238_v4 = vld [vmem:[%s2757_s1 + $0x578] sm:$0xff]  ;;  %v143_v5 = vld [vmem:[%s2757_s1 + $0x280] sm:$0xff]  ;;  %v205_v9 = vld [vmem:[%s2757_s1 + $0x470] sm:$0xff] }
  0x2e   :  { %489 = vmatpush.msrb.mxu0 %v136_v22  ;;  %511 = vmatpush.msrb.mxu1 %v153_v23  ;;  %v175_v6 = vld [vmem:[%s2757_s1 + $0x380] sm:$0xff]  ;;  %v46_v8 = vld [vmem:[%s2758_s0 + $0xb8] sm:$0xff]  ;;  %v237_v11 = vld [vmem:[%s2757_s1 + $0x570] sm:$0xff] }
  0x2f   :  { %535 = vmatpush.msrb.mxu2 %v168_v24  ;;  %557 = vmatpush.msrb.mxu3 %v185_v25  ;;  %v43_v7 = vld [vmem:[%s2758_s0 + $0xa0] sm:$0xff]  ;;  %v222_v10 = vld [vmem:[%s2757_s1 + $0x4f8] sm:$0xff]  ;;  %v44_v13 = vld [vmem:[%s2758_s0 + $0xa8] sm:$0xff] }
  0x30   :  { %490 = vmatpush.msrb.mxu0 %v135_v26  ;;  %512 = vmatpush.msrb.mxu1 %v152_v27  ;;  %v254_v12 = vld [vmem:[%s2757_s1 + $0x5f8] sm:$0xff]  ;;  %v204_v14 = vld [vmem:[%s2757_s1 + $0x468] sm:$0xff]  ;;  %v221_v15 = vld [vmem:[%s2757_s1 + $0x4f0] sm:$0xff] }
  0x31   :  { %536 = vmatpush.msrb.mxu2 %v167_v28  ;;  %558 = vmatpush.msrb.mxu3 %v184_v29  ;;  %v236_v16 = vld [vmem:[%s2757_s1 + $0x568] sm:$0xff]  ;;  %v253_v17 = vld [vmem:[%s2757_s1 + $0x5f0] sm:$0xff]  ;;  %v203_v18 = vld [vmem:[%s2757_s1 + $0x460] sm:$0xff] }
  0x32   :  { %491 = vmatpush.msrb.mxu0 %v134_v30  ;;  %513 = vmatpush.msrb.mxu1 %v151_v31  ;;  %v220_v19 = vld [vmem:[%s2757_s1 + $0x4e8] sm:$0xff]  ;;  %v235_v20 = vld [vmem:[%s2757_s1 + $0x560] sm:$0xff]  ;;  %v29_v22 = vld [vmem:[%s2758_s0 + $0x30] sm:$0xff] }
  0x33   :  { %537 = vmatpush.msrb.mxu2 %v166_v32  ;;  %559 = vmatpush.msrb.mxu3 %v183_v33  ;;  %v252_v21 = vld [vmem:[%s2757_s1 + $0x5e8] sm:$0xff]  ;;  %v202_v23 = vld [vmem:[%s2757_s1 + $0x458] sm:$0xff]  ;;  %v219_v24 = vld [vmem:[%s2757_s1 + $0x4e0] sm:$0xff] }
  0x34   :  { %492 = vmatpush.msrb.mxu0 %v133_v34  ;;  %514 = vmatpush.msrb.mxu1 %v150_v35  ;;  %v234_v25 = vld [vmem:[%s2757_s1 + $0x558] sm:$0xff]  ;;  %v251_v26 = vld [vmem:[%s2757_s1 + $0x5e0] sm:$0xff]  ;;  %v201_v29 = vld [vmem:[%s2757_s1 + $0x450] sm:$0xff] }
  0x35   :  { %538 = vmatpush.msrb.mxu2 %v165_v36  ;;  %560 = vmatpush.msrb.mxu3 %v182_v37  ;;  %v27_v27 = vld [vmem:[%s2758_s0 + $0x20] sm:$0xff]  ;;  %v30_v28 = vld [vmem:[%s2758_s0 + $0x38] sm:$0xff]  ;;  %v233_v31 = vld [vmem:[%s2757_s1 + $0x550] sm:$0xff] }
  0x36   :  { %493 = vmatpush.msrb.mxu0 %v132_v38  ;;  %515 = vmatpush.msrb.mxu1 %v149_v39  ;;  %v218_v30 = vld [vmem:[%s2757_s1 + $0x4d8] sm:$0xff]  ;;  %v28_v33 = vld [vmem:[%s2758_s0 + $0x28] sm:$0xff]  ;;  %v217_v35 = vld [vmem:[%s2757_s1 + $0x4d0] sm:$0xff] }
  0x37   :  { %539 = vmatpush.msrb.mxu2 %v164_v40  ;;  %561 = vmatpush.msrb.mxu3 %v181_v41  ;;  %v250_v32 = vld [vmem:[%s2757_s1 + $0x5d8] sm:$0xff]  ;;  %v200_v34 = vld [vmem:[%s2757_s1 + $0x448] sm:$0xff]  ;;  %v249_v37 = vld [vmem:[%s2757_s1 + $0x5d0] sm:$0xff] }
  0x38   :  { %494 = vmatpush.msrb.mxu0 %v131_v42  ;;  %516 = vmatpush.msrb.mxu1 %v148_v43  ;;  %v232_v36 = vld [vmem:[%s2757_s1 + $0x548] sm:$0xff]  ;;  %v199_v38 = vld [vmem:[%s2757_s1 + $0x440] sm:$0xff]  ;;  %v198_v42 = vld [vmem:[%s2757_s1 + $0x438] sm:$0xff] }
  0x39   :  { %540 = vmatpush.msrb.mxu2 %v163_v44  ;;  %562 = vmatpush.msrb.mxu3 %v180_v45  ;;  %v216_v39 = vld [vmem:[%s2757_s1 + $0x4c8] sm:$0xff]  ;;  %v231_v40 = vld [vmem:[%s2757_s1 + $0x540] sm:$0xff]  ;;  %v230_v44 = vld [vmem:[%s2757_s1 + $0x538] sm:$0xff] }
  0x3a   :  { %453 = vmatmul.f32.vlgmr.msra.gmra.mxu2 %v25_v46  ;;  %495 = vmatpush.msrb.mxu0 %v130_v47  ;;  %v248_v41 = vld [vmem:[%s2757_s1 + $0x5c8] sm:$0xff]  ;;  %v215_v43 = vld [vmem:[%s2757_s1 + $0x4c0] sm:$0xff]  ;;  %v197_v46 = vld [vmem:[%s2757_s1 + $0x430] sm:$0xff] }
  0x3b   :  { %517 = vmatpush.msrb.mxu1 %v147_v48  ;;  %541 = vmatpush.msrb.mxu2 %v162_v49  ;;  %v247_v45 = vld [vmem:[%s2757_s1 + $0x5c0] sm:$0xff]  ;;  %v214_v47 = vld [vmem:[%s2757_s1 + $0x4b8] sm:$0xff]  ;;  %v229_v48 = vld [vmem:[%s2757_s1 + $0x530] sm:$0xff] }
  0x3c   :  { %563 = vmatpush.msrb.mxu3 %v179_v50  ;;  %407 = vmatmul.f32.vlgmr.msra.gmra.mxu0 %v23_v51  ;;  %v246_v49 = vld [vmem:[%s2757_s1 + $0x5b8] sm:$0xff]  ;;  %v196_v50 = vld [vmem:[%s2757_s1 + $0x428] sm:$0xff]  ;;  %v213_v51 = vld [vmem:[%s2757_s1 + $0x4b0] sm:$0xff] }
  0x3d   :  { %476 = vmatmul.f32.vlgmr.msra.gmra.mxu3 %v26_v52  ;;  %496 = vmatpush.msrb.mxu0 %v129_v53  ;;  %v228_v52 = vld [vmem:[%s2757_s1 + $0x528] sm:$0xff]  ;;  %v245_v53 = vld [vmem:[%s2757_s1 + $0x5b0] sm:$0xff] }
  0x3e   :  { %518 = vmatpush.msrb.mxu1 %v146_v54  ;;  %542 = vmatpush.msrb.mxu2 %v161_v55  ;;  %v195_v54 = vld [vmem:[%s2757_s1 + $0x420] sm:$0xff]  ;;  %v212_v55 = vld [vmem:[%s2757_s1 + $0x4a8] sm:$0xff] }
  0x3f   :  { %564 = vmatpush.msrb.mxu3 %v178_v56  ;;  %430 = vmatmul.f32.vlgmr.msra.gmra.mxu1 %v24_v57  ;;  %v227_v56 = vld [vmem:[%s2757_s1 + $0x520] sm:$0xff]  ;;  %v244_v57 = vld [vmem:[%s2757_s1 + $0x5a8] sm:$0xff] }
  0x40   :  { %497 = vmatpush.msrb.mxu0 %v128_v58  ;;  %519 = vmatpush.msrb.mxu1 %v145_v59  ;;  %v47_v58 = vld [vmem:[%s2758_s0 + $0xc0] sm:$0xff]  ;;  %v49_v59 = vld [vmem:[%s2758_s0 + $0xd0] sm:$0xff] }
  0x41   :  { %543 = vmatpush.msrb.mxu2 %v160_v60  ;;  %565 = vmatpush.msrb.mxu3 %v177_v61  ;;  %v194_v60 = vld [vmem:[%s2757_s1 + $0x418] sm:$0xff]  ;;  %v211_v61 = vld [vmem:[%s2757_s1 + $0x4a0] sm:$0xff] }
  0x42   :  { %498 = vmatpush.msrb.mxu0 %v127_v62  ;;  %520 = vmatpush.msrb.mxu1 %v144_v63  ;;  %v226_v62 = vld [vmem:[%s2757_s1 + $0x518] sm:$0xff]  ;;  %v243_v63 = vld [vmem:[%s2757_s1 + $0x5a0] sm:$0xff] }
  0x43   :  { %544 = vmatpush.msrb.mxu2 %v159_v0  ;;  %566 = vmatpush.msrb.mxu3 %v176_v1  ;;  %v48_v0 = vld [vmem:[%s2758_s0 + $0xc8] sm:$0xff]  ;;  %v50_v1 = vld [vmem:[%s2758_s0 + $0xd8] sm:$0xff] }
  0x44   :  { %456 = vmatmul.f32.gmra.mxu2 %v45_v2  ;;  %575 = vmatpush.msra.mxu0 %v206_v3  ;;  %v193_v2 = vld [vmem:[%s2757_s1 + $0x410] sm:$0xff]  ;;  %v210_v3 = vld [vmem:[%s2757_s1 + $0x498] sm:$0xff] }
  0x45   :  { %621 = vmatpush.msra.mxu2 %v238_v4  ;;  %521 = vmatpush.msrb.mxu1 %v143_v5  ;;  %v225_v4 = vld [vmem:[%s2757_s1 + $0x510] sm:$0xff]  ;;  %v242_v5 = vld [vmem:[%s2757_s1 + $0x598] sm:$0xff] }
  0x46   :  { %567 = vmatpush.msrb.mxu3 %v175_v6  ;;  %410 = vmatmul.f32.gmra.mxu0 %v43_v7  ;;  %v192_v6 = vld [vmem:[%s2757_s1 + $0x408] sm:$0xff]  ;;  %v209_v7 = vld [vmem:[%s2757_s1 + $0x490] sm:$0xff] }
  0x47   :  { %479 = vmatmul.f32.gmra.mxu3 %v46_v8  ;;  %576 = vmatpush.msra.mxu0 %v205_v9  ;;  %v224_v8 = vld [vmem:[%s2757_s1 + $0x508] sm:$0xff]  ;;  %v241_v9 = vld [vmem:[%s2757_s1 + $0x590] sm:$0xff] }
  0x48   :  { %598 = vmatpush.msra.mxu1 %v222_v10  ;;  %622 = vmatpush.msra.mxu2 %v237_v11  ;;  %v191_v10 = vld [vmem:[%s2757_s1 + $0x400] sm:$0xff]  ;;  %v208_v11 = vld [vmem:[%s2757_s1 + $0x488] sm:$0xff] }
  0x49   :  { %644 = vmatpush.msra.mxu3 %v254_v12  ;;  %433 = vmatmul.f32.gmra.mxu1 %v44_v13  ;;  %v223_v12 = vld [vmem:[%s2757_s1 + $0x500] sm:$0xff]  ;;  %v240_v13 = vld [vmem:[%s2757_s1 + $0x588] sm:$0xff] }
  0x4a   :  { %577 = vmatpush.msra.mxu0 %v204_v14  ;;  %599 = vmatpush.msra.mxu1 %v221_v15  ;;  %v31_v14 = vld [vmem:[%s2758_s0 + $0x40] sm:$0xff]  ;;  %v33_v15 = vld [vmem:[%s2758_s0 + $0x50] sm:$0xff] }
  0x4b   :  { %623 = vmatpush.msra.mxu2 %v236_v16  ;;  %645 = vmatpush.msra.mxu3 %v253_v17  ;;  %v270_v16 = vld [vmem:[%s2757_s1 + $0x678] sm:$0xff] }
  0x4c   :  { %578 = vmatpush.msra.mxu0 %v203_v18  ;;  %600 = vmatpush.msra.mxu1 %v220_v19  ;;  %v302_v17 = vld [vmem:[%s2757_s1 + $0x778] sm:$0xff]  ;;  %v207_v18 = vld [vmem:[%s2757_s1 + $0x480] sm:$0xff] }
  0x4d   :  { %624 = vmatpush.msra.mxu2 %v235_v20  ;;  %646 = vmatpush.msra.mxu3 %v252_v21  ;;  %v239_v19 = vld [vmem:[%s2757_s1 + $0x580] sm:$0xff]  ;;  %v32_v20 = vld [vmem:[%s2758_s0 + $0x48] sm:$0xff]  ;;  %v34_v21 = vld [vmem:[%s2758_s0 + $0x58] sm:$0xff] }
  0x4e   :  { %545 = vmatmul.f32.vlgmr.msrb.gmra.mxu2 %v29_v22  ;;  %579 = vmatpush.msra.mxu0 %v202_v23  ;;  %v269_v22 = vld [vmem:[%s2757_s1 + $0x670] sm:$0xff]  ;;  %v286_v23 = vld [vmem:[%s2757_s1 + $0x6f8] sm:$0xff] }
  0x4f   :  { %601 = vmatpush.msra.mxu1 %v219_v24  ;;  %625 = vmatpush.msra.mxu2 %v234_v25  ;;  %v301_v24 = vld [vmem:[%s2757_s1 + $0x770] sm:$0xff]  ;;  %v318_v25 = vld [vmem:[%s2757_s1 + $0x7f8] sm:$0xff] }
  0x50   :  { %647 = vmatpush.msra.mxu3 %v251_v26  ;;  %499 = vmatmul.f32.vlgmr.msrb.gmra.mxu0 %v27_v27  ;;  %v268_v26 = vld [vmem:[%s2757_s1 + $0x668] sm:$0xff]  ;;  %v285_v27 = vld [vmem:[%s2757_s1 + $0x6f0] sm:$0xff] }
  0x51   :  { %568 = vmatmul.f32.vlgmr.msrb.gmra.mxu3 %v30_v28  ;;  %580 = vmatpush.msra.mxu0 %v201_v29  ;;  %v300_v28 = vld [vmem:[%s2757_s1 + $0x768] sm:$0xff]  ;;  %v317_v29 = vld [vmem:[%s2757_s1 + $0x7f0] sm:$0xff] }
  0x52   :  { %602 = vmatpush.msra.mxu1 %v218_v30  ;;  %626 = vmatpush.msra.mxu2 %v233_v31  ;;  %v267_v30 = vld [vmem:[%s2757_s1 + $0x660] sm:$0xff]  ;;  %v284_v31 = vld [vmem:[%s2757_s1 + $0x6e8] sm:$0xff] }
  0x53   :  { %648 = vmatpush.msra.mxu3 %v250_v32  ;;  %522 = vmatmul.f32.vlgmr.msrb.gmra.mxu1 %v28_v33  ;;  %v299_v32 = vld [vmem:[%s2757_s1 + $0x760] sm:$0xff]  ;;  %v316_v33 = vld [vmem:[%s2757_s1 + $0x7e8] sm:$0xff] }
  0x54   :  { %581 = vmatpush.msra.mxu0 %v200_v34  ;;  %603 = vmatpush.msra.mxu1 %v217_v35  ;;  %v53_v34 = vld [vmem:[%s2758_s0 + $0xf0] sm:$0xff]  ;;  %v266_v35 = vld [vmem:[%s2757_s1 + $0x658] sm:$0xff] }
  0x55   :  { %627 = vmatpush.msra.mxu2 %v232_v36  ;;  %649 = vmatpush.msra.mxu3 %v249_v37  ;;  %v283_v36 = vld [vmem:[%s2757_s1 + $0x6e0] sm:$0xff]  ;;  %v298_v37 = vld [vmem:[%s2757_s1 + $0x758] sm:$0xff] }
  0x56   :  { %582 = vmatpush.msra.mxu0 %v199_v38  ;;  %604 = vmatpush.msra.mxu1 %v216_v39  ;;  %v315_v38 = vld [vmem:[%s2757_s1 + $0x7e0] sm:$0xff] }
  0x57   :  { %628 = vmatpush.msra.mxu2 %v231_v40  ;;  %650 = vmatpush.msra.mxu3 %v248_v41  ;;  %v51_v39 = vld [vmem:[%s2758_s0 + $0xe0] sm:$0xff]  ;;  %v54_v40 = vld [vmem:[%s2758_s0 + $0xf8] sm:$0xff]  ;;  %v265_v41 = vld [vmem:[%s2757_s1 + $0x650] sm:$0xff] }
  0x58   :  { %583 = vmatpush.msra.mxu0 %v198_v42  ;;  %605 = vmatpush.msra.mxu1 %v215_v43  ;;  %v282_v42 = vld [vmem:[%s2757_s1 + $0x6d8] sm:$0xff]  ;;  %v297_v43 = vld [vmem:[%s2757_s1 + $0x750] sm:$0xff] }
  0x59   :  { %629 = vmatpush.msra.mxu2 %v230_v44  ;;  %651 = vmatpush.msra.mxu3 %v247_v45  ;;  %v314_v44 = vld [vmem:[%s2757_s1 + $0x7d8] sm:$0xff]  ;;  %v52_v45 = vld [vmem:[%s2758_s0 + $0xe8] sm:$0xff] }
  0x5a   :  { %584 = vmatpush.msra.mxu0 %v197_v46  ;;  %606 = vmatpush.msra.mxu1 %v214_v47  ;;  %v264_v46 = vld [vmem:[%s2757_s1 + $0x648] sm:$0xff]  ;;  %v281_v47 = vld [vmem:[%s2757_s1 + $0x6d0] sm:$0xff] }
  0x5b   :  { %630 = vmatpush.msra.mxu2 %v229_v48  ;;  %652 = vmatpush.msra.mxu3 %v246_v49  ;;  %v296_v48 = vld [vmem:[%s2757_s1 + $0x748] sm:$0xff]  ;;  %v313_v49 = vld [vmem:[%s2757_s1 + $0x7d0] sm:$0xff] }
  0x5c   :  { %585 = vmatpush.msra.mxu0 %v196_v50  ;;  %607 = vmatpush.msra.mxu1 %v213_v51  ;;  %v263_v50 = vld [vmem:[%s2757_s1 + $0x640] sm:$0xff]  ;;  %v280_v51 = vld [vmem:[%s2757_s1 + $0x6c8] sm:$0xff] }
  0x5d   :  { %631 = vmatpush.msra.mxu2 %v228_v52  ;;  %653 = vmatpush.msra.mxu3 %v245_v53  ;;  %v295_v52 = vld [vmem:[%s2757_s1 + $0x740] sm:$0xff]  ;;  %v312_v53 = vld [vmem:[%s2757_s1 + $0x7c8] sm:$0xff] }
  0x5e   :  { %586 = vmatpush.msra.mxu0 %v195_v54  ;;  %608 = vmatpush.msra.mxu1 %v212_v55  ;;  %v262_v54 = vld [vmem:[%s2757_s1 + $0x638] sm:$0xff]  ;;  %v279_v55 = vld [vmem:[%s2757_s1 + $0x6c0] sm:$0xff] }
  0x5f   :  { %632 = vmatpush.msra.mxu2 %v227_v56  ;;  %654 = vmatpush.msra.mxu3 %v244_v57  ;;  %v294_v56 = vld [vmem:[%s2757_s1 + $0x738] sm:$0xff]  ;;  %v311_v57 = vld [vmem:[%s2757_s1 + $0x7c0] sm:$0xff] }
  0x60   :  { %502 = vmatmul.f32.gmra.mxu0 %v47_v58  ;;  %548 = vmatmul.f32.gmra.mxu2 %v49_v59  ;;  %v261_v58 = vld [vmem:[%s2757_s1 + $0x630] sm:$0xff]  ;;  %v278_v59 = vld [vmem:[%s2757_s1 + $0x6b8] sm:$0xff] }
  0x61   :  { %587 = vmatpush.msra.mxu0 %v194_v60  ;;  %609 = vmatpush.msra.mxu1 %v211_v61  ;;  %v293_v60 = vld [vmem:[%s2757_s1 + $0x730] sm:$0xff]  ;;  %v310_v61 = vld [vmem:[%s2757_s1 + $0x7b8] sm:$0xff] }
  0x62   :  { %633 = vmatpush.msra.mxu2 %v226_v62  ;;  %655 = vmatpush.msra.mxu3 %v243_v63  ;;  %v260_v62 = vld [vmem:[%s2757_s1 + $0x628] sm:$0xff]  ;;  %v277_v63 = vld [vmem:[%s2757_s1 + $0x6b0] sm:$0xff] }
  0x63   :  { %525 = vmatmul.f32.gmra.mxu1 %v48_v0  ;;  %571 = vmatmul.f32.gmra.mxu3 %v50_v1  ;;  %v292_v0 = vld [vmem:[%s2757_s1 + $0x728] sm:$0xff]  ;;  %v309_v1 = vld [vmem:[%s2757_s1 + $0x7b0] sm:$0xff] }
  0x64   :  { %588 = vmatpush.msra.mxu0 %v193_v2  ;;  %610 = vmatpush.msra.mxu1 %v210_v3  ;;  %v259_v2 = vld [vmem:[%s2757_s1 + $0x620] sm:$0xff]  ;;  %v276_v3 = vld [vmem:[%s2757_s1 + $0x6a8] sm:$0xff] }
  0x65   :  { %634 = vmatpush.msra.mxu2 %v225_v4  ;;  %656 = vmatpush.msra.mxu3 %v242_v5  ;;  %v291_v4 = vld [vmem:[%s2757_s1 + $0x720] sm:$0xff]  ;;  %v308_v5 = vld [vmem:[%s2757_s1 + $0x7a8] sm:$0xff] }
  0x66   :  { %589 = vmatpush.msra.mxu0 %v192_v6  ;;  %611 = vmatpush.msra.mxu1 %v209_v7  ;;  %v258_v6 = vld [vmem:[%s2757_s1 + $0x618] sm:$0xff]  ;;  %v275_v7 = vld [vmem:[%s2757_s1 + $0x6a0] sm:$0xff] }
  0x67   :  { %635 = vmatpush.msra.mxu2 %v224_v8  ;;  %657 = vmatpush.msra.mxu3 %v241_v9  ;;  %v290_v8 = vld [vmem:[%s2757_s1 + $0x718] sm:$0xff]  ;;  %v307_v9 = vld [vmem:[%s2757_s1 + $0x7a0] sm:$0xff] }
  0x68   :  { %590 = vmatpush.msra.mxu0 %v191_v10  ;;  %612 = vmatpush.msra.mxu1 %v208_v11  ;;  %v257_v10 = vld [vmem:[%s2757_s1 + $0x610] sm:$0xff]  ;;  %v274_v11 = vld [vmem:[%s2757_s1 + $0x698] sm:$0xff] }
  0x69   :  { %636 = vmatpush.msra.mxu2 %v223_v12  ;;  %658 = vmatpush.msra.mxu3 %v240_v13  ;;  %v289_v12 = vld [vmem:[%s2757_s1 + $0x710] sm:$0xff]  ;;  %v306_v13 = vld [vmem:[%s2757_s1 + $0x798] sm:$0xff] }
  0x6a   :  { %591 = vmatmul.f32.vlgmr.msra.gmra.mxu0 %v31_v14  ;;  %637 = vmatmul.f32.vlgmr.msra.gmra.mxu2 %v33_v15  ;;  %v256_v14 = vld [vmem:[%s2757_s1 + $0x608] sm:$0xff]  ;;  %v273_v15 = vld [vmem:[%s2757_s1 + $0x690] sm:$0xff] }
  0x6b   :  { %667 = vmatpush.msrb.mxu0 %v270_v16  ;;  %713 = vmatpush.msrb.mxu2 %v302_v17  ;;  %v288_v16 = vld [vmem:[%s2757_s1 + $0x708] sm:$0xff]  ;;  %v305_v17 = vld [vmem:[%s2757_s1 + $0x790] sm:$0xff] }
  0x6c   :  { %613 = vmatpush.msra.mxu1 %v207_v18  ;;  %659 = vmatpush.msra.mxu3 %v239_v19  ;;  %v255_v18 = vld [vmem:[%s2757_s1 + $0x600] sm:$0xff]  ;;  %v272_v19 = vld [vmem:[%s2757_s1 + $0x688] sm:$0xff] }
  0x6d   :  { %614 = vmatmul.f32.vlgmr.msra.gmra.mxu1 %v32_v20  ;;  %660 = vmatmul.f32.vlgmr.msra.gmra.mxu3 %v34_v21  ;;  %v287_v20 = vld [vmem:[%s2757_s1 + $0x700] sm:$0xff]  ;;  %v304_v21 = vld [vmem:[%s2757_s1 + $0x788] sm:$0xff] }
  0x6e   :  { %668 = vmatpush.msrb.mxu0 %v269_v22  ;;  %690 = vmatpush.msrb.mxu1 %v286_v23  ;;  %v35_v22 = vld [vmem:[%s2758_s0 + $0x60] sm:$0xff]  ;;  %v37_v23 = vld [vmem:[%s2758_s0 + $0x70] sm:$0xff] }
  0x6f   :  { %714 = vmatpush.msrb.mxu2 %v301_v24  ;;  %736 = vmatpush.msrb.mxu3 %v318_v25  ;;  %v334_v24 = vld [vmem:[%s2757_s1 + $0x878] sm:$0xff] }
  0x70   :  { %669 = vmatpush.msrb.mxu0 %v268_v26  ;;  %691 = vmatpush.msrb.mxu1 %v285_v27  ;;  %v366_v25 = vld [vmem:[%s2757_s1 + $0x978] sm:$0xff]  ;;  %v271_v26 = vld [vmem:[%s2757_s1 + $0x680] sm:$0xff] }
  0x71   :  { %715 = vmatpush.msrb.mxu2 %v300_v28  ;;  %737 = vmatpush.msrb.mxu3 %v317_v29  ;;  %v303_v27 = vld [vmem:[%s2757_s1 + $0x780] sm:$0xff]  ;;  %v36_v28 = vld [vmem:[%s2758_s0 + $0x68] sm:$0xff]  ;;  %v38_v29 = vld [vmem:[%s2758_s0 + $0x78] sm:$0xff] }
  0x72   :  { %670 = vmatpush.msrb.mxu0 %v267_v30  ;;  %692 = vmatpush.msrb.mxu1 %v284_v31  ;;  %v333_v30 = vld [vmem:[%s2757_s1 + $0x870] sm:$0xff]  ;;  %v350_v31 = vld [vmem:[%s2757_s1 + $0x8f8] sm:$0xff] }
  0x73   :  { %716 = vmatpush.msrb.mxu2 %v299_v32  ;;  %738 = vmatpush.msrb.mxu3 %v316_v33  ;;  %v365_v32 = vld [vmem:[%s2757_s1 + $0x970] sm:$0xff]  ;;  %v375_v33 = vld [vmem:[%s2757_s1 + $0x9c0] sm:$0xf] }
  0x74   :  { %640 = vmatmul.f32.gmra.mxu2 %v53_v34  ;;  %671 = vmatpush.msrb.mxu0 %v266_v35  ;;  %v332_v34 = vld [vmem:[%s2757_s1 + $0x868] sm:$0xff]  ;;  %v349_v35 = vld [vmem:[%s2757_s1 + $0x8f0] sm:$0xff] }
  0x75   :  { %693 = vmatpush.msrb.mxu1 %v283_v36  ;;  %717 = vmatpush.msrb.mxu2 %v298_v37  ;;  %v364_v36 = vld [vmem:[%s2757_s1 + $0x968] sm:$0xff]  ;;  %v374_v37 = vld [vmem:[%s2757_s1 + $0x9b8] sm:$0xff] }
  0x76   :  { %739 = vmatpush.msrb.mxu3 %v315_v38  ;;  %594 = vmatmul.f32.gmra.mxu0 %v51_v39  ;;  %v331_v38 = vld [vmem:[%s2757_s1 + $0x860] sm:$0xff]  ;;  %v348_v39 = vld [vmem:[%s2757_s1 + $0x8e8] sm:$0xff] }
  0x77   :  { %663 = vmatmul.f32.gmra.mxu3 %v54_v40  ;;  %672 = vmatpush.msrb.mxu0 %v265_v41  ;;  %v363_v40 = vld [vmem:[%s2757_s1 + $0x960] sm:$0xff] }
  0x78   :  { %694 = vmatpush.msrb.mxu1 %v282_v42  ;;  %718 = vmatpush.msrb.mxu2 %v297_v43  ;;  %v55_v41 = vld [vmem:[%s2758_s0 + $0x100] sm:$0xff]  ;;  %v57_v42 = vld [vmem:[%s2758_s0 + $0x110] sm:$0xff]  ;;  %v330_v43 = vld [vmem:[%s2757_s1 + $0x858] sm:$0xff] }
  0x79   :  { %740 = vmatpush.msrb.mxu3 %v314_v44  ;;  %617 = vmatmul.f32.gmra.mxu1 %v52_v45  ;;  %v347_v44 = vld [vmem:[%s2757_s1 + $0x8e0] sm:$0xff]  ;;  %v362_v45 = vld [vmem:[%s2757_s1 + $0x958] sm:$0xff] }
  0x7a   :  { %673 = vmatpush.msrb.mxu0 %v264_v46  ;;  %695 = vmatpush.msrb.mxu1 %v281_v47  ;;  %v56_v46 = vld [vmem:[%s2758_s0 + $0x108] sm:$0xff]  ;;  %v58_v47 = vld [vmem:[%s2758_s0 + $0x118] sm:$0xff] }
  0x7b   :  { %719 = vmatpush.msrb.mxu2 %v296_v48  ;;  %741 = vmatpush.msrb.mxu3 %v313_v49  ;;  %v329_v48 = vld [vmem:[%s2757_s1 + $0x850] sm:$0xff]  ;;  %v346_v49 = vld [vmem:[%s2757_s1 + $0x8d8] sm:$0xff] }
  0x7c   :  { %674 = vmatpush.msrb.mxu0 %v263_v50  ;;  %696 = vmatpush.msrb.mxu1 %v280_v51  ;;  %v361_v50 = vld [vmem:[%s2757_s1 + $0x950] sm:$0xff] }
  0x7d   :  { %720 = vmatpush.msrb.mxu2 %v295_v52  ;;  %742 = vmatpush.msrb.mxu3 %v312_v53  ;;  %v373_v51 = vld [vmem:[%s2757_s1 + $0x9b0] sm:$0xff]  ;;  %v328_v52 = vld [vmem:[%s2757_s1 + $0x848] sm:$0xff] }
  0x7e   :  { %675 = vmatpush.msrb.mxu0 %v262_v54  ;;  %697 = vmatpush.msrb.mxu1 %v279_v55  ;;  %v345_v53 = vld [vmem:[%s2757_s1 + $0x8d0] sm:$0xff]  ;;  %v360_v54 = vld [vmem:[%s2757_s1 + $0x948] sm:$0xff] }
  0x7f   :  { %721 = vmatpush.msrb.mxu2 %v294_v56  ;;  %743 = vmatpush.msrb.mxu3 %v311_v57  ;;  %v372_v55 = vld [vmem:[%s2757_s1 + $0x9a8] sm:$0xff]  ;;  %v327_v56 = vld [vmem:[%s2757_s1 + $0x840] sm:$0xff] }
  0x80   :  { %676 = vmatpush.msrb.mxu0 %v261_v58  ;;  %698 = vmatpush.msrb.mxu1 %v278_v59  ;;  %v344_v57 = vld [vmem:[%s2757_s1 + $0x8c8] sm:$0xff]  ;;  %v359_v58 = vld [vmem:[%s2757_s1 + $0x940] sm:$0xff] }
  0x81   :  { %722 = vmatpush.msrb.mxu2 %v293_v60  ;;  %744 = vmatpush.msrb.mxu3 %v310_v61  ;;  %v371_v59 = vld [vmem:[%s2757_s1 + $0x9a0] sm:$0xff]  ;;  %v326_v60 = vld [vmem:[%s2757_s1 + $0x838] sm:$0xff] }
  0x82   :  { %677 = vmatpush.msrb.mxu0 %v260_v62  ;;  %699 = vmatpush.msrb.mxu1 %v277_v63  ;;  %v343_v61 = vld [vmem:[%s2757_s1 + $0x8c0] sm:$0xff]  ;;  %v358_v62 = vld [vmem:[%s2757_s1 + $0x938] sm:$0xff] }
  0x83   :  { %723 = vmatpush.msrb.mxu2 %v292_v0  ;;  %745 = vmatpush.msrb.mxu3 %v309_v1  ;;  %v370_v63 = vld [vmem:[%s2757_s1 + $0x998] sm:$0xff]  ;;  %v325_v0 = vld [vmem:[%s2757_s1 + $0x830] sm:$0xff] }
  0x84   :  { %678 = vmatpush.msrb.mxu0 %v259_v2  ;;  %700 = vmatpush.msrb.mxu1 %v276_v3  ;;  %v342_v1 = vld [vmem:[%s2757_s1 + $0x8b8] sm:$0xff]  ;;  %v357_v2 = vld [vmem:[%s2757_s1 + $0x930] sm:$0xff] }
  0x85   :  { %724 = vmatpush.msrb.mxu2 %v291_v4  ;;  %746 = vmatpush.msrb.mxu3 %v308_v5  ;;  %v369_v3 = vld [vmem:[%s2757_s1 + $0x990] sm:$0xff]  ;;  %v324_v4 = vld [vmem:[%s2757_s1 + $0x828] sm:$0xff] }
  0x86   :  { %679 = vmatpush.msrb.mxu0 %v258_v6  ;;  %701 = vmatpush.msrb.mxu1 %v275_v7  ;;  %v341_v5 = vld [vmem:[%s2757_s1 + $0x8b0] sm:$0xff]  ;;  %v356_v6 = vld [vmem:[%s2757_s1 + $0x928] sm:$0xff] }
  0x87   :  { %725 = vmatpush.msrb.mxu2 %v290_v8  ;;  %747 = vmatpush.msrb.mxu3 %v307_v9  ;;  %v368_v7 = vld [vmem:[%s2757_s1 + $0x988] sm:$0xff]  ;;  %v323_v8 = vld [vmem:[%s2757_s1 + $0x820] sm:$0xff] }
  0x88   :  { %680 = vmatpush.msrb.mxu0 %v257_v10  ;;  %702 = vmatpush.msrb.mxu1 %v274_v11  ;;  %v340_v9 = vld [vmem:[%s2757_s1 + $0x8a8] sm:$0xff]  ;;  %v355_v10 = vld [vmem:[%s2757_s1 + $0x920] sm:$0xff] }
  0x89   :  { %726 = vmatpush.msrb.mxu2 %v289_v12  ;;  %748 = vmatpush.msrb.mxu3 %v306_v13  ;;  %v367_v11 = vld [vmem:[%s2757_s1 + $0x980] sm:$0xff]  ;;  %v322_v12 = vld [vmem:[%s2757_s1 + $0x818] sm:$0xff] }
  0x8a   :  { %681 = vmatpush.msrb.mxu0 %v256_v14  ;;  %703 = vmatpush.msrb.mxu1 %v273_v15  ;;  %v339_v13 = vld [vmem:[%s2757_s1 + $0x8a0] sm:$0xff]  ;;  %v354_v14 = vld [vmem:[%s2757_s1 + $0x918] sm:$0xff] }
  0x8b   :  { %727 = vmatpush.msrb.mxu2 %v288_v16  ;;  %749 = vmatpush.msrb.mxu3 %v305_v17  ;;  %v42_v15 = vld [vmem:[%s2758_s0 + $0x98] sm:$0xff]  ;;  %v321_v16 = vld [vmem:[%s2757_s1 + $0x810] sm:$0xff] }
  0x8c   :  { %682 = vmatpush.msrb.mxu0 %v255_v18  ;;  %704 = vmatpush.msrb.mxu1 %v272_v19  ;;  %v338_v17 = vld [vmem:[%s2757_s1 + $0x898] sm:$0xff]  ;;  %v353_v18 = vld [vmem:[%s2757_s1 + $0x910] sm:$0xff]  ;;  %v320_v19 = vld [vmem:[%s2757_s1 + $0x808] sm:$0xff] }
  0x8d   :  { %728 = vmatpush.msrb.mxu2 %v287_v20  ;;  %750 = vmatpush.msrb.mxu3 %v304_v21  ;;  %v337_v20 = vld [vmem:[%s2757_s1 + $0x890] sm:$0xff]  ;;  %v352_v21 = vld [vmem:[%s2757_s1 + $0x908] sm:$0xff] }
  0x8e   :  { %683 = vmatmul.f32.vlgmr.msrb.gmra.mxu0 %v35_v22  ;;  %729 = vmatmul.f32.vlgmr.msrb.gmra.mxu2 %v37_v23  ;;  %v319_v22 = vld [vmem:[%s2757_s1 + $0x800] sm:$0xff]  ;;  %v336_v23 = vld [vmem:[%s2757_s1 + $0x888] sm:$0xff] }
  0x8f   :  { %759 = vmatpush.msra.mxu0 %v334_v24  ;;  %805 = vmatpush.msra.mxu2 %v366_v25  ;;  %v351_v24 = vld [vmem:[%s2757_s1 + $0x900] sm:$0xff] }
  0x90   :  { %705 = vmatpush.msrb.mxu1 %v271_v26  ;;  %751 = vmatpush.msrb.mxu3 %v303_v27  ;;  %v39_v25 = vld [vmem:[%s2758_s0 + $0x80] sm:$0xff]  ;;  %v41_v26 = vld [vmem:[%s2758_s0 + $0x90] sm:$0xff] }
  0x91   :  { %706 = vmatmul.f32.vlgmr.msrb.gmra.mxu1 %v36_v28  ;;  %752 = vmatmul.f32.vlgmr.msrb.gmra.mxu3 %v38_v29  ;;  %v335_v27 = vld [vmem:[%s2757_s1 + $0x880] sm:$0xff]  ;;  %v40_v28 = vld [vmem:[%s2758_s0 + $0x88] sm:$0xff]  ;;  %v62_v29 = vld [vmem:[%s2758_s0 + $0x138] sm:$0xff] }
  0x92   :  { %760 = vmatpush.msra.mxu0 %v333_v30  ;;  %782 = vmatpush.msra.mxu1 %v350_v31  ;;  %v59_v30 = vld [vmem:[%s2758_s0 + $0x120] sm:$0xff]  ;;  %v61_v31 = vld [vmem:[%s2758_s0 + $0x130] sm:$0xff] }
  0x93   :  { %806 = vmatpush.msra.mxu2 %v365_v32  ;;  %1432 = vmatpush.msk.msra.mxu3 %vm387_vm0, %v375_v33  ;;  %v60_v32 = vld [vmem:[%s2758_s0 + $0x128] sm:$0xff] }
  0x94   :  { %761 = vmatpush.msra.mxu0 %v332_v34  ;;  %783 = vmatpush.msra.mxu1 %v349_v35 }
  0x95   :  { %807 = vmatpush.msra.mxu2 %v364_v36  ;;  %836 = vmatpush.msra.mxu3 %v374_v37 }
  0x96   :  { %762 = vmatpush.msra.mxu0 %v331_v38  ;;  %784 = vmatpush.msra.mxu1 %v348_v39 }
  0x97   :  { %808 = vmatpush.msra.mxu2 %v363_v40  ;;  %686 = vmatmul.f32.gmra.mxu0 %v55_v41  ;;  %v1505_v41 = vld [vmem:[%s2759_s2] ss:$0 sm:$0xff] }
  0x98   :  { %732 = vmatmul.f32.gmra.mxu2 %v57_v42  ;;  %763 = vmatpush.msra.mxu0 %v330_v43 }
  0x99   :  { %785 = vmatpush.msra.mxu1 %v347_v44  ;;  %809 = vmatpush.msra.mxu2 %v362_v45 }
  0x9a   :  { %709 = vmatmul.f32.gmra.mxu1 %v56_v46  ;;  %755 = vmatmul.f32.gmra.mxu3 %v58_v47 }
  0x9b   :  { %764 = vmatpush.msra.mxu0 %v329_v48  ;;  %786 = vmatpush.msra.mxu1 %v346_v49 }
  0x9c   :  { %810 = vmatpush.msra.mxu2 %v361_v50  ;;  %837 = vmatpush.msra.mxu3 %v373_v51 }
  0x9d   :  { %765 = vmatpush.msra.mxu0 %v328_v52  ;;  %787 = vmatpush.msra.mxu1 %v345_v53 }
  0x9e   :  { %811 = vmatpush.msra.mxu2 %v360_v54  ;;  %838 = vmatpush.msra.mxu3 %v372_v55 }
  0x9f   :  { %766 = vmatpush.msra.mxu0 %v327_v56  ;;  %788 = vmatpush.msra.mxu1 %v344_v57 }
  0xa0   :  { %812 = vmatpush.msra.mxu2 %v359_v58  ;;  %839 = vmatpush.msra.mxu3 %v371_v59 }
  0xa1   :  { %767 = vmatpush.msra.mxu0 %v326_v60  ;;  %789 = vmatpush.msra.mxu1 %v343_v61 }
  0xa2   :  { %813 = vmatpush.msra.mxu2 %v358_v62  ;;  %840 = vmatpush.msra.mxu3 %v370_v63 }
  0xa3   :  { %768 = vmatpush.msra.mxu0 %v325_v0  ;;  %790 = vmatpush.msra.mxu1 %v342_v1 }
  0xa4   :  { %814 = vmatpush.msra.mxu2 %v357_v2  ;;  %841 = vmatpush.msra.mxu3 %v369_v3 }
  0xa5   :  { %769 = vmatpush.msra.mxu0 %v324_v4  ;;  %791 = vmatpush.msra.mxu1 %v341_v5 }
  0xa6   :  { %815 = vmatpush.msra.mxu2 %v356_v6  ;;  %842 = vmatpush.msra.mxu3 %v368_v7 }
  0xa7   :  { %770 = vmatpush.msra.mxu0 %v323_v8  ;;  %792 = vmatpush.msra.mxu1 %v340_v9  ;;  %v851_v8 = vld [vmem:[%s2760_s4] sm:$0x3]  ;;  %v1438_v9 = vld [vmem:[%s2760_s4 + $0x2] sm:$0x3] }
  0xa8   :  { %816 = vmatpush.msra.mxu2 %v355_v10  ;;  %843 = vmatpush.msra.mxu3 %v367_v11 }
  0xa9   :  { %771 = vmatpush.msra.mxu0 %v322_v12  ;;  %793 = vmatpush.msra.mxu1 %v339_v13 }
  0xaa   :  { %817 = vmatpush.msra.mxu2 %v354_v14  ;;  %1433 = vmatmul.msk.f32.vlgmr.msra.gmra.mxu3 %vm380_vm1, %v42_v15 }
  0xab   :  { %772 = vmatpush.msra.mxu0 %v321_v16  ;;  %794 = vmatpush.msra.mxu1 %v338_v17 }
  0xac   :  { %818 = vmatpush.msra.mxu2 %v353_v18  ;;  %1435 = vmatpush.msk.msrb.mxu3 %vm859_vm2, %v851_v8 }
  0xad   :  { %773 = vmatpush.msra.mxu0 %v320_v19  ;;  %795 = vmatpush.msra.mxu1 %v337_v20 }
  0xae   :  { %819 = vmatpush.msra.mxu2 %v352_v21  ;;  %v1448_v21 = vld [vmem:[%s2760_s4 + $0x4] sm:$0x3] }
  0xaf   :  { %774 = vmatpush.msra.mxu0 %v319_v22  ;;  %796 = vmatpush.msra.mxu1 %v336_v23 }
  0xb0   :  { %820 = vmatpush.msra.mxu2 %v351_v24  ;;  %775 = vmatmul.f32.vlgmr.msra.gmra.mxu0 %v39_v25 }
  0xb1   :  { %821 = vmatmul.f32.vlgmr.msra.gmra.mxu2 %v41_v26  ;;  %797 = vmatpush.msra.mxu1 %v335_v27 }
  0xb2   :  { %798 = vmatmul.f32.vlgmr.msra.gmra.mxu1 %v40_v28  ;;  %1434 = vmatmul.msk.f32.gmra.mxu3 %vm380_vm1, %v62_v29 }
  0xb3   :  { %1439 = vmatpush.msk.msrb.mxu0 %vm859_vm2, %v1438_v9  ;;  %1504 = vmatpush.msk.msrb.mxu1 %vm859_vm2, %v1438_v9  ;;  %v1468_v9 = vld [vmem:[%s2761_s3 + $0x40] sm:$0xff] }
  0xb4   :  { %1449 = vmatpush.msk.msra.mxu3 %vm859_vm2, %v1448_v21  ;;  %v1485_v21 = vld [vmem:[%s2761_s3 + $0x68] sm:$0xff] }
  0xb8   :  { %778 = vmatmul.f32.gmra.mxu0 %v59_v30 }
  0xb9   :  { %824 = vmatmul.f32.gmra.mxu2 %v61_v31  ;;  %v408_v33 = vpop.f32.mrf.mxu0 }
  0xba   :  { %801 = vmatmul.f32.gmra.mxu1 %v60_v32  ;;  %v409_v42 = vadd.f32 %v1505_v41, %v408_v33 }
  0xbc   :  { %v431_v34 = vpop.f32.mrf.mxu1 }
  0xbd   :  { %v454_v36 = vpop.f32.mrf.mxu2  ;;  %v432_v46 = vadd.f32 %v431_v34, %v409_v42 }
  0xbf   :  { %v455_v49 = vadd.f32 %v454_v36, %v432_v46 }
  0xc0   :  { %v477_v35 = vpop.f32.mrf.mxu3 }
  0xc1   :  { %v478_v54 = vadd.f32 %v477_v35, %v455_v49 }
  0xc3   :  { %v411_v37 = vpop.f32.mrf.mxu0 }
  0xc4   :  { %v412_v47 = vadd.f32 %v1505_v41, %v411_v37 }
  0xc6   :  { %v434_v38 = vpop.f32.mrf.mxu1 }
  0xc7   :  { %v457_v40 = vpop.f32.mrf.mxu2  ;;  %v435_v50 = vadd.f32 %v434_v38, %v412_v47  ;;  %v1464_v47 = vld [vmem:[%s2760_s4 + $0x8] sm:$0x3] }
  0xc9   :  { %v458_v55 = vadd.f32 %v457_v40, %v435_v50 }
  0xca   :  { %v480_v39 = vpop.f32.mrf.mxu3 }
  0xcb   :  { %v481_v57 = vadd.f32 %v480_v39, %v458_v55  ;;  %v1496_v55 = vld [vmem:[%s2760_s4 + $0x10] sm:$0x3] }
  0xcd   :  { %v500_v43 = vpop.f32.mrf.mxu0 }
  0xce   :  { %v501_v58 = vadd.f32 %v500_v43, %v478_v54  ;;  %v1480_v54 = vld [vmem:[%s2760_s4 + $0xc] sm:$0x3] }
  0xd0   :  { %v523_v44 = vpop.f32.mrf.mxu1 }
  0xd1   :  { %v546_v48 = vpop.f32.mrf.mxu2  ;;  %v524_v60 = vadd.f32 %v523_v44, %v501_v58  ;;  %v1442_v58 = vld [vmem:[%s2761_s3 + $0x10] sm:$0xff] }
  0xd3   :  { %v547_v1 = vadd.f32 %v546_v48, %v524_v60  ;;  %v1456_v60 = vld [vmem:[%s2760_s4 + $0x6] sm:$0x3] }
  0xd4   :  { %v569_v45 = vpop.f32.mrf.mxu3 }
  0xd5   :  { %v570_v4 = vadd.f32 %v569_v45, %v547_v1 }
  0xdd   :  { %v503_v51 = vpop.f32.mrf.mxu0 }
  0xde   :  { %v504_v61 = vadd.f32 %v503_v51, %v481_v57 }
  0xe0   :  { %v526_v52 = vpop.f32.mrf.mxu1 }
  0xe1   :  { %v527_v2 = vadd.f32 %v526_v52, %v504_v61  ;;  %v1472_v61 = vld [vmem:[%s2760_s4 + $0xa] sm:$0x3] }
  0xe3   :  { %v549_v56 = vpop.f32.mrf.mxu2 }
  0xe4   :  { %v550_v5 = vadd.f32 %v549_v56, %v527_v2  ;;  %v887_v2 = vld [vmem:[%s2761_s3 + $0x8] sm:$0xff] }
  0xe6   :  { %v572_v53 = vpop.f32.mrf.mxu3 }
  0xe7   :  { %v592_v59 = vpop.f32.mrf.mxu0  ;;  %v573_v11 = vadd.f32 %v572_v53, %v550_v5  ;;  %v1452_v5 = vld [vmem:[%s2761_s3 + $0x20] sm:$0xff] }
  0xe8   :  { %v593_v7 = vadd.f32 %v592_v59, %v570_v4 }
  0xea   :  { %v615_v62 = vpop.f32.mrf.mxu1 }
  0xeb   :  { %v616_v13 = vadd.f32 %v615_v62, %v593_v7  ;;  %v1453_v7 = vld [vmem:[%s2761_s3 + $0x28] sm:$0xff] }
  0xed   :  { %v638_v0 = vpop.f32.mrf.mxu2 }
  0xee   :  { %v639_v15 = vadd.f32 %v638_v0, %v616_v13  ;;  %v1443_v0 = vld [vmem:[%s2761_s3 + $0x18] sm:$0xff] }
  0xf0   :  { %v661_v63 = vpop.f32.mrf.mxu3 }
  0xf1   :  { %v662_v19 = vadd.f32 %v661_v63, %v639_v15  ;;  %v886_v63 = vld [vmem:[%s2761_s3] sm:$0xff] }
  0xf3   :  { %v595_v3 = vpop.f32.mrf.mxu0 }
  0xf4   :  { %v596_v16 = vadd.f32 %v595_v3, %v573_v11  ;;  %v1488_v3 = vld [vmem:[%s2760_s4 + $0xe] sm:$0x3] }
  0xf6   :  { %v618_v6 = vpop.f32.mrf.mxu1 }
  0xf7   :  { %v641_v12 = vpop.f32.mrf.mxu2  ;;  %v619_v20 = vadd.f32 %v618_v6, %v596_v16  ;;  %v1469_v16 = vld [vmem:[%s2761_s3 + $0x48] sm:$0xff] }
  0xf9   :  { %v642_v24 = vadd.f32 %v641_v12, %v619_v20  ;;  %v1460_v20 = vld [vmem:[%s2761_s3 + $0x30] sm:$0xff] }
  0xfa   :  { %v664_v10 = vpop.f32.mrf.mxu3 }
  0xfb   :  { %v665_v28 = vadd.f32 %v664_v10, %v642_v24  ;;  %v1500_v24 = vld [vmem:[%s2761_s3 + $0x80] sm:$0xff] }
 0x10b   :  { %v684_v14 = vpop.f32.mrf.mxu0 }
 0x10c   :  { %v685_v23 = vadd.f32 %v684_v14, %v662_v19 }
 0x10e   :  { %v707_v17 = vpop.f32.mrf.mxu1 }
 0x10f   :  { %v708_v26 = vadd.f32 %v707_v17, %v685_v23  ;;  %v1461_v23 = vld [vmem:[%s2761_s3 + $0x38] sm:$0xff] }
 0x111   :  { %v730_v22 = vpop.f32.mrf.mxu2 }
 0x112   :  { %v731_v29 = vadd.f32 %v730_v22, %v708_v26  ;;  %v1476_v26 = vld [vmem:[%s2761_s3 + $0x50] sm:$0xff] }
 0x114   :  { %v753_v18 = vpop.f32.mrf.mxu3  ;;  %v687_v25 = vpop.f32.mrf.mxu0 }
 0x115   :  { %v688_v31 = vadd.f32 %v687_v25, %v665_v28  ;;  %v754_v33 = vadd.f32 %v753_v18, %v731_v29  ;;  %v1484_v18 = vld [vmem:[%s2761_s3 + $0x60] sm:$0xff]  ;;  %v1477_v29 = vld [vmem:[%s2761_s3 + $0x58] sm:$0xff] }
 0x117   :  { %v710_v27 = vpop.f32.mrf.mxu1 }
 0x118   :  { %v711_v35 = vadd.f32 %v710_v27, %v688_v31  ;;  %v1501_v27 = vld [vmem:[%s2761_s3 + $0x88] sm:$0xff]  ;;  %v1492_v31 = vld [vmem:[%s2761_s3 + $0x70] sm:$0xff] }
 0x11b   :  { %v733_v32 = vpop.f32.mrf.mxu2 }
 0x11c   :  { %v734_v38 = vadd.f32 %v733_v32, %v711_v35  ;;  %v1493_v32 = vld [vmem:[%s2761_s3 + $0x78] sm:$0xff] }
 0x11d   :  { %v756_v30 = vpop.f32.mrf.mxu3 }
 0x11e   :  { %v757_v42 = vadd.f32 %v756_v30, %v734_v38 }
 0x12d   :  { %v776_v34 = vpop.f32.mrf.mxu0  ;;  %v845_v39 = vpop.f32.mrf.mxu3 }
 0x12e   :  { %v777_v36 = vadd.f32 %v776_v34, %v754_v33 }
 0x12f   :  { %v799_v37 = vpop.f32.mrf.mxu1 }
 0x130   :  { %v800_v40 = vadd.f32 %v799_v37, %v777_v36 }
 0x134   :  { %v822_v41 = vpop.f32.mrf.mxu2 }
 0x135   :  { %v823_v43 = vadd.f32 %v822_v41, %v800_v40  ;;  %v779_v44 = vpop.f32.mrf.mxu0  ;;  %v848_v51 = vpop.f32.mrf.mxu3 }
 0x136   :  { %v780_v45 = vadd.f32 %v779_v44, %v757_v42 }
 0x137   :  { %v2623_v46 = vadd.f32 %v845_v39, %v823_v43  ;;  %v802_v48 = vpop.f32.mrf.mxu1 }
 0x138   :  { %v803_v49 = vadd.f32 %v802_v48, %v780_v45 }
 0x139   :  { %1436 = vmatmul.msk.f32.vlgmr.msrb.gmra.mxu3 %vm852_vm3, %v2623_v46  ;;  %1440 = vmatmul.msk.f32.vlgmr.msrb.gmra.mxu0 %vm852_vm3, %v2623_v46 }
 0x13a   :  { %1465 = vmatpush.msk.msrb.mxu3 %vm859_vm2, %v1464_v47 }
 0x13c   :  { %v825_v50 = vpop.f32.mrf.mxu2 }
 0x13d   :  { %v826_v52 = vadd.f32 %v825_v50, %v803_v49 }
 0x13f   :  { %v849_v53 = vadd.f32 %v848_v51, %v826_v52 }
 0x141   :  { %1437 = vmatmul.msk.f32.gmra.mxu3 %vm852_vm3, %v849_v53  ;;  %1441 = vmatmul.msk.f32.vlgmr.msrb.gmra.mxu1 %vm852_vm3, %v849_v53 }
 0x149   :  { %1450 = vmatmul.msk.f32.vlgmr.msra.gmra.mxu3 %vm852_vm3, %v2623_v46 }
 0x14a   :  { %1481 = vmatpush.msk.msra.mxu3 %vm859_vm2, %v1480_v54 }
 0x151   :  { %1451 = vmatmul.msk.f32.gmra.mxu3 %vm852_vm3, %v849_v53 }
 0x159   :  { %1466 = vmatmul.msk.f32.vlgmr.msrb.gmra.mxu3 %vm852_vm3, %v2623_v46 }
 0x15a   :  { %1497 = vmatpush.msk.msrb.mxu3 %vm859_vm2, %v1496_v55 }
 0x161   :  { %1467 = vmatmul.msk.f32.gmra.mxu3 %vm852_vm3, %v849_v53 }
 0x169   :  { %1482 = vmatmul.msk.f32.vlgmr.msra.gmra.mxu3 %vm852_vm3, %v2623_v46 }
 0x171   :  { %1483 = vmatmul.msk.f32.gmra.mxu3 %vm852_vm3, %v849_v53 }
 0x179   :  { %1498 = vmatmul.msk.f32.vlgmr.msrb.gmra.mxu3 %vm852_vm3, %v2623_v46 }
 0x181   :  { %1499 = vmatmul.msk.f32.gmra.mxu3 %vm852_vm3, %v849_v53 }
 0x1b6   :  { %v910_v59 = vpop.f32.mrf.mxu0 }
 0x1bc   :  { %v880_v56 = vpop.f32.mrf.mxu3 }
 0x1be   :  { %v913_v57 = vpop.f32.mrf.mxu1 }
 0x1bf   :  { %940 = vmatpush.msra.mxu1 %v913_v57 }
 0x1c1   :  { %941 = vmatpush.msra.mxu1 %v910_v59 }
 0x1c2   :  { %1444 = vmatmul.msk.f32.vlgmr.msra.gmra.mxu1 %vm919_vm4, %v1442_v58  ;;  %v1506_v58 = vld [vmem:[%s2762_s5] ss:$0 sm:$0xff] }
 0x1c3   :  { %1457 = vmatpush.msk.msrb.mxu1 %vm859_vm2, %v1456_v60 }
 0x1c4   :  { %v883_v62 = vpop.f32.mrf.mxu3 }
 0x1c5   :  { %1473 = vmatpush.msk.msra.mxu1 %vm859_vm2, %v1472_v61  ;;  %969 = vmatpush.msrb.mxu2 %v883_v62  ;;  %v1418_v61 = vlaneseq }
 0x1c7   :  { %970 = vmatpush.msrb.mxu2 %v880_v56 }
 0x1c8   :  { %1446 = vmatmul.msk.f32.vlgmr.msrb.gmra.mxu2 %vm919_vm4, %v886_v63 }
 0x1ca   :  { %1445 = vmatmul.msk.f32.gmra.mxu1 %vm919_vm4, %v1443_v0  ;;  %v1419_v0 = vand.u32 127, %v1418_v61 }
 0x1cc   :  { %v1000_v1 = vpop.f32.mrf.mxu3  ;;  %vm1420_vm5 = vcmp.lt.s32.totalorder %v1419_v0, 4 }
 0x1d0   :  { %1447 = vmatmul.msk.f32.gmra.mxu2 %vm919_vm4, %v887_v2 }
 0x1d2   :  { %1458 = vmatmul.msk.f32.vlgmr.msrb.gmra.mxu1 %vm852_vm3, %v2623_v46 }
 0x1d3   :  { %1489 = vmatpush.msk.msrb.mxu1 %vm859_vm2, %v1488_v3 }
 0x1d4   :  { %v1003_v4 = vpop.f32.mrf.mxu3 }
 0x1d5   :  { %1029 = vmatpush.msra.mxu0 %v1003_v4 }
 0x1d7   :  { %1030 = vmatpush.msra.mxu0 %v1000_v1 }
 0x1d8   :  { %1454 = vmatmul.msk.f32.vlgmr.msra.gmra.mxu0 %vm919_vm4, %v1452_v5 }
 0x1da   :  { %1459 = vmatmul.msk.f32.gmra.mxu1 %vm852_vm3, %v849_v53 }
 0x1dc   :  { %v1124_v6 = vpop.f32.mrf.mxu3 }
 0x1e0   :  { %1455 = vmatmul.msk.f32.gmra.mxu0 %vm919_vm4, %v1453_v7 }
 0x1e2   :  { %1474 = vmatmul.msk.f32.vlgmr.msra.gmra.mxu1 %vm852_vm3, %v2623_v46 }
 0x1e4   :  { %v1127_v8 = vpop.f32.mrf.mxu3 }
 0x1e5   :  { %1153 = vmatpush.msrb.mxu0 %v1127_v8 }
 0x1e7   :  { %1154 = vmatpush.msrb.mxu0 %v1124_v6 }
 0x1e8   :  { %1470 = vmatmul.msk.f32.vlgmr.msrb.gmra.mxu0 %vm919_vm4, %v1468_v9 }
 0x1ea   :  { %1475 = vmatmul.msk.f32.gmra.mxu1 %vm852_vm3, %v849_v53 }
 0x1ec   :  { %v1248_v10 = vpop.f32.mrf.mxu3 }
 0x1f0   :  { %1471 = vmatmul.msk.f32.gmra.mxu0 %vm919_vm4, %v1469_v16 }
 0x1f2   :  { %1490 = vmatmul.msk.f32.vlgmr.msrb.gmra.mxu1 %vm852_vm3, %v2623_v46 }
 0x1f4   :  { %v1251_v11 = vpop.f32.mrf.mxu3 }
 0x1f5   :  { %1277 = vmatpush.msra.mxu0 %v1251_v11 }
 0x1f7   :  { %1278 = vmatpush.msra.mxu0 %v1248_v10 }
 0x1f8   :  { %1486 = vmatmul.msk.f32.vlgmr.msra.gmra.mxu0 %vm919_vm4, %v1484_v18 }
 0x1fa   :  { %1491 = vmatmul.msk.f32.gmra.mxu1 %vm852_vm3, %v849_v53 }
 0x1fc   :  { %v1372_v12 = vpop.f32.mrf.mxu3 }
 0x200   :  { %1487 = vmatmul.msk.f32.gmra.mxu0 %vm919_vm4, %v1485_v21 }
 0x204   :  { %v1375_v13 = vpop.f32.mrf.mxu3 }
 0x205   :  { %1401 = vmatpush.msrb.mxu0 %v1375_v13 }
 0x207   :  { %1402 = vmatpush.msrb.mxu0 %v1372_v12 }
 0x208   :  { %1502 = vmatmul.msk.f32.vlgmr.msrb.gmra.mxu0 %vm919_vm4, %v1500_v24 }
 0x210   :  { %1503 = vmatmul.msk.f32.gmra.mxu0 %vm919_vm4, %v1501_v27 }
 0x23f   :  { %v943_v14 = vpop.f32.mrf.mxu1 }
 0x247   :  { %v946_v15 = vpop.f32.mrf.mxu1 }
 0x24b   :  { %v972_v34 = vpop.f32.mrf.mxu2 }
 0x24c   :  { %v973_v43 = vadd.f32 %v972_v34, %v943_v14 }
 0x24f   :  { %v1062_v17 = vpop.f32.mrf.mxu1 }
 0x253   :  { %v975_v37 = vpop.f32.mrf.mxu2 }
 0x254   :  { %v976_v48 = vadd.f32 %v975_v37, %v946_v15 }
 0x255   :  { %v1032_v33 = vpop.f32.mrf.mxu0 }
 0x256   :  { %v1038_v44 = vadd.f32 %v1032_v33, %v973_v43 }
 0x257   :  { %v1065_v19 = vpop.f32.mrf.mxu1 }
 0x258   :  { %1091 = vmatpush.msra.mxu2 %v1065_v19 }
 0x25a   :  { %1092 = vmatpush.msra.mxu2 %v1062_v17 }
 0x25b   :  { %1462 = vmatmul.msk.f32.vlgmr.msra.gmra.mxu2 %vm919_vm4, %v1460_v20 }
 0x25d   :  { %v1035_v35 = vpop.f32.mrf.mxu0 }
 0x25e   :  { %v1039_v50 = vadd.f32 %v1035_v35, %v976_v48 }
 0x25f   :  { %v1186_v22 = vpop.f32.mrf.mxu1 }
 0x263   :  { %1463 = vmatmul.msk.f32.gmra.mxu2 %vm919_vm4, %v1461_v23 }
 0x265   :  { %v1156_v36 = vpop.f32.mrf.mxu0 }
 0x267   :  { %v1189_v25 = vpop.f32.mrf.mxu1 }
 0x268   :  { %1215 = vmatpush.msrb.mxu2 %v1189_v25 }
 0x26a   :  { %1216 = vmatpush.msrb.mxu2 %v1186_v22 }
 0x26b   :  { %1478 = vmatmul.msk.f32.vlgmr.msrb.gmra.mxu2 %vm919_vm4, %v1476_v26 }
 0x26d   :  { %v1159_v39 = vpop.f32.mrf.mxu0 }
 0x26f   :  { %v1310_v28 = vpop.f32.mrf.mxu1 }
 0x273   :  { %1479 = vmatmul.msk.f32.gmra.mxu2 %vm919_vm4, %v1477_v29 }
 0x275   :  { %v1280_v41 = vpop.f32.mrf.mxu0 }
 0x277   :  { %v1313_v30 = vpop.f32.mrf.mxu1 }
 0x278   :  { %1339 = vmatpush.msra.mxu2 %v1313_v30 }
 0x27a   :  { %1340 = vmatpush.msra.mxu2 %v1310_v28 }
 0x27b   :  { %1494 = vmatmul.msk.f32.vlgmr.msra.gmra.mxu2 %vm919_vm4, %v1492_v31 }
 0x27d   :  { %v1283_v45 = vpop.f32.mrf.mxu0 }
 0x283   :  { %1495 = vmatmul.msk.f32.gmra.mxu2 %vm919_vm4, %v1493_v32 }
 0x285   :  { %v1404_v53 = vpop.f32.mrf.mxu0 }
 0x28d   :  { %v1407_v2 = vpop.f32.mrf.mxu0 }
 0x2de   :  { %v1094_v38 = vpop.f32.mrf.mxu2 }
 0x2df   :  { %v1100_v46 = vadd.f32 %v1094_v38, %v1038_v44 }
 0x2e1   :  { %v1162_v49 = vadd.f32 %v1156_v36, %v1100_v46 }
 0x2e6   :  { %v1097_v40 = vpop.f32.mrf.mxu2 }
 0x2e7   :  { %v1101_v52 = vadd.f32 %v1097_v40, %v1039_v50 }
 0x2e9   :  { %v1163_v56 = vadd.f32 %v1159_v39, %v1101_v52 }
 0x2ee   :  { %v1218_v42 = vpop.f32.mrf.mxu2 }
 0x2ef   :  { %v1224_v51 = vadd.f32 %v1218_v42, %v1162_v49 }
 0x2f1   :  { %v1286_v54 = vadd.f32 %v1280_v41, %v1224_v51 }
 0x2f6   :  { %v1221_v47 = vpop.f32.mrf.mxu2 }
 0x2f7   :  { %v1225_v59 = vadd.f32 %v1221_v47, %v1163_v56 }
 0x2f9   :  { %v1287_v63 = vadd.f32 %v1283_v45, %v1225_v59 }
 0x2fe   :  { %v1342_v55 = vpop.f32.mrf.mxu2 }
 0x2ff   :  { %v1348_v57 = vadd.f32 %v1342_v55, %v1286_v54 }
 0x301   :  { %v1410_v60 = vadd.f32 %v1404_v53, %v1348_v57 }
 0x303   :  { %v1416_v62 = vadd.f32 %v1506_v58, %v1410_v60 }
 0x305   :  { %1507 = vtanh.f32 %v1416_v62 }
 0x306   :  { %v1345_v1 = vpop.f32.mrf.mxu2 }
 0x307   :  { %v1349_v3 = vadd.f32 %v1345_v1, %v1287_v63 }
 0x309   :  { %v1411_v4 = vadd.f32 %v1407_v2, %v1349_v3 }
 0x30b   :  { %v1508_v5 = vpop.eup %1507  ;;  %v1417_v6 = vadd.f32 %v1506_v58, %v1411_v4 }
 0x30c   :  { %v1423_v7 = vsel %vm1420_vm5, %v1416_v62, %v1508_v5 }
 0x30d   :  { %1426 = vst.msk [vmem:[%s2763_s6] sm:$0xff] %vm1425_vm6, %v1423_v7  ;;  %1509 = vtanh.f32 %v1417_v6 }
 0x313   :  { %v1510_v8 = vpop.eup %1509 }
 0x314   :  { %v1424_v9 = vsel %vm1420_vm5, %v1417_v6, %v1510_v8 }
 0x315   :  { %1427 = vst.msk [vmem:[%s2763_s6 + $0x8] sm:$0xff] %vm1425_vm6, %v1424_v9 }

</bundles_post_ra>
